<compile_context>
chip_gen: v5e
topology: v5e:2x2
jax: 0.10.0
libtpu: 0.0.40
codegen_flags: <defaults>
</compile_context>

<pallas_src>
import numpy as np
import jax
import jax.numpy as jnp
from jax.experimental import pallas as pl
from jax.experimental.pallas import tpu as pltpu

# ---------------- small ViT config (consistent with the module) -------------
IMG = 16          # img_size
PATCH = 4         # patch_size
IN_CH = 3         # in_chans
EMBED = 64        # embed_dim
DEPTH = 2         # depth
HEADS = 4         # num_heads
MLP_RATIO = 4.0
NUM_CLASSES = 16
B = 2

HD = EMBED // HEADS                       # head_dim = 16
NP = (IMG // PATCH) ** 2                  # num_patches = 16
SEQ = NP + 1                              # +1 class token = 17
BS = B * SEQ                              # flattened token rows = 34
HIDDEN = int(EMBED * MLP_RATIO)           # 256
LN_EPS = 1e-6
ATTN_SCALE = HD ** (-0.5)
PATCH_DIM = IN_CH * PATCH * PATCH         # 48
NEG_INF = -1e30

# additive attention bias: 0 within an image, -1e30 across images
_row_batch = np.concatenate([np.repeat(np.arange(B), NP), np.arange(B)])
ATTN_BIAS_NP = np.where(_row_batch[:, None] == _row_batch[None, :],
                        0.0, NEG_INF).astype(np.float32)


# ------------------------------ in-kernel helpers ----------------------------
def _layernorm(v, g, b):
    mu = jnp.mean(v, axis=-1, keepdims=True)
    var = jnp.mean((v - mu) ** 2, axis=-1, keepdims=True)
    return (v - mu) * jax.lax.rsqrt(var + LN_EPS) * g + b


def _gelu_exact(x):
    # matches torch.nn.GELU() (erf formulation)
    return 0.5 * x * (1.0 + jax.lax.erf(x * (2.0 ** -0.5)))


# ------------------------------ fused ViT kernel ------------------------------
def _vit_kernel(patches_ref, w_patch_ref, b_patch_ref, pos_patch_ref,
                cls_base_ref, bias_ref,
                ln1g_ref, ln1b_ref,
                wq_ref, bq_ref, wk_ref, bk_ref, wv_ref, bv_ref,
                wproj_ref, bproj_ref,
                ln2g_ref, ln2b_ref,
                wfc1_ref, bfc1_ref, wfc2_ref, bfc2_ref,
                lnfg_ref, lnfb_ref, whead_ref, bhead_ref,
                o_ref,
                tok_ref, attn_ref):
    d = pl.program_id(0)

    # ---- step 0: patch embedding + cls token + positional embedding ---------
    @pl.when(d == 0)
    def _():
        emb = (jnp.dot(patches_ref[...], w_patch_ref[...],
                       preferred_element_type=jnp.float32)
               + b_patch_ref[...])                          # (B*NP, EMBED)
        tok_ref[0:B * NP, :] = emb + pos_patch_ref[...]     # patch tokens
        tok_ref[B * NP:BS, :] = cls_base_ref[...]           # cls tokens (+pos)

    x = tok_ref[...]                                        # (BS, EMBED)

    # ---- attention branch ----------------------------------------------------
    xn = _layernorm(x, ln1g_ref[0], ln1b_ref[0])
    q = jnp.dot(xn, wq_ref[0], preferred_element_type=jnp.float32) + bq_ref[0]
    k = jnp.dot(xn, wk_ref[0], preferred_element_type=jnp.float32) + bk_ref[0]
    v = jnp.dot(xn, wv_ref[0], preferred_element_type=jnp.float32) + bv_ref[0]
    bias = bias_ref[...]                                    # (BS, BS)

    for h in range(HEADS):                                  # static unroll
        sl = slice(h * HD, (h + 1) * HD)
        qh, kh, vh = q[:, sl], k[:, sl], v[:, sl]           # (BS, HD)
        s = jax.lax.dot_general(
            qh, kh, (((1,), (1,)), ((), ())),
            preferred_element_type=jnp.float32) * ATTN_SCALE + bias  # (BS, BS)
        s = s - jnp.max(s, axis=-1, keepdims=True)
        e = jnp.exp(s)
        p = e * pl.reciprocal(jnp.sum(e, axis=-1, keepdims=True), approx=True)
        attn_ref[:, sl] = jnp.dot(p, vh, preferred_element_type=jnp.float32)

    # single full-width output projection on the concatenated heads
    attn = (jnp.dot(attn_ref[...], wproj_ref[0],
                    preferred_element_type=jnp.float32) + bproj_ref[0])
    x = x + attn                                            # residual 1

    # ---- MLP branch -----------------------------------------------------------
    xn2 = _layernorm(x, ln2g_ref[0], ln2b_ref[0])
    h1 = (jnp.dot(xn2, wfc1_ref[0], preferred_element_type=jnp.float32)
          + bfc1_ref[0])
    h1 = _gelu_exact(h1)
    h2 = (jnp.dot(h1, wfc2_ref[0], preferred_element_type=jnp.float32)
          + bfc2_ref[0])
    x_out = x + h2                                          # residual 2
    tok_ref[...] = x_out                                    # stays in VMEM

    # ---- last step: final LayerNorm + classification head on cls tokens ------
    @pl.when(d == DEPTH - 1)
    def _():
        cls_tok = x_out[B * NP:BS, :]                       # (B, EMBED)
        xn_f = _layernorm(cls_tok, lnfg_ref[...], lnfb_ref[...])
        o_ref[...] = (jnp.dot(xn_f, whead_ref[...],
                              preferred_element_type=jnp.float32)
                      + bhead_ref[...])


# ------------------------------ wrapper / specs -------------------------------
def _const_spec(shape):
    nd = len(shape)
    return pl.BlockSpec(shape, lambda d, _n=nd: (0,) * _n)


def _depth_spec(shape):
    nd = len(shape)
    return pl.BlockSpec((1,) + tuple(shape[1:]),
                        lambda d, _n=nd: (d,) + (0,) * (_n - 1))


def extract_patches(x):
    # x: (B, C, H, W) NCHW -> (B*NP, C*p*p), batch-major, row-major spatial
    Hp = IMG // PATCH
    x = x.reshape(B, IN_CH, Hp, PATCH, Hp, PATCH)
    x = x.transpose(0, 2, 4, 1, 3, 5)                   # (B, Hp, Wp, C, p, p)
    return x.reshape(B * NP, PATCH_DIM)


def vit_forward(x, params):
    patches = extract_patches(x)                         # (B*NP, PATCH_DIM)
    pos = params["pos_embed"][0]                         # (SEQ, EMBED)
    pos_patch = jnp.tile(pos[1:], (B, 1))                # (B*NP, EMBED)
    cls_base = jnp.broadcast_to(params["cls_token"] + pos[0:1], (B, EMBED))
    bias = jnp.asarray(ATTN_BIAS_NP)

    const_in = [patches, params["w_patch"], params["b_patch"],
                pos_patch, cls_base, bias]
    depth_in = [params[k] for k in (
        "ln1_g", "ln1_b", "wq", "bq", "wk", "bk", "wv", "bv",
        "wproj", "bproj", "ln2_g", "ln2_b",
        "wfc1", "bfc1", "wfc2", "bfc2")]
    head_in = [params["lnf_g"], params["lnf_b"],
               params["w_head"], params["b_head"]]

    in_specs = ([_const_spec(a.shape) for a in const_in]
                + [_depth_spec(a.shape) for a in depth_in]
                + [_const_spec(a.shape) for a in head_in])

    return pl.pallas_call(
        _vit_kernel,
        grid=(DEPTH,),
        out_shape=jax.ShapeDtypeStruct((B, NUM_CLASSES), jnp.float32),
        in_specs=in_specs,
        out_specs=pl.BlockSpec((B, NUM_CLASSES), lambda d: (0, 0)),
        scratch_shapes=[pltpu.VMEM((BS, EMBED), jnp.float32),   # tokens
                        pltpu.VMEM((BS, EMBED), jnp.float32)],  # head concat
        compiler_params=pltpu.CompilerParams(
            dimension_semantics=("arbitrary",)),  # sequential over depth
    )(*const_in, *depth_in, *head_in)


# ------------------------------ parameter init --------------------------------
def init_params(key):
    ks = iter(jax.random.split(key, 4 + 6 * DEPTH))
    rnd = lambda shape: 0.02 * jax.random.normal(next(ks), shape, jnp.float32)
    ones = lambda shape: jnp.ones(shape, jnp.float32)
    zeros = lambda shape: jnp.zeros(shape, jnp.float32)

    params = {
        # conv weight (E, C, p, p) flattened to (C*p*p, E)
        "w_patch": rnd((PATCH_DIM, EMBED)),
        "b_patch": zeros((1, EMBED)),
        "cls_token": zeros((1, EMBED)),               # torch.zeros
        "pos_embed": rnd((1, SEQ, EMBED)),            # randn * 0.02
        "lnf_g": ones((1, EMBED)),
        "lnf_b": zeros((1, EMBED)),
        "w_head": rnd((EMBED, NUM_CLASSES)),
        "b_head": zeros((1, NUM_CLASSES)),
    }

    def stack_rnd(shape):
        return jnp.stack([rnd(shape) for _ in range(DEPTH)], axis=0)

    params.update({
        "ln1_g": ones((DEPTH, 1, EMBED)), "ln1_b": zeros((DEPTH, 1, EMBED)),
        "wq": stack_rnd((EMBED, EMBED)), "bq": zeros((DEPTH, 1, EMBED)),
        "wk": stack_rnd((EMBED, EMBED)), "bk": zeros((DEPTH, 1, EMBED)),
        "wv": stack_rnd((EMBED, EMBED)), "bv": zeros((DEPTH, 1, EMBED)),
        "wproj": stack_rnd((EMBED, EMBED)), "bproj": zeros((DEPTH, 1, EMBED)),
        "ln2_g": ones((DEPTH, 1, EMBED)), "ln2_b": zeros((DEPTH, 1, EMBED)),
        "wfc1": stack_rnd((EMBED, HIDDEN)), "bfc1": zeros((DEPTH, 1, HIDDEN)),
        "wfc2": stack_rnd((HIDDEN, EMBED)), "bfc2": zeros((DEPTH, 1, EMBED)),
    })
    return params


# TODO(synk): dropout / drop-path / LayerScale are disabled in the reference
# defaults (rate 0.0, init_values=None) so they are identities here.

if __name__ == "__main__":
    key = jax.random.PRNGKey(0)
    k_x, k_p = jax.random.split(key)
    x = jax.random.normal(k_x, (B, IN_CH, IMG, IMG), jnp.float32)  # NCHW input
    params = init_params(k_p)

    out = jax.jit(vit_forward)(x, params)
    out = jax.block_until_ready(out)
    assert out.shape == (B, NUM_CLASSES), out.shape
    print("KERNEL_OK")
</pallas_src>

<mosaic_0001>
module attributes {stable_mosaic.version = 11 : i64} {
  func.func @_vit_kernel(%arg0: i32, %arg1: memref<32x48xf32, #tpu.memory_space<vmem>>, %arg2: memref<48x64xf32, #tpu.memory_space<vmem>>, %arg3: memref<1x64xf32, #tpu.memory_space<vmem>>, %arg4: memref<32x64xf32, #tpu.memory_space<vmem>>, %arg5: memref<2x64xf32, #tpu.memory_space<vmem>>, %arg6: memref<34x34xf32, #tpu.memory_space<vmem>>, %arg7: memref<1x1x64xf32, #tpu.memory_space<vmem>>, %arg8: memref<1x1x64xf32, #tpu.memory_space<vmem>>, %arg9: memref<1x64x64xf32, #tpu.memory_space<vmem>>, %arg10: memref<1x1x64xf32, #tpu.memory_space<vmem>>, %arg11: memref<1x64x64xf32, #tpu.memory_space<vmem>>, %arg12: memref<1x1x64xf32, #tpu.memory_space<vmem>>, %arg13: memref<1x64x64xf32, #tpu.memory_space<vmem>>, %arg14: memref<1x1x64xf32, #tpu.memory_space<vmem>>, %arg15: memref<1x64x64xf32, #tpu.memory_space<vmem>>, %arg16: memref<1x1x64xf32, #tpu.memory_space<vmem>>, %arg17: memref<1x1x64xf32, #tpu.memory_space<vmem>>, %arg18: memref<1x1x64xf32, #tpu.memory_space<vmem>>, %arg19: memref<1x64x256xf32, #tpu.memory_space<vmem>>, %arg20: memref<1x1x256xf32, #tpu.memory_space<vmem>>, %arg21: memref<1x256x64xf32, #tpu.memory_space<vmem>>, %arg22: memref<1x1x64xf32, #tpu.memory_space<vmem>>, %arg23: memref<1x64xf32, #tpu.memory_space<vmem>>, %arg24: memref<1x64xf32, #tpu.memory_space<vmem>>, %arg25: memref<64x16xf32, #tpu.memory_space<vmem>>, %arg26: memref<1x16xf32, #tpu.memory_space<vmem>>, %arg27: memref<2x16xf32, #tpu.memory_space<vmem>>, %arg28: memref<34x64xf32, #tpu.memory_space<vmem>>, %arg29: memref<34x64xf32, #tpu.memory_space<vmem>>) attributes {dimension_semantics = [#tpu.dimension_semantics<arbitrary>], iteration_bounds = array<i64: 2>, scalar_prefetch = 0 : i64, scratch_operands = 2 : i64, tpu.core_type = #tpu.core_type<tc>, window_params = [{pipeline_mode = #tpu.pipeline_mode<synchronous>, transform_indices = @transform_0, window_bounds = array<i64: 32, 48>}, {pipeline_mode = #tpu.pipeline_mode<synchronous>, transform_indices = @transform_1, window_bounds = array<i64: 48, 64>}, {pipeline_mode = #tpu.pipeline_mode<synchronous>, transform_indices = @transform_2, window_bounds = array<i64: 1, 64>}, {pipeline_mode = #tpu.pipeline_mode<synchronous>, transform_indices = @transform_3, window_bounds = array<i64: 32, 64>}, {pipeline_mode = #tpu.pipeline_mode<synchronous>, transform_indices = @transform_4, window_bounds = array<i64: 2, 64>}, {pipeline_mode = #tpu.pipeline_mode<synchronous>, transform_indices = @transform_5, window_bounds = array<i64: 34, 34>}, {transform_indices = @transform_6, window_bounds = array<i64: 1, 1, 64>}, {transform_indices = @transform_7, window_bounds = array<i64: 1, 1, 64>}, {transform_indices = @transform_8, window_bounds = array<i64: 1, 64, 64>}, {transform_indices = @transform_9, window_bounds = array<i64: 1, 1, 64>}, {transform_indices = @transform_10, window_bounds = array<i64: 1, 64, 64>}, {transform_indices = @transform_11, window_bounds = array<i64: 1, 1, 64>}, {transform_indices = @transform_12, window_bounds = array<i64: 1, 64, 64>}, {transform_indices = @transform_13, window_bounds = array<i64: 1, 1, 64>}, {transform_indices = @transform_14, window_bounds = array<i64: 1, 64, 64>}, {transform_indices = @transform_15, window_bounds = array<i64: 1, 1, 64>}, {transform_indices = @transform_16, window_bounds = array<i64: 1, 1, 64>}, {transform_indices = @transform_17, window_bounds = array<i64: 1, 1, 64>}, {transform_indices = @transform_18, window_bounds = array<i64: 1, 64, 256>}, {transform_indices = @transform_19, window_bounds = array<i64: 1, 1, 256>}, {transform_indices = @transform_20, window_bounds = array<i64: 1, 256, 64>}, {transform_indices = @transform_21, window_bounds = array<i64: 1, 1, 64>}, {pipeline_mode = #tpu.pipeline_mode<synchronous>, transform_indices = @transform_22, window_bounds = array<i64: 1, 64>}, {pipeline_mode = #tpu.pipeline_mode<synchronous>, transform_indices = @transform_23, window_bounds = array<i64: 1, 64>}, {pipeline_mode = #tpu.pipeline_mode<synchronous>, transform_indices = @transform_24, window_bounds = array<i64: 64, 16>}, {pipeline_mode = #tpu.pipeline_mode<synchronous>, transform_indices = @transform_25, window_bounds = array<i64: 1, 16>}, {pipeline_mode = #tpu.pipeline_mode<synchronous>, transform_indices = @transform_26, window_bounds = array<i64: 2, 16>}]} {
    %c0_i32 = arith.constant 0 : i32
    %0 = arith.cmpi eq, %arg0, %c0_i32 : i32
    %1 = arith.extui %0 : i1 to i32
    %c0_i32_0 = arith.constant 0 : i32
    %2 = arith.cmpi ne, %1, %c0_i32_0 : i32
    scf.if %2 {
      %c0_100 = arith.constant 0 : index
      %c0_101 = arith.constant 0 : index
      %190 = vector.load %arg1[%c0_100, %c0_101] : memref<32x48xf32, #tpu.memory_space<vmem>>, vector<32x48xf32>
      %c0_102 = arith.constant 0 : index
      %c0_103 = arith.constant 0 : index
      %191 = vector.load %arg2[%c0_102, %c0_103] : memref<48x64xf32, #tpu.memory_space<vmem>>, vector<48x64xf32>
      %cst_104 = arith.constant dense<0.000000e+00> : vector<32x64xf32>
      %192 = tpu.matmul %190, %191, %cst_104 {dimension_numbers = #tpu.dot_dimension_numbers<[1], [0], [0], [1], [0, 0, 1, 1], [], []>} : vector<32x48xf32>, vector<48x64xf32>, vector<32x64xf32> -> vector<32x64xf32>
      %c0_105 = arith.constant 0 : index
      %c0_106 = arith.constant 0 : index
      %193 = vector.load %arg3[%c0_105, %c0_106] : memref<1x64xf32, #tpu.memory_space<vmem>>, vector<1x64xf32>
      %194 = vector.broadcast %193 : vector<1x64xf32> to vector<32x64xf32>
      %195 = arith.addf %192, %194 : vector<32x64xf32>
      %c0_107 = arith.constant 0 : index
      %c0_108 = arith.constant 0 : index
      %196 = vector.load %arg4[%c0_107, %c0_108] : memref<32x64xf32, #tpu.memory_space<vmem>>, vector<32x64xf32>
      %197 = arith.addf %195, %196 : vector<32x64xf32>
      %c0_109 = arith.constant 0 : index
      %c0_110 = arith.constant 0 : index
      %198 = vector.load %arg28[%c0_109, %c0_110] : memref<34x64xf32, #tpu.memory_space<vmem>>, vector<32x64xf32>
      tpu.vector_store %arg28[%c0_109, %c0_110], %197 {strides = array<i32>} : memref<34x64xf32, #tpu.memory_space<vmem>>, vector<32x64xf32>,
      %c0_111 = arith.constant 0 : index
      %c0_112 = arith.constant 0 : index
      %199 = vector.load %arg5[%c0_111, %c0_112] : memref<2x64xf32, #tpu.memory_space<vmem>>, vector<2x64xf32>
      %c32_113 = arith.constant 32 : index
      %c0_114 = arith.constant 0 : index
      %200 = vector.load %arg28[%c32_113, %c0_114] : memref<34x64xf32, #tpu.memory_space<vmem>>, vector<2x64xf32>
      tpu.vector_store %arg28[%c32_113, %c0_114], %199 {strides = array<i32>} : memref<34x64xf32, #tpu.memory_space<vmem>>, vector<2x64xf32>,
    } else {
    }
    %c0 = arith.constant 0 : index
    %c0_1 = arith.constant 0 : index
    %3 = vector.load %arg28[%c0, %c0_1] : memref<34x64xf32, #tpu.memory_space<vmem>>, vector<34x64xf32>
    %c0_2 = arith.constant 0 : index
    %c0_3 = arith.constant 0 : index
    %c0_4 = arith.constant 0 : index
    %4 = vector.load %arg7[%c0_2, %c0_3, %c0_4] : memref<1x1x64xf32, #tpu.memory_space<vmem>>, vector<1x1x64xf32>
    %5 = vector.shape_cast %4 : vector<1x1x64xf32> to vector<1x64xf32>
    %c0_5 = arith.constant 0 : index
    %c0_6 = arith.constant 0 : index
    %c0_7 = arith.constant 0 : index
    %6 = vector.load %arg8[%c0_5, %c0_6, %c0_7] : memref<1x1x64xf32, #tpu.memory_space<vmem>>, vector<1x1x64xf32>
    %7 = vector.shape_cast %6 : vector<1x1x64xf32> to vector<1x64xf32>
    %cst = arith.constant dense<0.000000e+00> : vector<34xf32>
    %8 = vector.multi_reduction <add>, %3, %cst [1] : vector<34x64xf32> to vector<34xf32>
    %9 = vector.shape_cast %8 : vector<34xf32> to vector<34x1xf32>
    %cst_8 = arith.constant 6.400000e+01 : f32
    %10 = vector.broadcast %cst_8 : f32 to vector<34x1xf32>
    %11 = arith.divf %9, %10 : vector<34x1xf32>
    %12 = vector.broadcast %11 : vector<34x1xf32> to vector<34x64xf32>
    %13 = arith.subf %3, %12 : vector<34x64xf32>
    %14 = arith.mulf %13, %13 : vector<34x64xf32>
    %cst_9 = arith.constant dense<0.000000e+00> : vector<34xf32>
    %15 = vector.multi_reduction <add>, %14, %cst_9 [1] : vector<34x64xf32> to vector<34xf32>
    %16 = vector.shape_cast %15 : vector<34xf32> to vector<34x1xf32>
    %cst_10 = arith.constant 6.400000e+01 : f32
    %17 = vector.broadcast %cst_10 : f32 to vector<34x1xf32>
    %18 = arith.divf %16, %17 : vector<34x1xf32>
    %19 = vector.broadcast %11 : vector<34x1xf32> to vector<34x64xf32>
    %20 = arith.subf %3, %19 : vector<34x64xf32>
    %cst_11 = arith.constant 9.99999997E-7 : f32
    %21 = vector.broadcast %cst_11 : f32 to vector<34x1xf32>
    %22 = arith.addf %18, %21 : vector<34x1xf32>
    %23 = math.rsqrt %22 : vector<34x1xf32>
    %24 = vector.broadcast %23 : vector<34x1xf32> to vector<34x64xf32>
    %25 = arith.mulf %20, %24 : vector<34x64xf32>
    %26 = vector.broadcast %5 : vector<1x64xf32> to vector<34x64xf32>
    %27 = arith.mulf %25, %26 : vector<34x64xf32>
    %28 = vector.broadcast %7 : vector<1x64xf32> to vector<34x64xf32>
    %29 = arith.addf %27, %28 : vector<34x64xf32>
    %c0_12 = arith.constant 0 : index
    %c0_13 = arith.constant 0 : index
    %c0_14 = arith.constant 0 : index
    %30 = vector.load %arg9[%c0_12, %c0_13, %c0_14] : memref<1x64x64xf32, #tpu.memory_space<vmem>>, vector<1x64x64xf32>
    %31 = vector.shape_cast %30 : vector<1x64x64xf32> to vector<64x64xf32>
    %cst_15 = arith.constant dense<0.000000e+00> : vector<34x64xf32>
    %32 = tpu.matmul %29, %31, %cst_15 {dimension_numbers = #tpu.dot_dimension_numbers<[1], [0], [0], [1], [0, 0, 1, 1], [], []>} : vector<34x64xf32>, vector<64x64xf32>, vector<34x64xf32> -> vector<34x64xf32>
    %c0_16 = arith.constant 0 : index
    %c0_17 = arith.constant 0 : index
    %c0_18 = arith.constant 0 : index
    %33 = vector.load %arg10[%c0_16, %c0_17, %c0_18] : memref<1x1x64xf32, #tpu.memory_space<vmem>>, vector<1x1x64xf32>
    %34 = vector.shape_cast %33 : vector<1x1x64xf32> to vector<1x64xf32>
    %35 = vector.broadcast %34 : vector<1x64xf32> to vector<34x64xf32>
    %36 = arith.addf %32, %35 : vector<34x64xf32>
    %c0_19 = arith.constant 0 : index
    %c0_20 = arith.constant 0 : index
    %c0_21 = arith.constant 0 : index
    %37 = vector.load %arg11[%c0_19, %c0_20, %c0_21] : memref<1x64x64xf32, #tpu.memory_space<vmem>>, vector<1x64x64xf32>
    %38 = vector.shape_cast %37 : vector<1x64x64xf32> to vector<64x64xf32>
    %cst_22 = arith.constant dense<0.000000e+00> : vector<34x64xf32>
    %39 = tpu.matmul %29, %38, %cst_22 {dimension_numbers = #tpu.dot_dimension_numbers<[1], [0], [0], [1], [0, 0, 1, 1], [], []>} : vector<34x64xf32>, vector<64x64xf32>, vector<34x64xf32> -> vector<34x64xf32>
    %c0_23 = arith.constant 0 : index
    %c0_24 = arith.constant 0 : index
    %c0_25 = arith.constant 0 : index
    %40 = vector.load %arg12[%c0_23, %c0_24, %c0_25] : memref<1x1x64xf32, #tpu.memory_space<vmem>>, vector<1x1x64xf32>
    %41 = vector.shape_cast %40 : vector<1x1x64xf32> to vector<1x64xf32>
    %42 = vector.broadcast %41 : vector<1x64xf32> to vector<34x64xf32>
    %43 = arith.addf %39, %42 : vector<34x64xf32>
    %c0_26 = arith.constant 0 : index
    %c0_27 = arith.constant 0 : index
    %c0_28 = arith.constant 0 : index
    %44 = vector.load %arg13[%c0_26, %c0_27, %c0_28] : memref<1x64x64xf32, #tpu.memory_space<vmem>>, vector<1x64x64xf32>
    %45 = vector.shape_cast %44 : vector<1x64x64xf32> to vector<64x64xf32>
    %cst_29 = arith.constant dense<0.000000e+00> : vector<34x64xf32>
    %46 = tpu.matmul %29, %45, %cst_29 {dimension_numbers = #tpu.dot_dimension_numbers<[1], [0], [0], [1], [0, 0, 1, 1], [], []>} : vector<34x64xf32>, vector<64x64xf32>, vector<34x64xf32> -> vector<34x64xf32>
    %c0_30 = arith.constant 0 : index
    %c0_31 = arith.constant 0 : index
    %c0_32 = arith.constant 0 : index
    %47 = vector.load %arg14[%c0_30, %c0_31, %c0_32] : memref<1x1x64xf32, #tpu.memory_space<vmem>>, vector<1x1x64xf32>
    %48 = vector.shape_cast %47 : vector<1x1x64xf32> to vector<1x64xf32>
    %49 = vector.broadcast %48 : vector<1x64xf32> to vector<34x64xf32>
    %50 = arith.addf %46, %49 : vector<34x64xf32>
    %c0_33 = arith.constant 0 : index
    %c0_34 = arith.constant 0 : index
    %51 = vector.load %arg6[%c0_33, %c0_34] : memref<34x34xf32, #tpu.memory_space<vmem>>, vector<34x34xf32>
    %52 = vector.extract_strided_slice %36 {offsets = [0, 0], sizes = [34, 16], strides = [1, 1]} : vector<34x64xf32> to vector<34x16xf32>
    %53 = vector.extract_strided_slice %43 {offsets = [0, 0], sizes = [34, 16], strides = [1, 1]} : vector<34x64xf32> to vector<34x16xf32>
    %54 = vector.extract_strided_slice %50 {offsets = [0, 0], sizes = [34, 16], strides = [1, 1]} : vector<34x64xf32> to vector<34x16xf32>
    %cst_35 = arith.constant dense<0.000000e+00> : vector<34x34xf32>
    %55 = tpu.matmul %52, %53, %cst_35 {dimension_numbers = #tpu.dot_dimension_numbers<[1], [1], [0], [0], [0, 0, 1, 0], [], []>} : vector<34x16xf32>, vector<34x16xf32>, vector<34x34xf32> -> vector<34x34xf32>
    %cst_36 = arith.constant 2.500000e-01 : f32
    %56 = vector.broadcast %cst_36 : f32 to vector<34x34xf32>
    %57 = arith.mulf %55, %56 : vector<34x34xf32>
    %58 = arith.addf %57, %51 : vector<34x34xf32>
    %cst_37 = arith.constant dense<0xFF800000> : vector<34xf32>
    %59 = vector.multi_reduction <maximumf>, %58, %cst_37 [1] : vector<34x34xf32> to vector<34xf32>
    %60 = vector.shape_cast %59 : vector<34xf32> to vector<34x1xf32>
    %61 = vector.broadcast %60 : vector<34x1xf32> to vector<34x34xf32>
    %62 = arith.subf %58, %61 : vector<34x34xf32>
    %63 = math.exp %62 : vector<34x34xf32>
    %cst_38 = arith.constant dense<0.000000e+00> : vector<34xf32>
    %64 = vector.multi_reduction <add>, %63, %cst_38 [1] : vector<34x34xf32> to vector<34xf32>
    %65 = vector.shape_cast %64 : vector<34xf32> to vector<34x1xf32>
    %66 = tpu.reciprocal %65 {approx = true} : vector<34x1xf32> -> vector<34x1xf32>
    %67 = vector.broadcast %66 : vector<34x1xf32> to vector<34x34xf32>
    %68 = arith.mulf %63, %67 : vector<34x34xf32>
    %cst_39 = arith.constant dense<0.000000e+00> : vector<34x16xf32>
    %69 = tpu.matmul %68, %54, %cst_39 {dimension_numbers = #tpu.dot_dimension_numbers<[1], [0], [0], [1], [0, 0, 1, 1], [], []>} : vector<34x34xf32>, vector<34x16xf32>, vector<34x16xf32> -> vector<34x16xf32>
    %c0_40 = arith.constant 0 : index
    %c0_41 = arith.constant 0 : index
    %70 = vector.load %arg29[%c0_40, %c0_41] : memref<34x64xf32, #tpu.memory_space<vmem>>, vector<34x16xf32>
    tpu.vector_store %arg29[%c0_40, %c0_41], %69 {strides = array<i32>} : memref<34x64xf32, #tpu.memory_space<vmem>>, vector<34x16xf32>,
    %71 = vector.extract_strided_slice %36 {offsets = [0, 16], sizes = [34, 16], strides = [1, 1]} : vector<34x64xf32> to vector<34x16xf32>
    %72 = vector.extract_strided_slice %43 {offsets = [0, 16], sizes = [34, 16], strides = [1, 1]} : vector<34x64xf32> to vector<34x16xf32>
    %73 = vector.extract_strided_slice %50 {offsets = [0, 16], sizes = [34, 16], strides = [1, 1]} : vector<34x64xf32> to vector<34x16xf32>
    %cst_42 = arith.constant dense<0.000000e+00> : vector<34x34xf32>
    %74 = tpu.matmul %71, %72, %cst_42 {dimension_numbers = #tpu.dot_dimension_numbers<[1], [1], [0], [0], [0, 0, 1, 0], [], []>} : vector<34x16xf32>, vector<34x16xf32>, vector<34x34xf32> -> vector<34x34xf32>
    %cst_43 = arith.constant 2.500000e-01 : f32
    %75 = vector.broadcast %cst_43 : f32 to vector<34x34xf32>
    %76 = arith.mulf %74, %75 : vector<34x34xf32>
    %77 = arith.addf %76, %51 : vector<34x34xf32>
    %cst_44 = arith.constant dense<0xFF800000> : vector<34xf32>
    %78 = vector.multi_reduction <maximumf>, %77, %cst_44 [1] : vector<34x34xf32> to vector<34xf32>
    %79 = vector.shape_cast %78 : vector<34xf32> to vector<34x1xf32>
    %80 = vector.broadcast %79 : vector<34x1xf32> to vector<34x34xf32>
    %81 = arith.subf %77, %80 : vector<34x34xf32>
    %82 = math.exp %81 : vector<34x34xf32>
    %cst_45 = arith.constant dense<0.000000e+00> : vector<34xf32>
    %83 = vector.multi_reduction <add>, %82, %cst_45 [1] : vector<34x34xf32> to vector<34xf32>
    %84 = vector.shape_cast %83 : vector<34xf32> to vector<34x1xf32>
    %85 = tpu.reciprocal %84 {approx = true} : vector<34x1xf32> -> vector<34x1xf32>
    %86 = vector.broadcast %85 : vector<34x1xf32> to vector<34x34xf32>
    %87 = arith.mulf %82, %86 : vector<34x34xf32>
    %cst_46 = arith.constant dense<0.000000e+00> : vector<34x16xf32>
    %88 = tpu.matmul %87, %73, %cst_46 {dimension_numbers = #tpu.dot_dimension_numbers<[1], [0], [0], [1], [0, 0, 1, 1], [], []>} : vector<34x34xf32>, vector<34x16xf32>, vector<34x16xf32> -> vector<34x16xf32>
    %c0_47 = arith.constant 0 : index
    %c16 = arith.constant 16 : index
    %89 = vector.load %arg29[%c0_47, %c16] : memref<34x64xf32, #tpu.memory_space<vmem>>, vector<34x16xf32>
    tpu.vector_store %arg29[%c0_47, %c16], %88 {strides = array<i32>} : memref<34x64xf32, #tpu.memory_space<vmem>>, vector<34x16xf32>,
    %90 = vector.extract_strided_slice %36 {offsets = [0, 32], sizes = [34, 16], strides = [1, 1]} : vector<34x64xf32> to vector<34x16xf32>
    %91 = vector.extract_strided_slice %43 {offsets = [0, 32], sizes = [34, 16], strides = [1, 1]} : vector<34x64xf32> to vector<34x16xf32>
    %92 = vector.extract_strided_slice %50 {offsets = [0, 32], sizes = [34, 16], strides = [1, 1]} : vector<34x64xf32> to vector<34x16xf32>
    %cst_48 = arith.constant dense<0.000000e+00> : vector<34x34xf32>
    %93 = tpu.matmul %90, %91, %cst_48 {dimension_numbers = #tpu.dot_dimension_numbers<[1], [1], [0], [0], [0, 0, 1, 0], [], []>} : vector<34x16xf32>, vector<34x16xf32>, vector<34x34xf32> -> vector<34x34xf32>
    %cst_49 = arith.constant 2.500000e-01 : f32
    %94 = vector.broadcast %cst_49 : f32 to vector<34x34xf32>
    %95 = arith.mulf %93, %94 : vector<34x34xf32>
    %96 = arith.addf %95, %51 : vector<34x34xf32>
    %cst_50 = arith.constant dense<0xFF800000> : vector<34xf32>
    %97 = vector.multi_reduction <maximumf>, %96, %cst_50 [1] : vector<34x34xf32> to vector<34xf32>
    %98 = vector.shape_cast %97 : vector<34xf32> to vector<34x1xf32>
    %99 = vector.broadcast %98 : vector<34x1xf32> to vector<34x34xf32>
    %100 = arith.subf %96, %99 : vector<34x34xf32>
    %101 = math.exp %100 : vector<34x34xf32>
    %cst_51 = arith.constant dense<0.000000e+00> : vector<34xf32>
    %102 = vector.multi_reduction <add>, %101, %cst_51 [1] : vector<34x34xf32> to vector<34xf32>
    %103 = vector.shape_cast %102 : vector<34xf32> to vector<34x1xf32>
    %104 = tpu.reciprocal %103 {approx = true} : vector<34x1xf32> -> vector<34x1xf32>
    %105 = vector.broadcast %104 : vector<34x1xf32> to vector<34x34xf32>
    %106 = arith.mulf %101, %105 : vector<34x34xf32>
    %cst_52 = arith.constant dense<0.000000e+00> : vector<34x16xf32>
    %107 = tpu.matmul %106, %92, %cst_52 {dimension_numbers = #tpu.dot_dimension_numbers<[1], [0], [0], [1], [0, 0, 1, 1], [], []>} : vector<34x34xf32>, vector<34x16xf32>, vector<34x16xf32> -> vector<34x16xf32>
    %c0_53 = arith.constant 0 : index
    %c32 = arith.constant 32 : index
    %108 = vector.load %arg29[%c0_53, %c32] : memref<34x64xf32, #tpu.memory_space<vmem>>, vector<34x16xf32>
    tpu.vector_store %arg29[%c0_53, %c32], %107 {strides = array<i32>} : memref<34x64xf32, #tpu.memory_space<vmem>>, vector<34x16xf32>,
    %109 = vector.extract_strided_slice %36 {offsets = [0, 48], sizes = [34, 16], strides = [1, 1]} : vector<34x64xf32> to vector<34x16xf32>
    %110 = vector.extract_strided_slice %43 {offsets = [0, 48], sizes = [34, 16], strides = [1, 1]} : vector<34x64xf32> to vector<34x16xf32>
    %111 = vector.extract_strided_slice %50 {offsets = [0, 48], sizes = [34, 16], strides = [1, 1]} : vector<34x64xf32> to vector<34x16xf32>
    %cst_54 = arith.constant dense<0.000000e+00> : vector<34x34xf32>
    %112 = tpu.matmul %109, %110, %cst_54 {dimension_numbers = #tpu.dot_dimension_numbers<[1], [1], [0], [0], [0, 0, 1, 0], [], []>} : vector<34x16xf32>, vector<34x16xf32>, vector<34x34xf32> -> vector<34x34xf32>
    %cst_55 = arith.constant 2.500000e-01 : f32
    %113 = vector.broadcast %cst_55 : f32 to vector<34x34xf32>
    %114 = arith.mulf %112, %113 : vector<34x34xf32>
    %115 = arith.addf %114, %51 : vector<34x34xf32>
    %cst_56 = arith.constant dense<0xFF800000> : vector<34xf32>
    %116 = vector.multi_reduction <maximumf>, %115, %cst_56 [1] : vector<34x34xf32> to vector<34xf32>
    %117 = vector.shape_cast %116 : vector<34xf32> to vector<34x1xf32>
    %118 = vector.broadcast %117 : vector<34x1xf32> to vector<34x34xf32>
    %119 = arith.subf %115, %118 : vector<34x34xf32>
    %120 = math.exp %119 : vector<34x34xf32>
    %cst_57 = arith.constant dense<0.000000e+00> : vector<34xf32>
    %121 = vector.multi_reduction <add>, %120, %cst_57 [1] : vector<34x34xf32> to vector<34xf32>
    %122 = vector.shape_cast %121 : vector<34xf32> to vector<34x1xf32>
    %123 = tpu.reciprocal %122 {approx = true} : vector<34x1xf32> -> vector<34x1xf32>
    %124 = vector.broadcast %123 : vector<34x1xf32> to vector<34x34xf32>
    %125 = arith.mulf %120, %124 : vector<34x34xf32>
    %cst_58 = arith.constant dense<0.000000e+00> : vector<34x16xf32>
    %126 = tpu.matmul %125, %111, %cst_58 {dimension_numbers = #tpu.dot_dimension_numbers<[1], [0], [0], [1], [0, 0, 1, 1], [], []>} : vector<34x34xf32>, vector<34x16xf32>, vector<34x16xf32> -> vector<34x16xf32>
    %c0_59 = arith.constant 0 : index
    %c48 = arith.constant 48 : index
    %127 = vector.load %arg29[%c0_59, %c48] : memref<34x64xf32, #tpu.memory_space<vmem>>, vector<34x16xf32>
    tpu.vector_store %arg29[%c0_59, %c48], %126 {strides = array<i32>} : memref<34x64xf32, #tpu.memory_space<vmem>>, vector<34x16xf32>,
    %c0_60 = arith.constant 0 : index
    %c0_61 = arith.constant 0 : index
    %128 = vector.load %arg29[%c0_60, %c0_61] : memref<34x64xf32, #tpu.memory_space<vmem>>, vector<34x64xf32>
    %c0_62 = arith.constant 0 : index
    %c0_63 = arith.constant 0 : index
    %c0_64 = arith.constant 0 : index
    %129 = vector.load %arg15[%c0_62, %c0_63, %c0_64] : memref<1x64x64xf32, #tpu.memory_space<vmem>>, vector<1x64x64xf32>
    %130 = vector.shape_cast %129 : vector<1x64x64xf32> to vector<64x64xf32>
    %cst_65 = arith.constant dense<0.000000e+00> : vector<34x64xf32>
    %131 = tpu.matmul %128, %130, %cst_65 {dimension_numbers = #tpu.dot_dimension_numbers<[1], [0], [0], [1], [0, 0, 1, 1], [], []>} : vector<34x64xf32>, vector<64x64xf32>, vector<34x64xf32> -> vector<34x64xf32>
    %c0_66 = arith.constant 0 : index
    %c0_67 = arith.constant 0 : index
    %c0_68 = arith.constant 0 : index
    %132 = vector.load %arg16[%c0_66, %c0_67, %c0_68] : memref<1x1x64xf32, #tpu.memory_space<vmem>>, vector<1x1x64xf32>
    %133 = vector.shape_cast %132 : vector<1x1x64xf32> to vector<1x64xf32>
    %134 = vector.broadcast %133 : vector<1x64xf32> to vector<34x64xf32>
    %135 = arith.addf %131, %134 : vector<34x64xf32>
    %136 = arith.addf %3, %135 : vector<34x64xf32>
    %c0_69 = arith.constant 0 : index
    %c0_70 = arith.constant 0 : index
    %c0_71 = arith.constant 0 : index
    %137 = vector.load %arg17[%c0_69, %c0_70, %c0_71] : memref<1x1x64xf32, #tpu.memory_space<vmem>>, vector<1x1x64xf32>
    %138 = vector.shape_cast %137 : vector<1x1x64xf32> to vector<1x64xf32>
    %c0_72 = arith.constant 0 : index
    %c0_73 = arith.constant 0 : index
    %c0_74 = arith.constant 0 : index
    %139 = vector.load %arg18[%c0_72, %c0_73, %c0_74] : memref<1x1x64xf32, #tpu.memory_space<vmem>>, vector<1x1x64xf32>
    %140 = vector.shape_cast %139 : vector<1x1x64xf32> to vector<1x64xf32>
    %cst_75 = arith.constant dense<0.000000e+00> : vector<34xf32>
    %141 = vector.multi_reduction <add>, %136, %cst_75 [1] : vector<34x64xf32> to vector<34xf32>
    %142 = vector.shape_cast %141 : vector<34xf32> to vector<34x1xf32>
    %cst_76 = arith.constant 6.400000e+01 : f32
    %143 = vector.broadcast %cst_76 : f32 to vector<34x1xf32>
    %144 = arith.divf %142, %143 : vector<34x1xf32>
    %145 = vector.broadcast %144 : vector<34x1xf32> to vector<34x64xf32>
    %146 = arith.subf %136, %145 : vector<34x64xf32>
    %147 = arith.mulf %146, %146 : vector<34x64xf32>
    %cst_77 = arith.constant dense<0.000000e+00> : vector<34xf32>
    %148 = vector.multi_reduction <add>, %147, %cst_77 [1] : vector<34x64xf32> to vector<34xf32>
    %149 = vector.shape_cast %148 : vector<34xf32> to vector<34x1xf32>
    %cst_78 = arith.constant 6.400000e+01 : f32
    %150 = vector.broadcast %cst_78 : f32 to vector<34x1xf32>
    %151 = arith.divf %149, %150 : vector<34x1xf32>
    %152 = vector.broadcast %144 : vector<34x1xf32> to vector<34x64xf32>
    %153 = arith.subf %136, %152 : vector<34x64xf32>
    %cst_79 = arith.constant 9.99999997E-7 : f32
    %154 = vector.broadcast %cst_79 : f32 to vector<34x1xf32>
    %155 = arith.addf %151, %154 : vector<34x1xf32>
    %156 = math.rsqrt %155 : vector<34x1xf32>
    %157 = vector.broadcast %156 : vector<34x1xf32> to vector<34x64xf32>
    %158 = arith.mulf %153, %157 : vector<34x64xf32>
    %159 = vector.broadcast %138 : vector<1x64xf32> to vector<34x64xf32>
    %160 = arith.mulf %158, %159 : vector<34x64xf32>
    %161 = vector.broadcast %140 : vector<1x64xf32> to vector<34x64xf32>
    %162 = arith.addf %160, %161 : vector<34x64xf32>
    %c0_80 = arith.constant 0 : index
    %c0_81 = arith.constant 0 : index
    %c0_82 = arith.constant 0 : index
    %163 = vector.load %arg19[%c0_80, %c0_81, %c0_82] : memref<1x64x256xf32, #tpu.memory_space<vmem>>, vector<1x64x256xf32>
    %164 = vector.shape_cast %163 : vector<1x64x256xf32> to vector<64x256xf32>
    %cst_83 = arith.constant dense<0.000000e+00> : vector<34x256xf32>
    %165 = tpu.matmul %162, %164, %cst_83 {dimension_numbers = #tpu.dot_dimension_numbers<[1], [0], [0], [1], [0, 0, 1, 1], [], []>} : vector<34x64xf32>, vector<64x256xf32>, vector<34x256xf32> -> vector<34x256xf32>
    %c0_84 = arith.constant 0 : index
    %c0_85 = arith.constant 0 : index
    %c0_86 = arith.constant 0 : index
    %166 = vector.load %arg20[%c0_84, %c0_85, %c0_86] : memref<1x1x256xf32, #tpu.memory_space<vmem>>, vector<1x1x256xf32>
    %167 = vector.shape_cast %166 : vector<1x1x256xf32> to vector<1x256xf32>
    %168 = vector.broadcast %167 : vector<1x256xf32> to vector<34x256xf32>
    %169 = arith.addf %165, %168 : vector<34x256xf32>
    %cst_87 = arith.constant 5.000000e-01 : f32
    %170 = vector.broadcast %cst_87 : f32 to vector<34x256xf32>
    %171 = arith.mulf %170, %169 : vector<34x256xf32>
    %cst_88 = arith.constant 0.707106769 : f32
    %172 = vector.broadcast %cst_88 : f32 to vector<34x256xf32>
    %173 = arith.mulf %169, %172 : vector<34x256xf32>
    %174 = math.erf %173 : vector<34x256xf32>
    %cst_89 = arith.constant 1.000000e+00 : f32
    %175 = vector.broadcast %cst_89 : f32 to vector<34x256xf32>
    %176 = arith.addf %175, %174 : vector<34x256xf32>
    %177 = arith.mulf %171, %176 : vector<34x256xf32>
    %c0_90 = arith.constant 0 : index
    %c0_91 = arith.constant 0 : index
    %c0_92 = arith.constant 0 : index
    %178 = vector.load %arg21[%c0_90, %c0_91, %c0_92] : memref<1x256x64xf32, #tpu.memory_space<vmem>>, vector<1x256x64xf32>
    %179 = vector.shape_cast %178 : vector<1x256x64xf32> to vector<256x64xf32>
    %cst_93 = arith.constant dense<0.000000e+00> : vector<34x64xf32>
    %180 = tpu.matmul %177, %179, %cst_93 {dimension_numbers = #tpu.dot_dimension_numbers<[1], [0], [0], [1], [0, 0, 1, 1], [], []>} : vector<34x256xf32>, vector<256x64xf32>, vector<34x64xf32> -> vector<34x64xf32>
    %c0_94 = arith.constant 0 : index
    %c0_95 = arith.constant 0 : index
    %c0_96 = arith.constant 0 : index
    %181 = vector.load %arg22[%c0_94, %c0_95, %c0_96] : memref<1x1x64xf32, #tpu.memory_space<vmem>>, vector<1x1x64xf32>
    %182 = vector.shape_cast %181 : vector<1x1x64xf32> to vector<1x64xf32>
    %183 = vector.broadcast %182 : vector<1x64xf32> to vector<34x64xf32>
    %184 = arith.addf %180, %183 : vector<34x64xf32>
    %185 = arith.addf %136, %184 : vector<34x64xf32>
    %c0_97 = arith.constant 0 : index
    %c0_98 = arith.constant 0 : index
    %186 = vector.load %arg28[%c0_97, %c0_98] : memref<34x64xf32, #tpu.memory_space<vmem>>, vector<34x64xf32>
    tpu.vector_store %arg28[%c0_97, %c0_98], %185 {strides = array<i32>} : memref<34x64xf32, #tpu.memory_space<vmem>>, vector<34x64xf32>,
    %c1_i32 = arith.constant 1 : i32
    %187 = arith.cmpi eq, %arg0, %c1_i32 : i32
    %188 = arith.extui %187 : i1 to i32
    %c0_i32_99 = arith.constant 0 : i32
    %189 = arith.cmpi ne, %188, %c0_i32_99 : i32
    scf.if %189 {
      %190 = vector.extract_strided_slice %185 {offsets = [32, 0], sizes = [2, 64], strides = [1, 1]} : vector<34x64xf32> to vector<2x64xf32>
      %c0_100 = arith.constant 0 : index
      %c0_101 = arith.constant 0 : index
      %191 = vector.load %arg23[%c0_100, %c0_101] : memref<1x64xf32, #tpu.memory_space<vmem>>, vector<1x64xf32>
      %c0_102 = arith.constant 0 : index
      %c0_103 = arith.constant 0 : index
      %192 = vector.load %arg24[%c0_102, %c0_103] : memref<1x64xf32, #tpu.memory_space<vmem>>, vector<1x64xf32>
      %cst_104 = arith.constant dense<0.000000e+00> : vector<2xf32>
      %193 = vector.multi_reduction <add>, %190, %cst_104 [1] : vector<2x64xf32> to vector<2xf32>
      %194 = vector.shape_cast %193 : vector<2xf32> to vector<2x1xf32>
      %cst_105 = arith.constant 6.400000e+01 : f32
      %195 = vector.broadcast %cst_105 : f32 to vector<2x1xf32>
      %196 = arith.divf %194, %195 : vector<2x1xf32>
      %197 = vector.broadcast %196 : vector<2x1xf32> to vector<2x64xf32>
      %198 = arith.subf %190, %197 : vector<2x64xf32>
      %199 = arith.mulf %198, %198 : vector<2x64xf32>
      %cst_106 = arith.constant dense<0.000000e+00> : vector<2xf32>
      %200 = vector.multi_reduction <add>, %199, %cst_106 [1] : vector<2x64xf32> to vector<2xf32>
      %201 = vector.shape_cast %200 : vector<2xf32> to vector<2x1xf32>
      %cst_107 = arith.constant 6.400000e+01 : f32
      %202 = vector.broadcast %cst_107 : f32 to vector<2x1xf32>
      %203 = arith.divf %201, %202 : vector<2x1xf32>
      %204 = vector.broadcast %196 : vector<2x1xf32> to vector<2x64xf32>
      %205 = arith.subf %190, %204 : vector<2x64xf32>
      %cst_108 = arith.constant 9.99999997E-7 : f32
      %206 = vector.broadcast %cst_108 : f32 to vector<2x1xf32>
      %207 = arith.addf %203, %206 : vector<2x1xf32>
      %208 = math.rsqrt %207 : vector<2x1xf32>
      %209 = vector.broadcast %208 : vector<2x1xf32> to vector<2x64xf32>
      %210 = arith.mulf %205, %209 : vector<2x64xf32>
      %211 = vector.broadcast %191 : vector<1x64xf32> to vector<2x64xf32>
      %212 = arith.mulf %210, %211 : vector<2x64xf32>
      %213 = vector.broadcast %192 : vector<1x64xf32> to vector<2x64xf32>
      %214 = arith.addf %212, %213 : vector<2x64xf32>
      %c0_109 = arith.constant 0 : index
      %c0_110 = arith.constant 0 : index
      %215 = vector.load %arg25[%c0_109, %c0_110] : memref<64x16xf32, #tpu.memory_space<vmem>>, vector<64x16xf32>
      %cst_111 = arith.constant dense<0.000000e+00> : vector<2x16xf32>
      %216 = tpu.matmul %214, %215, %cst_111 {dimension_numbers = #tpu.dot_dimension_numbers<[1], [0], [0], [1], [0, 0, 1, 1], [], []>} : vector<2x64xf32>, vector<64x16xf32>, vector<2x16xf32> -> vector<2x16xf32>
      %c0_112 = arith.constant 0 : index
      %c0_113 = arith.constant 0 : index
      %217 = vector.load %arg26[%c0_112, %c0_113] : memref<1x16xf32, #tpu.memory_space<vmem>>, vector<1x16xf32>
      %218 = vector.broadcast %217 : vector<1x16xf32> to vector<2x16xf32>
      %219 = arith.addf %216, %218 : vector<2x16xf32>
      %c0_114 = arith.constant 0 : index
      %c0_115 = arith.constant 0 : index
      %220 = vector.load %arg27[%c0_114, %c0_115] : memref<2x16xf32, #tpu.memory_space<vmem>>, vector<2x16xf32>
      tpu.vector_store %arg27[%c0_114, %c0_115], %219 {strides = array<i32>} : memref<2x16xf32, #tpu.memory_space<vmem>>, vector<2x16xf32>,
    } else {
    }
    return
  }
  func.func @transform_0(%arg0: i32) -> (i32, i32) {
    %c0_i32 = arith.constant 0 : i32
    %c0_i32_0 = arith.constant 0 : i32
    %c0_i32_1 = arith.constant 0 : i32
    return %c0_i32, %c0_i32_0 : i32, i32
  }
  func.func @transform_1(%arg0: i32) -> (i32, i32) {
    %c0_i32 = arith.constant 0 : i32
    %c0_i32_0 = arith.constant 0 : i32
    %c0_i32_1 = arith.constant 0 : i32
    return %c0_i32, %c0_i32_0 : i32, i32
  }
  func.func @transform_2(%arg0: i32) -> (i32, i32) {
    %c0_i32 = arith.constant 0 : i32
    %c0_i32_0 = arith.constant 0 : i32
    %c0_i32_1 = arith.constant 0 : i32
    return %c0_i32, %c0_i32_0 : i32, i32
  }
  func.func @transform_3(%arg0: i32) -> (i32, i32) {
    %c0_i32 = arith.constant 0 : i32
    %c0_i32_0 = arith.constant 0 : i32
    %c0_i32_1 = arith.constant 0 : i32
    return %c0_i32, %c0_i32_0 : i32, i32
  }
  func.func @transform_4(%arg0: i32) -> (i32, i32) {
    %c0_i32 = arith.constant 0 : i32
    %c0_i32_0 = arith.constant 0 : i32
    %c0_i32_1 = arith.constant 0 : i32
    return %c0_i32, %c0_i32_0 : i32, i32
  }
  func.func @transform_5(%arg0: i32) -> (i32, i32) {
    %c0_i32 = arith.constant 0 : i32
    %c0_i32_0 = arith.constant 0 : i32
    %c0_i32_1 = arith.constant 0 : i32
    return %c0_i32, %c0_i32_0 : i32, i32
  }
  func.func @transform_6(%arg0: i32) -> (i32, i32, i32) {
    %c0_i32 = arith.constant 0 : i32
    %c0_i32_0 = arith.constant 0 : i32
    %c0_i32_1 = arith.constant 0 : i32
    return %arg0, %c0_i32, %c0_i32_0 : i32, i32, i32
  }
  func.func @transform_7(%arg0: i32) -> (i32, i32, i32) {
    %c0_i32 = arith.constant 0 : i32
    %c0_i32_0 = arith.constant 0 : i32
    %c0_i32_1 = arith.constant 0 : i32
    return %arg0, %c0_i32, %c0_i32_0 : i32, i32, i32
  }
  func.func @transform_8(%arg0: i32) -> (i32, i32, i32) {
    %c0_i32 = arith.constant 0 : i32
    %c0_i32_0 = arith.constant 0 : i32
    %c0_i32_1 = arith.constant 0 : i32
    return %arg0, %c0_i32, %c0_i32_0 : i32, i32, i32
  }
  func.func @transform_9(%arg0: i32) -> (i32, i32, i32) {
    %c0_i32 = arith.constant 0 : i32
    %c0_i32_0 = arith.constant 0 : i32
    %c0_i32_1 = arith.constant 0 : i32
    return %arg0, %c0_i32, %c0_i32_0 : i32, i32, i32
  }
  func.func @transform_10(%arg0: i32) -> (i32, i32, i32) {
    %c0_i32 = arith.constant 0 : i32
    %c0_i32_0 = arith.constant 0 : i32
    %c0_i32_1 = arith.constant 0 : i32
    return %arg0, %c0_i32, %c0_i32_0 : i32, i32, i32
  }
  func.func @transform_11(%arg0: i32) -> (i32, i32, i32) {
    %c0_i32 = arith.constant 0 : i32
    %c0_i32_0 = arith.constant 0 : i32
    %c0_i32_1 = arith.constant 0 : i32
    return %arg0, %c0_i32, %c0_i32_0 : i32, i32, i32
  }
  func.func @transform_12(%arg0: i32) -> (i32, i32, i32) {
    %c0_i32 = arith.constant 0 : i32
    %c0_i32_0 = arith.constant 0 : i32
    %c0_i32_1 = arith.constant 0 : i32
    return %arg0, %c0_i32, %c0_i32_0 : i32, i32, i32
  }
  func.func @transform_13(%arg0: i32) -> (i32, i32, i32) {
    %c0_i32 = arith.constant 0 : i32
    %c0_i32_0 = arith.constant 0 : i32
    %c0_i32_1 = arith.constant 0 : i32
    return %arg0, %c0_i32, %c0_i32_0 : i32, i32, i32
  }
  func.func @transform_14(%arg0: i32) -> (i32, i32, i32) {
    %c0_i32 = arith.constant 0 : i32
    %c0_i32_0 = arith.constant 0 : i32
    %c0_i32_1 = arith.constant 0 : i32
    return %arg0, %c0_i32, %c0_i32_0 : i32, i32, i32
  }
  func.func @transform_15(%arg0: i32) -> (i32, i32, i32) {
    %c0_i32 = arith.constant 0 : i32
    %c0_i32_0 = arith.constant 0 : i32
    %c0_i32_1 = arith.constant 0 : i32
    return %arg0, %c0_i32, %c0_i32_0 : i32, i32, i32
  }
  func.func @transform_16(%arg0: i32) -> (i32, i32, i32) {
    %c0_i32 = arith.constant 0 : i32
    %c0_i32_0 = arith.constant 0 : i32
    %c0_i32_1 = arith.constant 0 : i32
    return %arg0, %c0_i32, %c0_i32_0 : i32, i32, i32
  }
  func.func @transform_17(%arg0: i32) -> (i32, i32, i32) {
    %c0_i32 = arith.constant 0 : i32
    %c0_i32_0 = arith.constant 0 : i32
    %c0_i32_1 = arith.constant 0 : i32
    return %arg0, %c0_i32, %c0_i32_0 : i32, i32, i32
  }
  func.func @transform_18(%arg0: i32) -> (i32, i32, i32) {
    %c0_i32 = arith.constant 0 : i32
    %c0_i32_0 = arith.constant 0 : i32
    %c0_i32_1 = arith.constant 0 : i32
    return %arg0, %c0_i32, %c0_i32_0 : i32, i32, i32
  }
  func.func @transform_19(%arg0: i32) -> (i32, i32, i32) {
    %c0_i32 = arith.constant 0 : i32
    %c0_i32_0 = arith.constant 0 : i32
    %c0_i32_1 = arith.constant 0 : i32
    return %arg0, %c0_i32, %c0_i32_0 : i32, i32, i32
  }
  func.func @transform_20(%arg0: i32) -> (i32, i32, i32) {
    %c0_i32 = arith.constant 0 : i32
    %c0_i32_0 = arith.constant 0 : i32
    %c0_i32_1 = arith.constant 0 : i32
    return %arg0, %c0_i32, %c0_i32_0 : i32, i32, i32
  }
  func.func @transform_21(%arg0: i32) -> (i32, i32, i32) {
    %c0_i32 = arith.constant 0 : i32
    %c0_i32_0 = arith.constant 0 : i32
    %c0_i32_1 = arith.constant 0 : i32
    return %arg0, %c0_i32, %c0_i32_0 : i32, i32, i32
  }
  func.func @transform_22(%arg0: i32) -> (i32, i32) {
    %c0_i32 = arith.constant 0 : i32
    %c0_i32_0 = arith.constant 0 : i32
    %c0_i32_1 = arith.constant 0 : i32
    return %c0_i32, %c0_i32_0 : i32, i32
  }
  func.func @transform_23(%arg0: i32) -> (i32, i32) {
    %c0_i32 = arith.constant 0 : i32
    %c0_i32_0 = arith.constant 0 : i32
    %c0_i32_1 = arith.constant 0 : i32
    return %c0_i32, %c0_i32_0 : i32, i32
  }
  func.func @transform_24(%arg0: i32) -> (i32, i32) {
    %c0_i32 = arith.constant 0 : i32
    %c0_i32_0 = arith.constant 0 : i32
    %c0_i32_1 = arith.constant 0 : i32
    return %c0_i32, %c0_i32_0 : i32, i32
  }
  func.func @transform_25(%arg0: i32) -> (i32, i32) {
    %c0_i32 = arith.constant 0 : i32
    %c0_i32_0 = arith.constant 0 : i32
    %c0_i32_1 = arith.constant 0 : i32
    return %c0_i32, %c0_i32_0 : i32, i32
  }
  func.func @transform_26(%arg0: i32) -> (i32, i32) {
    %c0_i32 = arith.constant 0 : i32
    %c0_i32_0 = arith.constant 0 : i32
    %c0_i32_1 = arith.constant 0 : i32
    return %c0_i32, %c0_i32_0 : i32, i32
  }
}

</mosaic_0001>

<bundles_post_ra>
// kernel: vit_forward.1
= control target key start
LH: loop header
LB: loop body
LE: loop exit
PB: predicated region body
PF: predicated region fallthrough
CT: control target
= control target key end

     0   :  { %s5134_s0 = inlined_call_operand.vmem [shape: f32[32,48], index: 0, kind: input, shape index: {}]   ;;  %s5135_s1 = inlined_call_operand.vmem [shape: f32[48,64], index: 1, kind: input, shape index: {}]   ;;  %s5136_s2 = inlined_call_operand.vmem [shape: f32[1,64], index: 2, kind: input, shape index: {}]   ;;  %s5137_s3 = inlined_call_operand.vmem [shape: f32[32,64], index: 3, kind: input, shape index: {}]   ;;  %s5138_s4 = inlined_call_operand.vmem [shape: f32[2,64], index: 4, kind: input, shape index: {}]   ;;  %s5139_s5 = inlined_call_operand.vmem [shape: f32[34,34], index: 5, kind: input, shape index: {}]   ;;  %s5140_s6 = inlined_call_operand.vmem [shape: f32[2,1,64], index: 6, kind: input, shape index: {}]   ;;  %s5141_s7 = inlined_call_operand.vmem [shape: f32[2,1,64], index: 7, kind: input, shape index: {}]   ;;  %s5142_s8 = inlined_call_operand.vmem [shape: f32[2,64,64], index: 8, kind: input, shape index: {}]   ;;  %s5143_s9 = inlined_call_operand.vmem [shape: f32[2,1,64], index: 9, kind: input, shape index: {}]   ;;  %s5144_s10 = inlined_call_operand.vmem [shape: f32[2,64,64], index: 10, kind: input, shape index: {}]   ;;  %s5145_s11 = inlined_call_operand.vmem [shape: f32[2,1,64], index: 11, kind: input, shape index: {}]   ;;  %s5146_s12 = inlined_call_operand.vmem [shape: f32[2,64,64], index: 12, kind: input, shape index: {}]   ;;  %s5147_s13 = inlined_call_operand.vmem [shape: f32[2,1,64], index: 13, kind: input, shape index: {}]   ;;  %s5148_s14 = inlined_call_operand.vmem [shape: f32[2,64,64], index: 14, kind: input, shape index: {}]   ;;  %s5149_s15 = inlined_call_operand.vmem [shape: f32[2,1,64], index: 15, kind: input, shape index: {}]   ;;  %s5150_s16 = inlined_call_operand.vmem [shape: f32[2,1,64], index: 16, kind: input, shape index: {}]   ;;  %s5151_s17 = inlined_call_operand.vmem [shape: f32[2,1,64], index: 17, kind: input, shape index: {}]   ;;  %s5152_s18 = inlined_call_operand.vmem [shape: f32[2,64,256], index: 18, kind: input, shape index: {}]   ;;  %s5153_s19 = inlined_call_operand.vmem [shape: f32[2,1,256], index: 19, kind: input, shape index: {}]   ;;  %s5154_s20 = inlined_call_operand.vmem [shape: f32[2,256,64], index: 20, kind: input, shape index: {}]   ;;  %s5155_s21 = inlined_call_operand.vmem [shape: f32[2,1,64], index: 21, kind: input, shape index: {}]   ;;  %s5156_s22 = inlined_call_operand.vmem [shape: f32[1,64], index: 22, kind: input, shape index: {}]   ;;  %s5157_s23 = inlined_call_operand.vmem [shape: f32[1,64], index: 23, kind: input, shape index: {}]   ;;  %s5158_s24 = inlined_call_operand.vmem [shape: f32[64,16], index: 24, kind: input, shape index: {}]   ;;  %s5159_s25 = inlined_call_operand.vmem [shape: f32[1,16], index: 25, kind: input, shape index: {}]   ;;  %s5160_s26 = inlined_call_operand.hbm [shape: f32[2,16], index: 26, kind: output, shape index: {}]  }
   0x1   :  { %5167 = sst [smem:[#allocation8_spill]] %s5134_s0 }
   0x2   :  { %5168 = sst [smem:[#allocation9_spill]] %s5135_s1 }
   0x3   :  { %5169 = sst [smem:[#allocation10_spill]] %s5136_s2 }
   0x4   :  { %5170 = sst [smem:[#allocation11_spill]] %s5137_s3 }
   0x5   :  { %5171 = sst [smem:[#allocation12_spill]] %s5138_s4 }
   0x6   :  { %5172 = sst [smem:[#allocation13_spill]] %s5139_s5 }
   0x7   :  { %5173 = sst [smem:[#allocation14_spill]] %s5140_s6 }
   0x8   :  { %5174 = sst [smem:[#allocation15_spill]] %s5141_s7 }
   0x9   :  { %5175 = sst [smem:[#allocation16_spill]] %s5142_s8 }
   0xa   :  { %5176 = sst [smem:[#allocation17_spill]] %s5143_s9 }
   0xb   :  { %5177 = sst [smem:[#allocation18_spill]] %s5144_s10 }
   0xc   :  { %5178 = sst [smem:[#allocation19_spill]] %s5145_s11 }
   0xd   :  { %5179 = sst [smem:[#allocation20_spill]] %s5146_s12 }
   0xe   :  { %5180 = sst [smem:[#allocation21_spill]] %s5156_s22 }
   0xf   :  { %5181 = sst [smem:[#allocation22_spill]] %s5157_s23 }
  0x10   :  { %5182 = sst [smem:[#allocation23_spill]] %s5158_s24 }
  0x11   :  { %5183 = sst [smem:[#allocation24_spill]] %s5159_s25 }
  0x12   :  { %5184 = sst [smem:[#allocation25_spill]] %s5160_s26 }
  0x13   :  { %31 = vsyncpa [#allocation5], 0  ;;  %s3917_s27 = smov 0  }
  0x14 LB: > { %5185 = sst [smem:[#allocation7_spill]] %s3772_s27  ;;  %s3923_s3 = sadd.s32 4294967295, %s3772_s27   ;;  %s3772_s27 = sphi %s3917_s27, %s37_s27  }
  0x15   : > { %p3387_p0 = scmp.ge.s32.totalorder %s3772_s27, 1  ;;  %p839_p1 = scmp.lt.s32.totalorder %s3772_s27, 3 }
  0x17   : > { %p840_p2 = pnand %p3387_p0, %p839_p1 }
  0x18   : > { %p960_p3 = scmp.lt.s32.totalorder (!%p840_p2), %s3923_s3, 1  ;;  %s5189_s26 = sld [smem:[#allocation16_spill]] (!%p840_p2) }
  0x19   : > { %843 = sbr.rel (%p840_p2) target bundleno = 2718 (0xa9e), region = 124  ;;  %s5190_s24 = sld [smem:[#allocation18_spill]] (!%p840_p2) }
  0x1a   : > { %s5192_s12 = sld [smem:[#allocation20_spill]] (!%p840_p2)  ;;  %p3401_p4 = scmp.ne.s32.totalorder (!%p840_p2), %s3923_s3, 0 }
  0x1e   : > { %s3929_s7 = scalar_select %p960_p3, %s3923_s3, 1 }
  0x1f   : > { %s5193_s1 = sld [smem:[#allocation9_spill]] (!%p3401_p4) }
  0x20   : > { %s3516_s5 = sshll.u32 %s3929_s7, 6  ;;  %s3520_s11 = sshll.u32 %s3929_s7, 7 }
  0x21   : > { %s3947_s25 = scalar_lea.vmem %s5189_s26, %s3516_s5  ;;  %s3952_s4 = scalar_lea.vmem %s5190_s24, %s3516_s5 }
  0x22   : > { %s3961_s10 = scalar_lea.vmem %s5192_s12, %s3516_s5  ;;  %s3970_s28 = scalar_lea.vmem %s5148_s14, %s3516_s5 }
  0x23   : > { %s3988_s27 = scalar_lea.vmem %s5152_s18, %s3520_s11  ;;  %s3398_s5 = sshll.u32 %s3929_s7, 1 }
  0x24   : > { %s3994_s22 = scalar_lea.vmem %s5153_s19, %s3398_s5  ;;  %s3521_s23 = sshll.u32 %s3929_s7, 8 }
  0x25   : > { %s4000_s0 = scalar_lea.vmem %s5154_s20, %s3521_s23  ;;  %1024 = sbr.rel (%p3401_p4) target bundleno = 192 (0xc0), region = 128 }
  0x26   : > { %s5194_s24 = sld [smem:[#allocation8_spill]] (!%p3401_p4) }
  0x27   : > { %s5195_s5 = sld [smem:[#allocation12_spill]] (!%p3401_p4) }
  0x28   : > { %s5196_s29 = sld [smem:[#allocation10_spill]] (!%p3401_p4) }
  0x29   : > { %s5197_s11 = sld [smem:[#allocation11_spill]] (!%p3401_p4) }
  0x2a   : > { %v1034_v0 = vld [vmem:[%s5193_s1 + $0x28] sm:$0xff]  ;;  %v1033_v1 = vld [vmem:[%s5193_s1 + $0x20] sm:$0xff]  ;;  %v1032_v2 = vld [vmem:[%s5193_s1 + $0x18] sm:$0xff]  ;;  %vm1039_vm0 = vcmask 392192   ;;  %vm1095_vm1 = vcmask 517120   ;;  %vm1089_vm2 = vcmask 523264  }
  0x2b   : > { %3523 = vmatpush.msra.mxu2 %v1034_v0  ;;  %3524 = vmatpush.msra.mxu3 %v1034_v0  ;;  %v1031_v3 = vld [vmem:[%s5193_s1 + $0x10] sm:$0xff]  ;;  %v1030_v4 = vld [vmem:[%s5193_s1 + $0x8] sm:$0xff]  ;;  %v1029_v5 = vld [vmem:[%s5193_s1] sm:$0xff] }
  0x2c   : > { %1062 = vmatpush.msra.mxu0 %v1034_v0  ;;  %3522 = vmatpush.msra.mxu1 %v1034_v0  ;;  %v1027_v6 = vld [vmem:[%s5194_s24 + $0x10] sm:$0xff]  ;;  %v1028_v7 = vld [vmem:[%s5194_s24 + $0x18] sm:$0xff]  ;;  %v1025_v8 = vld [vmem:[%s5194_s24] sm:$0xff] }
  0x2d   : > { %3526 = vmatpush.msra.mxu2 %v1033_v1  ;;  %3527 = vmatpush.msra.mxu3 %v1033_v1  ;;  %v1026_v9 = vld [vmem:[%s5194_s24 + $0x8] sm:$0xff]  ;;  %v1094_v10 = vld [vmem:[%s5195_s5] sm:$0x3] }
  0x2e   : > { %1063 = vmatpush.msra.mxu0 %v1033_v1  ;;  %3525 = vmatpush.msra.mxu1 %v1033_v1  ;;  %1096 = vst.msk [vmem:[#allocation2 + $0x20] sm:$0x3] %vm1095_vm1, %v1094_v10  ;;  %v3562_v11 = vld [vmem:[%s5196_s29] ss:$0 sm:$0xff] }
  0x2f   : > { %3529 = vmatpush.msra.mxu2 %v1032_v2  ;;  %3530 = vmatpush.msra.mxu3 %v1032_v2  ;;  %v1081_v13 = vld [vmem:[%s5197_s11] sm:$0xff]  ;;  %v1082_v15 = vld [vmem:[%s5197_s11 + $0x8] sm:$0xff]  ;;  %v1083_v21 = vld [vmem:[%s5197_s11 + $0x10] sm:$0xff] }
  0x30   : > { %1064 = vmatpush.msra.mxu0 %v1032_v2  ;;  %3528 = vmatpush.msra.mxu1 %v1032_v2  ;;  %v1084_v23 = vld [vmem:[%s5197_s11 + $0x18] sm:$0xff] }
  0x31   : > { %3532 = vmatpush.msra.mxu2 %v1031_v3  ;;  %3533 = vmatpush.msra.mxu3 %v1031_v3 }
  0x32   : > { %1065 = vmatpush.msra.mxu0 %v1031_v3  ;;  %3531 = vmatpush.msra.mxu1 %v1031_v3 }
  0x33   : > { %3535 = vmatpush.msra.mxu2 %v1030_v4  ;;  %3536 = vmatpush.msra.mxu3 %v1030_v4 }
  0x34   : > { %1066 = vmatpush.msra.mxu0 %v1030_v4  ;;  %3534 = vmatpush.msra.mxu1 %v1030_v4 }
  0x35   : > { %3538 = vmatpush.msra.mxu2 %v1029_v5  ;;  %3539 = vmatpush.msra.mxu3 %v1029_v5 }
  0x36   : > { %3404 = vmatmul.msk.f32.vlgmr.msra.gmra.mxu2 %vm1039_vm0, %v1027_v6  ;;  %3405 = vmatmul.msk.f32.vlgmr.msra.gmra.mxu3 %vm1039_vm0, %v1028_v7 }
  0x37   : > { %1067 = vmatpush.msra.mxu0 %v1029_v5  ;;  %3537 = vmatpush.msra.mxu1 %v1029_v5 }
  0x38   : > { %3402 = vmatmul.msk.f32.vlgmr.msra.gmra.mxu0 %vm1039_vm0, %v1025_v8  ;;  %3403 = vmatmul.msk.f32.vlgmr.msra.gmra.mxu1 %vm1039_vm0, %v1026_v9 }
  0xb5   : > { %v1069_v12 = vpop.f32.mrf.mxu0  ;;  %v1072_v14 = vpop.f32.mrf.mxu1 }
  0xb6   : > { %v1070_v16 = vadd.f32 %v3562_v11, %v1069_v12  ;;  %v1073_v17 = vadd.f32 %v3562_v11, %v1072_v14 }
  0xb8   : > { %v1085_v18 = vadd.f32 %v1081_v13, %v1070_v16  ;;  %v1086_v19 = vadd.f32 %v1082_v15, %v1073_v17 }
  0xb9   : > { %v1075_v20 = vpop.f32.mrf.mxu2  ;;  %v1078_v22 = vpop.f32.mrf.mxu3 }
  0xba   : > { %1090 = vst.msk [vmem:[#allocation2] sm:$0xff] %vm1089_vm2, %v1085_v18  ;;  %v1076_v24 = vadd.f32 %v3562_v11, %v1075_v20  ;;  %v1079_v25 = vadd.f32 %v3562_v11, %v1078_v22 }
  0xbb   : > { %1091 = vst.msk [vmem:[#allocation2 + $0x8] sm:$0xff] %vm1089_vm2, %v1086_v19 }
  0xbc   : > { %v1087_v26 = vadd.f32 %v1083_v21, %v1076_v24  ;;  %v1088_v27 = vadd.f32 %v1084_v23, %v1079_v25 }
  0xbe   : > { %1092 = vst.msk [vmem:[#allocation2 + $0x10] sm:$0xff] %vm1089_vm2, %v1087_v26 }
  0xbf   : > { %1093 = vst.msk [vmem:[#allocation2 + $0x18] sm:$0xff] %vm1089_vm2, %v1088_v27 }
  0xc0 PF: > { %vm1104_vm3 = vcmask 523264   ;;  %vm1117_vm4 = vcmask 517120   ;;  %v1101_v32 = vld [vmem:[#allocation2 + $0x20] sm:$0x3]  ;;  %v3774_v38 = vmov 64.0   ;;  %v1246_v6 = vld [vmem:[%s3947_s25 + $0x38] sm:$0xff]  ;;  %s5204_s26 = scalar_lea.vmem %s5147_s13, %s3929_s7  ;;  %s5210_s8 = scalar_lea.vmem %s5149_s15, %s3929_s7 }
  0xc1   : > { %v1097_v29 = vld [vmem:[#allocation2] sm:$0xff]  ;;  %v1118_v35 = vsel %vm1117_vm4, %v1101_v32, 0.0  ;;  %3602 = vrcp.f32 %v3774_v38  ;;  %v1305_v7 = vld [vmem:[%s3952_s4 + $0x38] sm:$0xff]  ;;  %1274 = vmatpush.msra.mxu0 %v1246_v6  ;;  %v1245_v9 = vld [vmem:[%s3947_s25 + $0x30] sm:$0xff]  ;;  %s5200_s29 = sld [smem:[#allocation15_spill]]  ;;  %s3777_s30 = smov 80  }
  0xc2   : > { %v1105_v31 = vsel %vm1104_vm3, %v1097_v29, 0.0  ;;  %v1098_v34 = vld [vmem:[#allocation2 + $0x8] sm:$0xff]  ;;  %1119 = vadd.xlane.f32.xlu2 %v1118_v35  ;;  %v1349_v8 = vld [vmem:[%s3961_s10 + $0x38] sm:$0xff]  ;;  %1318 = vmatpush.msra.mxu1 %v1305_v7  ;;  %v1304_v10 = vld [vmem:[%s3952_s4 + $0x30] sm:$0xff]  ;;  %s5205_s12 = sld [smem:[#allocation19_spill]]  ;;  %s3780_s6 = smov 48  }
  0xc3   : > { %1106 = vadd.xlane.f32.xlu0 %v1105_v31  ;;  %v1108_v37 = vsel %vm1104_vm3, %v1098_v34, 0.0  ;;  %1362 = vmatpush.msra.mxu2 %v1349_v8  ;;  %v1348_v11 = vld [vmem:[%s3961_s10 + $0x30] sm:$0xff]  ;;  %v1244_v12 = vld [vmem:[%s3947_s25 + $0x28] sm:$0xff]  ;;  %v1243_v15 = vld [vmem:[%s3947_s25 + $0x20] sm:$0xff]  ;;  %s5207_s23 = sld [smem:[#allocation17_spill]]  ;;  %p3510_p5 = scmp.ne.s32.totalorder %s3923_s3, 1 }
  0xc4   : > { %1275 = vmatpush.msra.mxu0 %v1245_v9  ;;  %1319 = vmatpush.msra.mxu1 %v1304_v10  ;;  %v1303_v13 = vld [vmem:[%s3952_s4 + $0x28] sm:$0xff]  ;;  %v1302_v16 = vld [vmem:[%s3952_s4 + $0x20] sm:$0xff]  ;;  %v1242_v18 = vld [vmem:[%s3947_s25 + $0x18] sm:$0xff]  ;;  %s5209_s5 = sld [smem:[#allocation13_spill]] }
  0xc5   : > { %v1099_v28 = vld [vmem:[#allocation2 + $0x10] sm:$0xff]  ;;  %1363 = vmatpush.msra.mxu2 %v1348_v11  ;;  %v1347_v14 = vld [vmem:[%s3961_s10 + $0x28] sm:$0xff]  ;;  %v1346_v17 = vld [vmem:[%s3961_s10 + $0x20] sm:$0xff] }
  0xc6   : > { %v1111_v30 = vsel %vm1104_vm3, %v1099_v28, 0.0  ;;  %v1100_v33 = vld [vmem:[#allocation2 + $0x18] sm:$0xff]  ;;  %1276 = vmatpush.msra.mxu0 %v1244_v12  ;;  %1320 = vmatpush.msra.mxu1 %v1303_v13  ;;  %v1241_v21 = vld [vmem:[%s3947_s25 + $0x10] sm:$0xff]  ;;  %v1240_v24 = vld [vmem:[%s3947_s25 + $0x8] sm:$0xff] }
  0xc7   : > { %1112 = vadd.xlane.f32.xlu1 %v1111_v30  ;;  %v1114_v36 = vsel %vm1104_vm3, %v1100_v33, 0.0  ;;  %v3603_v39 = vpop.eup %3602  ;;  %1364 = vmatpush.msra.mxu2 %v1347_v14  ;;  %v1301_v19 = vld [vmem:[%s3952_s4 + $0x18] sm:$0xff]  ;;  %v1300_v22 = vld [vmem:[%s3952_s4 + $0x10] sm:$0xff]  ;;  %v1299_v25 = vld [vmem:[%s3952_s4 + $0x8] sm:$0xff]  ;;  %s5201_s2 = scalar_lea.vmem %s5200_s29, %s3929_s7 }
  0xc8   : > { %v1122_v40 = vmul.f32 64.0, %v3603_v39  ;;  %vm1126_vm5 = vweird.f32 %v3603_v39  ;;  %1277 = vmatpush.msra.mxu0 %v1243_v15  ;;  %1321 = vmatpush.msra.mxu1 %v1302_v16  ;;  %v1345_v20 = vld [vmem:[%s3961_s10 + $0x18] sm:$0xff]  ;;  %v1344_v23 = vld [vmem:[%s3961_s10 + $0x10] sm:$0xff]  ;;  %v1343_v26 = vld [vmem:[%s3961_s10 + $0x8] sm:$0xff] }
  0xc9   : > { %1365 = vmatpush.msra.mxu2 %v1346_v17  ;;  %v1239_v27 = vld [vmem:[%s3947_s25] sm:$0xff]  ;;  %s5206_s25 = scalar_lea.vmem %s5205_s12, %s3929_s7  ;;  %s5208_s29 = scalar_lea.vmem %s5207_s23, %s3929_s7 }
  0xca   : > { %v1123_v41 = vsub.f32 1.0, %v1122_v40  ;;  %1278 = vmatpush.msra.mxu0 %v1242_v18  ;;  %1322 = vmatpush.msra.mxu1 %v1301_v19  ;;  %s5219_s23 = scalar_lea.vmem %s5155_s21, %s3929_s7  ;;  %s5223_s12 = sld [smem:[#allocation24_spill]] (!%p3510_p5) }
  0xcb   : > { %1109 = vadd.xlane.f32.xlu0 %v1108_v37  ;;  %1366 = vmatpush.msra.mxu2 %v1345_v20 }
  0xcc   : > { %v1124_v42 = vmul.f32 %v3603_v39, %v1123_v41  ;;  %1279 = vmatpush.msra.mxu0 %v1241_v21  ;;  %1323 = vmatpush.msra.mxu1 %v1300_v22 }
  0xcd   : > { %1367 = vmatpush.msra.mxu2 %v1344_v23 }
  0xce   : > { %v1125_v43 = vadd.f32 %v3603_v39, %v1124_v42  ;;  %1280 = vmatpush.msra.mxu0 %v1240_v24  ;;  %1324 = vmatpush.msra.mxu1 %v1299_v25 }
  0xcf   : > { %1115 = vadd.xlane.f32.xlu1 %v1114_v36  ;;  %1368 = vmatpush.msra.mxu2 %v1343_v26 }
  0xd0   : > { %v4060_v44 = vsel %vm1126_vm5, %v3603_v39, %v1125_v43  ;;  %1281 = vmatpush.msra.mxu0 %v1239_v27 }
 0x135   : > { %v1120_v53 = vpop.xlane.xlu2 %1119 }
 0x136   : > { %v1107_v46 = vpop.xlane.xlu0 %1106  ;;  %v1132_v60 = vmul.f32 %v4060_v44, %v1120_v53 }
 0x137   : > { %v1128_v48 = vmul.f32 %v4060_v44, %v1107_v46 }
 0x138   : > { %v4081_v63 = vsub.f32 %v1101_v32, %v1132_v60 }
 0x139   : > { %v4066_v50 = vsub.f32 %v1097_v29, %v1128_v48  ;;  %v1342_v29 = vld [vmem:[%s3961_s10] sm:$0xff]  ;;  %s5212_s10 = scalar_lea.vmem %s5151_s17, %s3929_s7 }
 0x13a   : > { %v1113_v45 = vpop.xlane.xlu1 %1112  ;;  %v1142_v4 = vmul.f32 %v4081_v63, %v4081_v63  ;;  %1369 = vmatpush.msra.mxu2 %v1342_v29 }
 0x13b   : > { %v1130_v47 = vmul.f32 %v4060_v44, %v1113_v45  ;;  %v1138_v52 = vmul.f32 %v4066_v50, %v4066_v50 }
 0x13c   : > { %v1155_v5 = vsel %vm1117_vm4, %v1142_v4, 0.0 }
 0x13d   : > { %v4064_v49 = vsub.f32 %v1099_v28, %v1130_v47  ;;  %v1143_v55 = vsel %vm1104_vm3, %v1138_v52, 0.0  ;;  %v1298_v28 = vld [vmem:[%s3952_s4] sm:$0xff]  ;;  %s5198_s4 = sld [smem:[#allocation14_spill]] }
 0x13e   : > { %1144 = vadd.xlane.f32.xlu2 %v1143_v55  ;;  %v1110_v57 = vpop.xlane.xlu0 %1109  ;;  %1325 = vmatpush.msra.mxu1 %v1298_v28 }
 0x13f   : > { %v1140_v51 = vmul.f32 %v4064_v49, %v4064_v49  ;;  %v1129_v59 = vmul.f32 %v4060_v44, %v1110_v57 }
 0x141   : > { %v1149_v54 = vsel %vm1104_vm3, %v1140_v51, 0.0  ;;  %v4079_v62 = vsub.f32 %v1098_v34, %v1129_v59 }
 0x142   : > { %1150 = vadd.xlane.f32.xlu1 %v1149_v54  ;;  %v1116_v56 = vpop.xlane.xlu1 %1115 }
 0x143   : > { %v1131_v58 = vmul.f32 %v4060_v44, %v1116_v56  ;;  %v1139_v1 = vmul.f32 %v4079_v62, %v4079_v62  ;;  %s5199_s9 = scalar_lea.vmem %s5198_s4, %s3929_s7  ;;  %s3775_s4 = smov 112  }
 0x145   : > { %v4077_v61 = vsub.f32 %v1100_v33, %v1131_v58  ;;  %v1146_v3 = vsel %vm1104_vm3, %v1139_v1, 0.0  ;;  %v3593_v1 = vld [vmem:[%s5199_s9] ss:$0 sm:$0xff] }
 0x146   : > { %1147 = vadd.xlane.f32.xlu0 %v1146_v3 }
 0x147   : > { %v1141_v0 = vmul.f32 %v4077_v61, %v4077_v61 }
 0x149   : > { %v1152_v2 = vsel %vm1104_vm3, %v1141_v0, 0.0 }
 0x14a   : > { %1153 = vadd.xlane.f32.xlu2 %v1152_v2 }
 0x14e   : > { %1156 = vadd.xlane.f32.xlu0 %v1155_v5  ;;  %v3594_v5 = vld [vmem:[%s5201_s2] ss:$0 sm:$0xff]  ;;  %s3776_s2 = smov 96  }
 0x1b1   : > { %v1145_v31 = vpop.xlane.xlu2 %1144 }
 0x1b2   : > { %v1158_v33 = vmul.f32 %v1145_v31, %v4060_v44 }
 0x1b4   : > { %v1163_v35 = vadd.f32 1e-06, %v1158_v33 }
 0x1b5   : > { %v1151_v30 = vpop.xlane.xlu1 %1150 }
 0x1b6   : > { %v1160_v32 = vmul.f32 %v1151_v30, %v4060_v44  ;;  %vm1174_vm7 = vweird.f32 %v1163_v35 }
 0x1b8   : > { %v1165_v34 = vadd.f32 1e-06, %v1160_v32 }
 0x1b9   : > { %v1148_v37 = vpop.xlane.xlu0 %1147 }
 0x1ba   : > { %3604 = vrsqrt.f32 %v1165_v34  ;;  %v1159_v39 = vmul.f32 %v1148_v37, %v4060_v44  ;;  %vm1194_vm9 = vweird.f32 %v1165_v34 }
 0x1bb   : > { %3606 = vrsqrt.f32 %v1163_v35 }
 0x1bc   : > { %v1164_v42 = vadd.f32 1e-06, %v1159_v39  ;;  %v3596_v39 = vld [vmem:[%s5206_s25] ss:$0 sm:$0xff]  ;;  %s5211_s25 = scalar_lea.vmem %s5150_s16, %s3929_s7 }
 0x1bd   : > { %v1154_v36 = vpop.xlane.xlu2 %1153 }
 0x1be   : > { %v1161_v38 = vmul.f32 %v1154_v36, %v4060_v44  ;;  %vm1184_vm12 = vweird.f32 %v1164_v42 }
 0x1c0   : > { %v3605_v40 = vpop.eup %3604  ;;  %v1166_v41 = vadd.f32 1e-06, %v1161_v38 }
 0x1c1   : > { %v3607_v43 = vpop.eup %3606  ;;  %v1189_v45 = vmul.f32 %v3605_v40, %v1165_v34  ;;  %v1157_v51 = vpop.xlane.xlu0 %1156  ;;  %vm1195_vm10 = vweird.f32 %v3605_v40 }
 0x1c2   : > { %v1169_v46 = vmul.f32 %v3607_v43, %v1163_v35  ;;  %3608 = vrsqrt.f32 %v1166_v41  ;;  %v1162_v53 = vmul.f32 %v1157_v51, %v4060_v44  ;;  %vm1175_vm6 = vweird.f32 %v3607_v43  ;;  %vm4132_vm13 = vmor %vm1194_vm9, %vm1195_vm10 }
 0x1c3   : > { %3610 = vrsqrt.f32 %v1164_v42  ;;  %v1190_v48 = vmul.f32 %v3605_v40, %v1189_v45  ;;  %vm1176_vm8 = vmor %vm1174_vm7, %vm1175_vm6  ;;  %vm1204_vm15 = vweird.f32 %v1166_v41  ;;  %vm1391_vm7 = vcmask 130048  }
 0x1c4   : > { %v1170_v47 = vmul.f32 %v3607_v43, %v1169_v46  ;;  %v1167_v56 = vadd.f32 1e-06, %v1162_v53  ;;  %vm1464_vm9 = vcmask 277504   ;;  %vm1477_vm10 = vcmask 271360  }
 0x1c5   : > { %v1191_v58 = vmul.f32 0.5, %v1190_v48 }
 0x1c6   : > { %v1171_v52 = vmul.f32 0.5, %v1170_v47  ;;  %3612 = vrsqrt.f32 %v1167_v56  ;;  %vm1214_vm2 = vweird.f32 %v1167_v56  ;;  %v3595_v47 = vld [vmem:[%s5208_s29] ss:$0 sm:$0xff] }
 0x1c7   : > { %v1192_v6 = vsub.f32 1.5, %v1191_v58 }
 0x1c8   : > { %v3609_v54 = vpop.eup %3608  ;;  %v1172_v55 = vsub.f32 1.5, %v1171_v52 }
 0x1c9   : > { %v3611_v57 = vpop.eup %3610  ;;  %v1199_v60 = vmul.f32 %v3609_v54, %v1166_v41  ;;  %v1193_v13 = vmul.f32 %v3605_v40, %v1192_v6  ;;  %vm1205_vm0 = vweird.f32 %v3609_v54 }
 0x1ca   : > { %v1173_v59 = vmul.f32 %v3607_v43, %v1172_v55  ;;  %v1179_v0 = vmul.f32 %v3611_v57, %v1164_v42  ;;  %vm1185_vm11 = vweird.f32 %v3611_v57  ;;  %vm1206_vm1 = vmor %vm1204_vm15, %vm1205_vm0  ;;  %vm2256_vm15 = vcmask 523648  }
 0x1cb   : > { %v1200_v7 = vmul.f32 %v3609_v54, %v1199_v60  ;;  %vm1186_vm14 = vmor %vm1184_vm12, %vm1185_vm11  ;;  %v1197_v19 = vsel %vm4132_vm13, %v3605_v40, %v1193_v13  ;;  %vm1576_vm11 = vcmask 123904   ;;  %vm1802_vm12 = vcmask 261248  }
 0x1cc   : > { %v1177_v2 = vsel %vm1176_vm8, %v3607_v43, %v1173_v59  ;;  %v1180_v3 = vmul.f32 %v3611_v57, %v1179_v0  ;;  %v3613_v10 = vpop.eup %3612  ;;  %v1220_v24 = vmul.f32 %v1197_v19, %v4064_v49  ;;  %vm1536_vm8 = vcmask 1041408  }
 0x1cd   : > { %v1218_v4 = vmul.f32 %v1177_v2, %v4066_v50  ;;  %v1201_v50 = vmul.f32 0.5, %v1200_v7  ;;  %v1209_v16 = vmul.f32 %v3613_v10, %v1167_v56  ;;  %vm1215_vm5 = vweird.f32 %v3613_v10 }
 0x1ce   : > { %v1181_v8 = vmul.f32 0.5, %v1180_v3  ;;  %vm1216_vm6 = vmor %vm1214_vm2, %vm1215_vm5  ;;  %vm1807_vm13 = vcmask 255104   ;;  %vm2034_vm0 = vcmask 386304  }
 0x1cf   : > { %v1226_v9 = vmul.f32 %v3593_v1, %v1218_v4  ;;  %v1202_v20 = vsub.f32 1.5, %v1201_v50  ;;  %v1210_v21 = vmul.f32 %v3613_v10, %v1209_v16 }
 0x1d0   : > { %v1182_v11 = vsub.f32 1.5, %v1181_v8 }
 0x1d1   : > { %v1234_v12 = vadd.f32 %v3594_v5, %v1226_v9  ;;  %v1203_v25 = vmul.f32 %v3609_v54, %v1202_v20  ;;  %v1211_v26 = vmul.f32 0.5, %v1210_v21 }
 0x1d2   : > { %v1183_v15 = vmul.f32 %v3611_v57, %v1182_v11 }
 0x1d3   : > { %3406 = vmatmul.msk.f32.vlgmr.msra.gmra.mxu0 %vm1104_vm3, %v1234_v12  ;;  %3411 = vmatmul.msk.f32.vlgmr.msra.gmra.mxu1 %vm1104_vm3, %v1234_v12  ;;  %v1207_v27 = vsel %vm1206_vm1, %v3609_v54, %v1203_v25  ;;  %v1212_v28 = vsub.f32 1.5, %v1211_v26  ;;  %vm2261_vm1 = vcmask 517504  }
 0x1d4   : > { %v1187_v17 = vsel %vm1186_vm14, %v3611_v57, %v1183_v15  ;;  %3416 = vmatmul.msk.f32.vlgmr.msra.gmra.mxu2 %vm1104_vm3, %v1234_v12  ;;  %v1221_v30 = vmul.f32 %v1207_v27, %v4077_v61  ;;  %vm2029_vm14 = vcmask 392448  }
 0x1d5   : > { %v1219_v18 = vmul.f32 %v1187_v17, %v4079_v62  ;;  %v1228_v62 = vmul.f32 %v3593_v1, %v1220_v24  ;;  %v1213_v31 = vmul.f32 %v3613_v10, %v1212_v28 }
 0x1d6   : > { %v1229_v49 = vmul.f32 %v3593_v1, %v1221_v30 }
 0x1d7   : > { %v1227_v22 = vmul.f32 %v3593_v1, %v1219_v18  ;;  %v1236_v29 = vadd.f32 %v3594_v5, %v1228_v62  ;;  %v1217_v32 = vsel %vm1216_vm6, %v3613_v10, %v1213_v31 }
 0x1d8   : > { %v1237_v33 = vadd.f32 %v3594_v5, %v1229_v49  ;;  %v1222_v34 = vmul.f32 %v1217_v32, %v4081_v63  ;;  %v3597_v63 = vld [vmem:[%s5204_s26] ss:$0 sm:$0xff]  ;;  %s5222_s26 = sld [smem:[#allocation22_spill]] (!%p3510_p5) }
 0x1d9   : > { %v1235_v23 = vadd.f32 %v3594_v5, %v1227_v22 }
 0x1da   : > { %v1230_v61 = vmul.f32 %v3593_v1, %v1222_v34 }
 0x1db   : > { %3407 = vmatmul.msk.f32.gmra.mxu0 %vm1104_vm3, %v1235_v23  ;;  %3412 = vmatmul.msk.f32.gmra.mxu1 %vm1104_vm3, %v1235_v23 }
 0x1dc   : > { %3417 = vmatmul.msk.f32.gmra.mxu2 %vm1104_vm3, %v1235_v23  ;;  %v1238_v35 = vadd.f32 %v3594_v5, %v1230_v61 }
 0x1e3   : > { %3408 = vmatmul.msk.f32.gmra.mxu0 %vm1104_vm3, %v1236_v29  ;;  %3413 = vmatmul.msk.f32.gmra.mxu1 %vm1104_vm3, %v1236_v29 }
 0x1e4   : > { %3418 = vmatmul.msk.f32.gmra.mxu2 %vm1104_vm3, %v1236_v29  ;;  %v4248_v29 = vld [vmem:[%s5209_s5] sm:$0xff] }
 0x1eb   : > { %3409 = vmatmul.msk.f32.gmra.mxu0 %vm1104_vm3, %v1237_v33  ;;  %3414 = vmatmul.msk.f32.gmra.mxu1 %vm1104_vm3, %v1237_v33 }
 0x1ec   : > { %3419 = vmatmul.msk.f32.gmra.mxu2 %vm1104_vm3, %v1237_v33 }
 0x1f3   : > { %3410 = vmatmul.msk.f32.gmra.mxu0 %vm1104_vm3, %v1238_v35  ;;  %3415 = vmatmul.msk.f32.gmra.mxu1 %vm1104_vm3, %v1238_v35 }
 0x1f4   : > { %3420 = vmatmul.msk.f32.gmra.mxu2 %vm1104_vm3, %v1238_v35  ;;  %v4261_v35 = vld [vmem:[%s5209_s5 + $0x8] sm:$0xff] }
 0x250   : > { %v1327_v36 = vpop.f32.mrf.mxu1  ;;  %v1283_v48 = vpop.f32.mrf.mxu0 }
 0x251   : > { %v1284_v53 = vadd.f32 %v3595_v47, %v1283_v48  ;;  %v1328_v5 = vadd.f32 %v3596_v39, %v1327_v36 }
 0x257   : > { %v1371_v37 = vpop.f32.mrf.mxu2 }
 0x258   : > { %v1330_v38 = vpop.f32.mrf.mxu1  ;;  %v1372_v41 = vadd.f32 %v3597_v63, %v1371_v37  ;;  %v1286_v1 = vpop.f32.mrf.mxu0 }
 0x259   : > { %v1331_v59 = vadd.f32 %v3596_v39, %v1330_v38  ;;  %v1287_v4 = vadd.f32 %v3595_v47, %v1286_v1  ;;  %v4298_v1 = vld [vmem:[%s5209_s5 + $0x20] sm:$0x3] }
 0x25f   : > { %v1374_v40 = vpop.f32.mrf.mxu2 }
 0x260   : > { %v1375_v42 = vadd.f32 %v3597_v63, %v1374_v40  ;;  %v1333_v43 = vpop.f32.mrf.mxu1  ;;  %v1289_v6 = vpop.f32.mrf.mxu0 }
 0x261   : > { %v1334_v45 = vadd.f32 %v3596_v39, %v1333_v43  ;;  %v1290_v7 = vadd.f32 %v3595_v47, %v1289_v6 }
 0x262   : > { %v4167_v46 = vpack.i.bf16 %v1372_v41, %v1375_v42 }
 0x263   : > { %1592 = vrot.lane.b32.xlu0 %v1334_v45, %s3775_s4 }
 0x267   : > { %v1377_v51 = vpop.f32.mrf.mxu2 }
 0x268   : > { %v1336_v52 = vpop.f32.mrf.mxu1  ;;  %v1378_v56 = vadd.f32 %v3597_v63, %v1377_v51  ;;  %v1292_v8 = vpop.f32.mrf.mxu0 }
 0x269   : > { %v1337_v54 = vadd.f32 %v3596_v39, %v1336_v52  ;;  %v1293_v9 = vadd.f32 %v3595_v47, %v1292_v8 }
 0x26b   : > { %1594 = vrot.lane.b32.xlu2 %v1337_v54, %s3775_s4  ;;  %1578 = vrot.lane.b32.xlu0 %v1284_v53, %s3775_s4 }
 0x26f   : > { %v1380_v55 = vpop.f32.mrf.mxu2 }
 0x270   : > { %v1381_v57 = vadd.f32 %v3597_v63, %v1380_v55  ;;  %v1339_v58 = vpop.f32.mrf.mxu1  ;;  %v1295_v10 = vpop.f32.mrf.mxu0 }
 0x271   : > { %v1340_v60 = vadd.f32 %v3596_v39, %v1339_v58  ;;  %v1296_v11 = vadd.f32 %v3595_v47, %v1295_v10 }
 0x272   : > { %v4177_v0 = vpack.i.bf16 %v1378_v56, %v1381_v57 }
 0x273   : > { %1825 = vrot.lane.b32.xlu0 %v1337_v54, %s3776_s2  ;;  %1590 = vrot.lane.b32.xlu2 %v1331_v59, %s3775_s4 }
 0x274   : > { %1596 = vrot.lane.b32.xlu1 %v1340_v60, %s3775_s4  ;;  %3421 = vmatpush.xpose.msk.msra.mxu3 %vm1391_vm7, %v1340_v60 }
 0x277   : > { %v1383_v2 = vpop.f32.mrf.mxu2 }
 0x278   : > { %v4183_v3 = vadd.f32 %v3597_v63, %v1383_v2  ;;  %3422 = vmatpush.xpose.msk.msra.mxu3 %vm1391_vm7, %v1337_v54 }
 0x27a   : > { %3431 = vmatpush.msk.msrb.mxu0 %vm1536_vm8, %v4183_v3 }
 0x27b   : > { %1580 = vrot.lane.b32.xlu2 %v1287_v4, %s3775_s4  ;;  %1827 = vrot.lane.b32.xlu0 %v1340_v60, %s3776_s2 }
 0x27c   : > { %1552 = vmatpush.msrb.mxu0 %v1381_v57  ;;  %1588 = vrot.lane.b32.xlu1 %v1328_v5, %s3775_s4 }
 0x27d   : > { %3423 = vmatpush.xpose.msk.msra.mxu3 %vm1391_vm7, %v1334_v45 }
 0x27e   : > { %1553 = vmatpush.msrb.mxu0 %v1378_v56 }
 0x280   : > { %1554 = vmatpush.msrb.mxu0 %v1375_v42 }
 0x281   : > { %3424 = vmatpush.xpose.msk.msra.mxu3 %vm1391_vm7, %v1331_v59 }
 0x282   : > { %1555 = vmatpush.msrb.mxu0 %v1372_v41  ;;  %v4274_v41 = vld [vmem:[%s5209_s5 + $0x10] sm:$0xff] }
 0x283   : > { %2052 = vrot.lane.b32.xlu2 %v1337_v54, %s3777_s30  ;;  %2050 = vrot.lane.b32.xlu0 %v1334_v45, %s3777_s30 }
 0x284   : > { %1582 = vrot.lane.b32.xlu1 %v1290_v7, %s3775_s4 }
 0x285   : > { %3425 = vmatpush.xpose.msk.msra.mxu3 %vm1391_vm7, %v1328_v5 }
 0x288   : > { %3426 = vmatmul.msk.f32.vlgmr.msra.gmra.mxu3 %vm1391_vm7, %v1284_v53 }
 0x28b   : > { %2054 = vrot.lane.b32.xlu2 %v1340_v60, %s3777_s30  ;;  %2048 = vrot.lane.b32.xlu0 %v1331_v59, %s3777_s30 }
 0x28c   : > { %1584 = vrot.lane.b32.xlu1 %v1293_v9, %s3775_s4 }
 0x290   : > { %3427 = vmatmul.msk.f32.gmra.mxu3 %vm1391_vm7, %v1287_v4 }
 0x293   : > { %1819 = vrot.lane.b32.xlu2 %v1328_v5, %s3776_s2  ;;  %1809 = vrot.lane.b32.xlu0 %v1284_v53, %s3776_s2 }
 0x294   : > { %1823 = vrot.lane.b32.xlu1 %v1334_v45, %s3776_s2 }
 0x298   : > { %3428 = vmatmul.msk.f32.gmra.mxu3 %vm1391_vm7, %v1290_v7 }
 0x29b   : > { %2038 = vrot.lane.b32.xlu0 %v1287_v4, %s3777_s30  ;;  %1586 = vrot.lane.b32.xlu2 %v1296_v11, %s3775_s4 }
 0x29c   : > { %1821 = vrot.lane.b32.xlu1 %v1331_v59, %s3776_s2 }
 0x2a0   : > { %3429 = vmatmul.msk.f32.gmra.mxu3 %vm1391_vm7, %v1293_v9 }
 0x2a3   : > { %1815 = vrot.lane.b32.xlu0 %v1293_v9, %s3776_s2  ;;  %2036 = vrot.lane.b32.xlu2 %v1284_v53, %s3777_s30  ;;  %v4286_v53 = vld [vmem:[%s5209_s5 + $0x18] sm:$0xff] }
 0x2a4   : > { %2046 = vrot.lane.b32.xlu1 %v1328_v5, %s3777_s30 }
 0x2a8   : > { %3430 = vmatmul.msk.f32.gmra.mxu3 %vm1391_vm7, %v1296_v11 }
 0x2ab   : > { %2044 = vrot.lane.b32.xlu0 %v1296_v11, %s3777_s30  ;;  %1813 = vrot.lane.b32.xlu2 %v1290_v7, %s3776_s2 }
 0x2ac   : > { %1811 = vrot.lane.b32.xlu1 %v1287_v4, %s3776_s2 }
 0x2b3   : > { %3569 = vrot.lane.b32.xlu0 %v4167_v46, %s3775_s4  ;;  %2042 = vrot.lane.b32.xlu2 %v1293_v9, %s3777_s30 }
 0x2b4   : > { %2040 = vrot.lane.b32.xlu1 %v1290_v7, %s3777_s30 }
 0x2bb   : > { %1727 = vrot.lane.b32.xlu0 %v4183_v3, %s3775_s4 }
 0x2bc   : > { %1817 = vrot.lane.b32.xlu1 %v1296_v11, %s3776_s2 }
 0x2c3   : > { %2181 = vrot.lane.b32.xlu0 %v4183_v3, %s3777_s30 }
 0x2c4   : > { %3564 = vrot.lane.b32.xlu1 %v4177_v0, %s3775_s4 }
 0x2c5   : > { %v1595_v12 = vpop.permute.xlu2 %1594 }
 0x2cc   : > { %3574 = vrot.lane.b32.xlu1 %v4177_v0, %s3777_s30 }
 0x2cd   : > { %v1591_v14 = vpop.permute.xlu2 %1590 }
 0x2d5   : > { %v1593_v13 = vpop.permute.xlu0 %1592  ;;  %v1581_v15 = vpop.permute.xlu2 %1580 }
 0x2dd   : > { %v1579_v50 = vpop.permute.xlu0 %1578  ;;  %v2053_v18 = vpop.permute.xlu2 %2052 }
 0x2e5   : > { %v1826_v16 = vpop.permute.xlu0 %1825  ;;  %v2055_v23 = vpop.permute.xlu2 %2054 }
 0x2e6   : > { %v1597_v17 = vpop.permute.xlu1 %1596 }
 0x2e7   : > { %3437 = vmatpush.xpose.msk.msrb.mxu1 %vm1391_vm7, %v1597_v17 }
 0x2eb   : > { %3438 = vmatpush.xpose.msk.msrb.mxu1 %vm1391_vm7, %v1595_v12 }
 0x2ed   : > { %v1828_v19 = vpop.permute.xlu0 %1827  ;;  %v1820_v27 = vpop.permute.xlu2 %1819 }
 0x2ee   : > { %v1589_v20 = vpop.permute.xlu1 %1588  ;;  %3453 = vmatpush.xpose.msk.msrb.mxu3 %vm1391_vm7, %v1828_v19 }
 0x2ef   : > { %3439 = vmatpush.xpose.msk.msrb.mxu1 %vm1391_vm7, %v1593_v13 }
 0x2f2   : > { %3454 = vmatpush.xpose.msk.msrb.mxu3 %vm1391_vm7, %v1826_v16 }
 0x2f3   : > { %3440 = vmatpush.xpose.msk.msrb.mxu1 %vm1391_vm7, %v1591_v14 }
 0x2f5   : > { %v2051_v21 = vpop.permute.xlu0 %2050  ;;  %v1587_v34 = vpop.permute.xlu2 %1586 }
 0x2f6   : > { %v1583_v22 = vpop.permute.xlu1 %1582 }
 0x2f7   : > { %3441 = vmatpush.xpose.msk.msrb.mxu1 %vm1391_vm7, %v1589_v20 }
 0x2fa   : > { %3442 = vmatmul.msk.f32.vlgmr.msrb.gmra.mxu1 %vm1391_vm7, %v1579_v50 }
 0x2fb   : > { %3469 = vmatpush.xpose.msk.msra.mxu1 %vm1391_vm7, %v2055_v23 }
 0x2fd   : > { %v2049_v24 = vpop.permute.xlu0 %2048  ;;  %v2037_v42 = vpop.permute.xlu2 %2036 }
 0x2fe   : > { %v1585_v25 = vpop.permute.xlu1 %1584 }
 0x2ff   : > { %3470 = vmatpush.xpose.msk.msra.mxu1 %vm1391_vm7, %v2053_v18 }
 0x302   : > { %3443 = vmatmul.msk.f32.gmra.mxu1 %vm1391_vm7, %v1581_v15 }
 0x303   : > { %3471 = vmatpush.xpose.msk.msra.mxu1 %vm1391_vm7, %v2051_v21 }
 0x305   : > { %v1810_v26 = vpop.permute.xlu0 %1809  ;;  %v1814_v56 = vpop.permute.xlu2 %1813 }
 0x306   : > { %v1824_v62 = vpop.permute.xlu1 %1823 }
 0x307   : > { %3472 = vmatpush.xpose.msk.msra.mxu1 %vm1391_vm7, %v2049_v24  ;;  %3455 = vmatpush.xpose.msk.msrb.mxu3 %vm1391_vm7, %v1824_v62 }
 0x30a   : > { %3444 = vmatmul.msk.f32.gmra.mxu1 %vm1391_vm7, %v1583_v22 }
 0x30b   : > { %v1439_v28 = vpop.f32.mrf.mxu3 }
 0x30c   : > { %v1454_v30 = vmul.f32 0.25, %v1439_v28 }
 0x30d   : > { %v2039_v31 = vpop.permute.xlu0 %2038  ;;  %v2043_v10 = vpop.permute.xlu2 %2042 }
 0x30e   : > { %v1822_v49 = vpop.permute.xlu1 %1821  ;;  %v4251_v32 = vadd.f32 %v1454_v30, %v4248_v29 }
 0x30f   : > { %3456 = vmatpush.xpose.msk.msrb.mxu3 %vm1391_vm7, %v1822_v49 }
 0x310   : > { %v1465_v33 = vsel %vm1464_vm9, %v4251_v32, -inf }
 0x311   : > { %1466 = vmax.xlane.f32.xlu1 %v1465_v33 }
 0x312   : > { %3445 = vmatmul.msk.f32.gmra.mxu1 %vm1391_vm7, %v1585_v25 }
 0x313   : > { %v1442_v61 = vpop.f32.mrf.mxu3  ;;  %3457 = vmatpush.xpose.msk.msrb.mxu3 %vm1391_vm7, %v1820_v27 }
 0x314   : > { %v1455_v36 = vmul.f32 0.25, %v1442_v61 }
 0x315   : > { %v1816_v37 = vpop.permute.xlu0 %1815 }
 0x316   : > { %v2047_v38 = vpop.permute.xlu1 %2046  ;;  %3458 = vmatmul.msk.f32.vlgmr.msrb.gmra.mxu3 %vm1391_vm7, %v1810_v26  ;;  %v4265_v63 = vadd.f32 %v1455_v36, %v4261_v35 }
 0x317   : > { %3473 = vmatpush.xpose.msk.msra.mxu1 %vm1391_vm7, %v2047_v38 }
 0x318   : > { %v1468_v39 = vsel %vm1464_vm9, %v4265_v63, -inf }
 0x319   : > { %1469 = vmax.xlane.f32.xlu2 %v1468_v39 }
 0x31a   : > { %3446 = vmatmul.msk.f32.gmra.mxu1 %vm1391_vm7, %v1587_v34 }
 0x31b   : > { %v1445_v40 = vpop.f32.mrf.mxu3 }
 0x31c   : > { %v1456_v43 = vmul.f32 0.25, %v1445_v40 }
 0x31d   : > { %v2045_v45 = vpop.permute.xlu0 %2044 }
 0x31e   : > { %v1812_v47 = vpop.permute.xlu1 %1811  ;;  %v4277_v48 = vadd.f32 %v1456_v43, %v4274_v41 }
 0x31f   : > { %3459 = vmatmul.msk.f32.gmra.mxu3 %vm1391_vm7, %v1812_v47 }
 0x320   : > { %v1471_v51 = vsel %vm1464_vm9, %v4277_v48, -inf }
 0x321   : > { %1472 = vmax.xlane.f32.xlu0 %v1471_v51 }
 0x322   : > { %3474 = vmatmul.msk.f32.vlgmr.msra.gmra.mxu1 %vm1391_vm7, %v2037_v42 }
 0x323   : > { %v1448_v52 = vpop.f32.mrf.mxu3 }
 0x324   : > { %v1457_v54 = vmul.f32 0.25, %v1448_v52 }
 0x325   : > { %v3570_v55 = vpop.permute.xlu0 %3569 }
 0x326   : > { %v2041_v57 = vpop.permute.xlu1 %2040  ;;  %v4289_v58 = vadd.f32 %v1457_v54, %v4286_v53  ;;  %v3571_v12 = vunpack.i.l.bf16 %v3570_v55  ;;  %v3572_v13 = vunpack.i.h.bf16 %v3570_v55 }
 0x327   : > { %3460 = vmatmul.msk.f32.gmra.mxu3 %vm1391_vm7, %v1814_v56 }
 0x328   : > { %v1474_v59 = vsel %vm1464_vm9, %v4289_v58, -inf }
 0x329   : > { %1475 = vmax.xlane.f32.xlu1 %v1474_v59 }
 0x32a   : > { %3475 = vmatmul.msk.f32.gmra.mxu1 %vm1391_vm7, %v2039_v31 }
 0x32b   : > { %v1451_v60 = vpop.f32.mrf.mxu3 }
 0x32c   : > { %v1458_v2 = vmul.f32 0.25, %v1451_v60 }
 0x32d   : > { %v1728_v4 = vpop.permute.xlu0 %1727 }
 0x32e   : > { %v1818_v5 = vpop.permute.xlu1 %1817  ;;  %3447 = vmatpush.msk.msrb.mxu2 %vm1536_vm8, %v1728_v4  ;;  %v4302_v6 = vadd.f32 %v1458_v2, %v4298_v1 }
 0x32f   : > { %3461 = vmatmul.msk.f32.gmra.mxu3 %vm1391_vm7, %v1816_v37 }
 0x330   : > { %v1478_v7 = vsel %vm1477_vm10, %v4302_v6, -inf }
 0x331   : > { %1479 = vmax.xlane.f32.xlu2 %v1478_v7 }
 0x332   : > { %3476 = vmatmul.msk.f32.gmra.mxu1 %vm1391_vm7, %v2041_v57 }
 0x335   : > { %v2182_v50 = vpop.permute.xlu0 %2181 }
 0x336   : > { %v3565_v8 = vpop.permute.xlu1 %3564 }
 0x337   : > { %3462 = vmatmul.msk.f32.gmra.mxu3 %vm1391_vm7, %v1818_v5  ;;  %v3566_v9 = vunpack.i.l.bf16 %v3565_v8  ;;  %v3567_v11 = vunpack.i.h.bf16 %v3565_v8 }
 0x339   : > { %1762 = vmatpush.msrb.mxu2 %v3566_v9 }
 0x33a   : > { %3477 = vmatmul.msk.f32.gmra.mxu1 %vm1391_vm7, %v2043_v10 }
 0x33b   : > { %1763 = vmatpush.msrb.mxu2 %v3567_v11 }
 0x33d   : > { %1764 = vmatpush.msrb.mxu2 %v3571_v12 }
 0x33e   : > { %v3575_v14 = vpop.permute.xlu1 %3574 }
 0x33f   : > { %v3576_v15 = vunpack.i.l.bf16 %v3575_v14  ;;  %1765 = vmatpush.msrb.mxu2 %v3572_v13  ;;  %v3577_v16 = vunpack.i.h.bf16 %v3575_v14 }
 0x341   : > { %3479 = vmatpush.msk.msra.mxu2 %vm1536_vm8, %v2182_v50 }
 0x342   : > { %3478 = vmatmul.msk.f32.gmra.mxu1 %vm1391_vm7, %v2045_v45 }
 0x343   : > { %2216 = vmatpush.msra.mxu2 %v3576_v15 }
 0x345   : > { %2217 = vmatpush.msra.mxu2 %v3577_v16 }
 0x377   : > { %v1635_v17 = vpop.f32.mrf.mxu1 }
 0x378   : > { %v1650_v18 = vmul.f32 0.25, %v1635_v17 }
 0x37a   : > { %v4313_v19 = vadd.f32 %v1650_v18, %v4248_v29 }
 0x37c   : > { %v1660_v20 = vsel %vm1464_vm9, %v4313_v19, -inf }
 0x37d   : > { %1661 = vmax.xlane.f32.xlu2 %v1660_v20 }
 0x37f   : > { %v1638_v21 = vpop.f32.mrf.mxu1 }
 0x380   : > { %v1651_v31 = vmul.f32 0.25, %v1638_v21 }
 0x382   : > { %v4329_v36 = vadd.f32 %v1651_v31, %v4261_v35 }
 0x384   : > { %v1467_v28 = vpop.xlane.xlu1 %1466  ;;  %v1663_v40 = vsel %vm1464_vm9, %v4329_v36, -inf }
 0x385   : > { %v1481_v49 = vsub.f32 %v4251_v32, %v1467_v28 }
 0x387   : > { %v1641_v22 = vpop.f32.mrf.mxu1  ;;  %v1486_v34 = vmul.f32 1.442695, %v1481_v49 }
 0x388   : > { %v1652_v23 = vmul.f32 0.25, %v1641_v22 }
 0x389   : > { %3614 = vpow2.f32 %v1486_v34 }
 0x38a   : > { %v4318_v24 = vadd.f32 %v1652_v23, %v4274_v41 }
 0x38c   : > { %v1666_v25 = vsel %vm1464_vm9, %v4318_v24, -inf  ;;  %v1470_v43 = vpop.xlane.xlu2 %1469 }
 0x38d   : > { %1667 = vmax.xlane.f32.xlu1 %v1666_v25  ;;  %v1482_v52 = vsub.f32 %v4265_v63, %v1470_v43 }
 0x38f   : > { %v1644_v62 = vpop.f32.mrf.mxu1  ;;  %v4338_v47 = vpop.eup %3614  ;;  %v1488_v60 = vmul.f32 1.442695, %v1482_v52 }
 0x390   : > { %v1653_v55 = vmul.f32 0.25, %v1644_v62  ;;  %v1496_v57 = vsel %vm1464_vm9, %v4338_v47, 0.0 }
 0x391   : > { %3616 = vpow2.f32 %v1488_v60 }
 0x392   : > { %v4349_v4 = vadd.f32 %v1653_v55, %v4286_v53 }
 0x394   : > { %v1669_v63 = vsel %vm1464_vm9, %v4349_v4, -inf  ;;  %v1473_v9 = vpop.xlane.xlu0 %1472 }
 0x395   : > { %v1483_v14 = vsub.f32 %v4277_v48, %v1473_v9 }
 0x397   : > { %v1647_v38 = vpop.f32.mrf.mxu1  ;;  %v4358_v13 = vpop.eup %3616  ;;  %v1490_v21 = vmul.f32 1.442695, %v1483_v14 }
 0x398   : > { %v1654_v56 = vmul.f32 0.25, %v1647_v38  ;;  %v1499_v18 = vsel %vm1464_vm9, %v4358_v13, 0.0 }
 0x399   : > { %v1866_v26 = vpop.f32.mrf.mxu3  ;;  %3618 = vpow2.f32 %v1490_v21 }
 0x39a   : > { %v1881_v27 = vmul.f32 0.25, %v1866_v26  ;;  %v4352_v5 = vadd.f32 %v1654_v56, %v4298_v1 }
 0x39c   : > { %v4323_v30 = vadd.f32 %v1881_v27, %v4248_v29  ;;  %v1672_v7 = vsel %vm1477_vm10, %v4352_v5, -inf  ;;  %v1476_v25 = vpop.xlane.xlu1 %1475 }
 0x39e   : > { %v1891_v33 = vsel %vm1464_vm9, %v4323_v30, -inf }
 0x39f   : > { %1892 = vmax.xlane.f32.xlu0 %v1891_v33  ;;  %v2093_v54 = vpop.f32.mrf.mxu1  ;;  %v4380_v31 = vpop.eup %3618 }
 0x3a0   : > { %v2108_v16 = vmul.f32 0.25, %v2093_v54  ;;  %v1502_v34 = vsel %vm1464_vm9, %v4380_v31, 0.0 }
 0x3a2   : > { %v1869_v61 = vpop.f32.mrf.mxu3  ;;  %v4373_v26 = vadd.f32 %v2108_v16, %v4248_v29 }
 0x3a3   : > { %v1882_v37 = vmul.f32 0.25, %v1869_v61 }
 0x3a4   : > { %v1480_v11 = vpop.xlane.xlu2 %1479  ;;  %v2118_v27 = vsel %vm1464_vm9, %v4373_v26, -inf }
 0x3a5   : > { %v4332_v39 = vadd.f32 %v1882_v37, %v4261_v35  ;;  %v1485_v15 = vsub.f32 %v4302_v6, %v1480_v11  ;;  %v1484_v6 = vsub.f32 %v4289_v58, %v1476_v25 }
 0x3a7   : > { %1664 = vmax.xlane.f32.xlu0 %v1663_v40  ;;  %v1894_v32 = vsel %vm1464_vm9, %v4332_v39, -inf  ;;  %v2096_v8 = vpop.f32.mrf.mxu1  ;;  %v1494_v22 = vmul.f32 1.442695, %v1485_v15  ;;  %v1492_v28 = vmul.f32 1.442695, %v1484_v6 }
 0x3a8   : > { %1895 = vmax.xlane.f32.xlu2 %v1894_v32  ;;  %v2109_v38 = vmul.f32 0.25, %v2096_v8 }
 0x3a9   : > { %3620 = vpow2.f32 %v1494_v22 }
 0x3aa   : > { %v1872_v42 = vpop.f32.mrf.mxu3  ;;  %3622 = vpow2.f32 %v1492_v28 }
 0x3ab   : > { %v1883_v45 = vmul.f32 0.25, %v1872_v42  ;;  %v4398_v42 = vadd.f32 %v2109_v38, %v4261_v35 }
 0x3ad   : > { %v4341_v51 = vadd.f32 %v1883_v45, %v4274_v41  ;;  %v2121_v45 = vsel %vm1464_vm9, %v4398_v42, -inf }
 0x3af   : > { %v1897_v59 = vsel %vm1464_vm9, %v4341_v51, -inf  ;;  %v2099_v23 = vpop.f32.mrf.mxu1  ;;  %v4382_v49 = vpop.eup %3620 }
 0x3b0   : > { %1497 = vadd.xlane.f32.xlu2 %v1496_v57  ;;  %1898 = vmax.xlane.f32.xlu0 %v1897_v59  ;;  %v1508_v58 = vsel %vm1477_vm10, %v4382_v49, 0.0  ;;  %v4391_v37 = vpop.eup %3622  ;;  %v2110_v43 = vmul.f32 0.25, %v2099_v23 }
 0x3b1   : > { %v1505_v32 = vsel %vm1464_vm9, %v4391_v37, 0.0 }
 0x3b2   : > { %v1875_v2 = vpop.f32.mrf.mxu3 }
 0x3b3   : > { %v1884_v17 = vmul.f32 0.25, %v1875_v2 }
 0x3b5   : > { %v4370_v48 = vadd.f32 %v1884_v17, %v4286_v53 }
 0x3b7   : > { %v1900_v62 = vsel %vm1464_vm9, %v4370_v48, -inf  ;;  %v2102_v33 = vpop.f32.mrf.mxu1 }
 0x3b8   : > { %1670 = vmax.xlane.f32.xlu2 %v1669_v63  ;;  %1673 = vmax.xlane.f32.xlu0 %v1672_v7  ;;  %v2111_v29 = vmul.f32 0.25, %v2102_v33 }
 0x3ba   : > { %v1878_v10 = vpop.f32.mrf.mxu3  ;;  %v4389_v61 = vadd.f32 %v2111_v29, %v4286_v53  ;;  %v4403_v53 = vadd.f32 %v2110_v43, %v4274_v41 }
 0x3bb   : > { %v1885_v12 = vmul.f32 0.25, %v1878_v10 }
 0x3bc   : > { %v2127_v40 = vsel %vm1464_vm9, %v4389_v61, -inf  ;;  %v2124_v55 = vsel %vm1464_vm9, %v4403_v53, -inf }
 0x3bd   : > { %v4362_v50 = vadd.f32 %v1885_v12, %v4298_v1 }
 0x3bf   : > { %v1903_v20 = vsel %vm1477_vm10, %v4362_v50, -inf  ;;  %v2105_v52 = vpop.f32.mrf.mxu1 }
 0x3c0   : > { %1500 = vadd.xlane.f32.xlu2 %v1499_v18  ;;  %1904 = vmax.xlane.f32.xlu1 %v1903_v20  ;;  %v2112_v54 = vmul.f32 0.25, %v2105_v52 }
 0x3c2   : > { %v4408_v56 = vadd.f32 %v2112_v54, %v4298_v1 }
 0x3c4   : > { %v2130_v35 = vsel %vm1477_vm10, %v4408_v56, -inf }
 0x3c8   : > { %1901 = vmax.xlane.f32.xlu2 %v1900_v62  ;;  %2119 = vmax.xlane.f32.xlu1 %v2118_v27 }
 0x3d0   : > { %1509 = vadd.xlane.f32.xlu1 %v1508_v58  ;;  %1503 = vadd.xlane.f32.xlu2 %v1502_v34 }
 0x3d8   : > { %2128 = vmax.xlane.f32.xlu1 %v2127_v40  ;;  %1506 = vadd.xlane.f32.xlu2 %v1505_v32 }
 0x3e0   : > { %2122 = vmax.xlane.f32.xlu2 %v2121_v45 }
 0x3e8   : > { %2125 = vmax.xlane.f32.xlu2 %v2124_v55 }
 0x3f0   : > { %v1662_v57 = vpop.xlane.xlu2 %1661  ;;  %2131 = vmax.xlane.f32.xlu2 %v2130_v35 }
 0x3f1   : > { %v1675_v59 = vsub.f32 %v4313_v19, %v1662_v57 }
 0x3f3   : > { %v1680_v60 = vmul.f32 1.442695, %v1675_v59 }
 0x3f5   : > { %3624 = vpow2.f32 %v1680_v60 }
 0x3fb   : > { %v4413_v41 = vpop.eup %3624 }
 0x3fc   : > { %v1690_v2 = vsel %vm1464_vm9, %v4413_v41, 0.0 }
 0x3fd   : > { %1691 = vadd.xlane.f32.xlu1 %v1690_v2 }
 0x400   : > { %v1668_v8 = vpop.xlane.xlu1 %1667 }
 0x401   : > { %v1677_v12 = vsub.f32 %v4318_v24, %v1668_v8 }
 0x412   : > { %v1893_v63 = vpop.xlane.xlu0 %1892 }
 0x413   : > { %v1906_v7 = vsub.f32 %v4323_v30, %v1893_v63 }
 0x415   : > { %v1911_v1 = vmul.f32 1.442695, %v1906_v7 }
 0x416   : > { %3584 = vrot.lane.b32.xlu1 %v4177_v0, %s3776_s2  ;;  %v1684_v0 = vmul.f32 1.442695, %v1677_v12 }
 0x417   : > { %3626 = vpow2.f32 %v1911_v1 }
 0x41a   : > { %v1665_v9 = vpop.xlane.xlu0 %1664 }
 0x41b   : > { %v1676_v19 = vsub.f32 %v4329_v36, %v1665_v9  ;;  %v4421_v10 = vpop.xlane.xlu2 %1895 }
 0x41d   : > { %v4423_v11 = vpop.eup %3626  ;;  %v1682_v14 = vmul.f32 1.442695, %v1676_v19 }
 0x41e   : > { %3589 = vrot.lane.b32.xlu1 %v4167_v46, %s3776_s2  ;;  %v1921_v30 = vsel %vm1464_vm9, %v4423_v11, 0.0 }
 0x41f   : > { %3628 = vpow2.f32 %v1682_v14  ;;  %1922 = vadd.xlane.f32.xlu2 %v1921_v30 }
 0x423   : > { %v1498_v15 = vpop.xlane.xlu2 %1497  ;;  %v4430_v16 = vpop.xlane.xlu0 %1898 }
 0x424   : > { %3630 = vrcp.f32 %v1498_v15  ;;  %v1907_v15 = vsub.f32 %v4332_v39, %v4421_v10 }
 0x425   : > { %v4432_v36 = vpop.eup %3628  ;;  %3632 = vpow2.f32 %v1684_v0 }
 0x426   : > { %v1693_v24 = vsel %vm1464_vm9, %v4432_v36, 0.0 }
 0x427   : > { %1694 = vadd.xlane.f32.xlu2 %v1693_v24 }
 0x42a   : > { %v3631_v17 = vpop.eup %3630 }
 0x42b   : > { %v4436_v18 = vpop.eup %3632  ;;  %v1671_v20 = vpop.xlane.xlu2 %1670  ;;  %v1516_v22 = vmul.f32 %v3631_v17, %v4338_v47 }
 0x42c   : > { %v1674_v21 = vpop.xlane.xlu0 %1673  ;;  %v1678_v23 = vsub.f32 %v4349_v4, %v1671_v20  ;;  %v1696_v62 = vsel %vm1464_vm9, %v4436_v18, 0.0  ;;  %v1913_v20 = vmul.f32 1.442695, %v1907_v15 }
 0x42d   : > { %3432 = vmatmul.msk.f32.vlgmr.msrb.gmra.mxu0 %vm1464_vm9, %v1516_v22  ;;  %v1679_v6 = vsub.f32 %v4352_v5, %v1674_v21 }
 0x42e   : > { %v1686_v25 = vmul.f32 1.442695, %v1678_v23 }
 0x42f   : > { %1697 = vadd.xlane.f32.xlu2 %v1696_v62  ;;  %v1688_v27 = vmul.f32 1.442695, %v1679_v6 }
 0x430   : > { %3634 = vpow2.f32 %v1686_v25 }
 0x433   : > { %v1501_v28 = vpop.xlane.xlu2 %1500  ;;  %v4444_v33 = vpop.xlane.xlu1 %1904 }
 0x434   : > { %3636 = vrcp.f32 %v1501_v28 }
 0x435   : > { %3638 = vpow2.f32 %v1688_v27 }
 0x436   : > { %v4446_v29 = vpop.eup %3634 }
 0x437   : > { %v1699_v47 = vsel %vm1464_vm9, %v4446_v29, 0.0 }
 0x438   : > { %1700 = vadd.xlane.f32.xlu0 %v1699_v47 }
 0x43a   : > { %v3637_v4 = vpop.eup %3636 }
 0x43b   : > { %v4450_v58 = vpop.xlane.xlu2 %1901  ;;  %v2120_v5 = vpop.xlane.xlu1 %2119  ;;  %v1517_v34 = vmul.f32 %v3637_v4, %v4358_v13 }
 0x43c   : > { %v4453_v38 = vpop.eup %3638  ;;  %v2133_v40 = vsub.f32 %v4373_v26, %v2120_v5 }
 0x43d   : > { %3433 = vmatmul.msk.f32.gmra.mxu0 %vm1464_vm9, %v1517_v34  ;;  %v1702_v43 = vsel %vm1477_vm10, %v4453_v38, 0.0 }
 0x43e   : > { %v2138_v32 = vmul.f32 1.442695, %v2133_v40 }
 0x440   : > { %1703 = vadd.xlane.f32.xlu0 %v1702_v43  ;;  %3640 = vpow2.f32 %v2138_v32 }
 0x443   : > { %v1504_v45 = vpop.xlane.xlu2 %1503  ;;  %v1510_v35 = vpop.xlane.xlu1 %1509 }
 0x444   : > { %3642 = vrcp.f32 %v1504_v45 }
 0x446   : > { %v4459_v52 = vpop.eup %3640 }
 0x447   : > { %v2148_v54 = vsel %vm1464_vm9, %v4459_v52, 0.0 }
 0x448   : > { %2149 = vadd.xlane.f32.xlu2 %v2148_v54 }
 0x44a   : > { %v3643_v13 = vpop.eup %3642 }
 0x44b   : > { %v1507_v55 = vpop.xlane.xlu2 %1506  ;;  %v1518_v26 = vmul.f32 %v3643_v13, %v4380_v31  ;;  %v2129_v12 = vpop.xlane.xlu1 %2128 }
 0x44c   : > { %3644 = vrcp.f32 %v1507_v55  ;;  %v2136_v21 = vsub.f32 %v4389_v61, %v2129_v12 }
 0x44d   : > { %3434 = vmatmul.msk.f32.gmra.mxu0 %vm1464_vm9, %v1518_v26  ;;  %3646 = vrcp.f32 %v1510_v35 }
 0x44e   : > { %v2144_v39 = vmul.f32 1.442695, %v2136_v21 }
 0x452   : > { %v3645_v57 = vpop.eup %3644 }
 0x453   : > { %v2123_v59 = vpop.xlane.xlu2 %2122  ;;  %v1519_v60 = vmul.f32 %v3645_v57, %v4391_v37  ;;  %v3647_v2 = vpop.eup %3646 }
 0x454   : > { %3579 = vrot.lane.b32.xlu0 %v4167_v46, %s3777_s30  ;;  %v1520_v1 = vmul.f32 %v3647_v2, %v4382_v49  ;;  %v2134_v49 = vsub.f32 %v4398_v42, %v2123_v59  ;;  %s3779_s30 = smov 32  }
 0x455   : > { %3435 = vmatmul.msk.f32.gmra.mxu0 %vm1464_vm9, %v1519_v60 }
 0x45b   : > { %v2126_v63 = vpop.xlane.xlu2 %2125 }
 0x45c   : > { %v2135_v7 = vsub.f32 %v4403_v53, %v2126_v63 }
 0x45d   : > { %3436 = vmatmul.msk.f32.gmra.mxu0 %vm1464_vm9, %v1520_v1 }
 0x45e   : > { %v2142_v31 = vmul.f32 1.442695, %v2135_v7 }
 0x460   : > { %3648 = vpow2.f32 %v2142_v31  ;;  %1954 = vrot.lane.b32.xlu2 %v4183_v3, %s3776_s2  ;;  %v2140_v3 = vmul.f32 1.442695, %v2134_v49  ;;  %s3778_s2 = smov 16  }
 0x463   : > { %v2132_v8 = vpop.xlane.xlu2 %2131 }
 0x464   : > { %v2137_v37 = vsub.f32 %v4408_v56, %v2132_v8  ;;  %v1908_v56 = vsub.f32 %v4341_v51, %v4430_v16  ;;  %v1909_v51 = vsub.f32 %v4370_v48, %v4450_v58 }
 0x466   : > { %v4475_v9 = vpop.eup %3648  ;;  %v2146_v46 = vmul.f32 1.442695, %v2137_v37  ;;  %v1915_v24 = vmul.f32 1.442695, %v1908_v56  ;;  %v1917_v16 = vmul.f32 1.442695, %v1909_v51 }
 0x467   : > { %v2154_v19 = vsel %vm1464_vm9, %v4475_v9, 0.0 }
 0x468   : > { %3650 = vpow2.f32 %v2146_v46  ;;  %2155 = vadd.xlane.f32.xlu1 %v2154_v19 }
 0x46e   : > { %v4480_v53 = vpop.eup %3650 }
 0x46f   : > { %v2160_v14 = vsel %vm1477_vm10, %v4480_v53, 0.0 }
 0x470   : > { %v1692_v30 = vpop.xlane.xlu1 %1691  ;;  %2161 = vadd.xlane.f32.xlu1 %v2160_v14 }
 0x471   : > { %3652 = vrcp.f32 %v1692_v30 }
 0x472   : > { %3654 = vpow2.f32 %v2140_v3 }
 0x473   : > { %3656 = vpow2.f32 %v1915_v24 }
 0x474   : > { %3658 = vpow2.f32 %v1913_v20 }
 0x475   : > { %3660 = vpow2.f32 %v2144_v39 }
 0x476   : > { %3662 = vpow2.f32 %v1917_v16 }
 0x477   : > { %v3653_v0 = vpop.eup %3652 }
 0x478   : > { %v1710_v42 = vmul.f32 %v3653_v0, %v4413_v41  ;;  %v4489_v17 = vpop.eup %3654  ;;  %v1910_v41 = vsub.f32 %v4362_v50, %v4444_v33 }
 0x479   : > { %v2151_v22 = vsel %vm1464_vm9, %v4489_v17, 0.0  ;;  %v4497_v10 = vpop.eup %3656 }
 0x47a   : > { %3448 = vmatmul.msk.f32.vlgmr.msrb.gmra.mxu2 %vm1464_vm9, %v1710_v42  ;;  %v1927_v23 = vsel %vm1464_vm9, %v4497_v10, 0.0  ;;  %v4503_v61 = vpop.eup %3658  ;;  %v1919_v25 = vmul.f32 1.442695, %v1910_v41 }
 0x47b   : > { %v1924_v6 = vsel %vm1464_vm9, %v4503_v61, 0.0  ;;  %v4507_v48 = vpop.eup %3660 }
 0x47c   : > { %3664 = vpow2.f32 %v1919_v25  ;;  %v2157_v50 = vsel %vm1464_vm9, %v4507_v48, 0.0  ;;  %v4511_v62 = vpop.eup %3662 }
 0x47d   : > { %v1930_v27 = vsel %vm1464_vm9, %v4511_v62, 0.0 }
 0x47e   : > { %2152 = vadd.xlane.f32.xlu0 %v2151_v22 }
 0x482   : > { %v4515_v28 = vpop.eup %3664 }
 0x483   : > { %v1933_v47 = vsel %vm1477_vm10, %v4515_v28, 0.0 }
 0x486   : > { %1928 = vadd.xlane.f32.xlu0 %v1927_v23 }
 0x489   : > { %1925 = vadd.xlane.f32.xlu2 %v1924_v6 }
 0x48e   : > { %2158 = vadd.xlane.f32.xlu0 %v2157_v50 }
 0x491   : > { %1931 = vadd.xlane.f32.xlu2 %v1930_v27 }
 0x492   : > { %v1923_v33 = vpop.xlane.xlu2 %1922 }
 0x496   : > { %1934 = vadd.xlane.f32.xlu0 %v1933_v47 }
 0x49a   : > { %v1695_v4 = vpop.xlane.xlu2 %1694 }
 0x49b   : > { %3666 = vrcp.f32 %v1695_v4 }
 0x4a1   : > { %v3667_v58 = vpop.eup %3666 }
 0x4a2   : > { %v1698_v5 = vpop.xlane.xlu2 %1697  ;;  %v1711_v34 = vmul.f32 %v3667_v58, %v4432_v36  ;;  %v2275_v58 = vld [vmem:[%s3970_s28 + $0x38] sm:$0xff] }
 0x4a3   : > { %3668 = vrcp.f32 %v1698_v5  ;;  %2303 = vmatpush.msra.mxu3 %v2275_v58 }
 0x4a4   : > { %3449 = vmatmul.msk.f32.gmra.mxu2 %vm1464_vm9, %v1711_v34 }
 0x4a9   : > { %v3669_v40 = vpop.eup %3668 }
 0x4aa   : > { %v1557_v32 = vpop.f32.mrf.mxu0  ;;  %v1712_v43 = vmul.f32 %v3669_v40, %v4436_v18  ;;  %v3585_v18 = vpop.permute.xlu1 %3584 }
 0x4ab   : > { %1572 = vst.msk [vmem:[#allocation3] sm:$0xff] %vm1391_vm7, %v1557_v32  ;;  %v1701_v45 = vpop.xlane.xlu0 %1700  ;;  %v3586_v60 = vunpack.i.l.bf16 %v3585_v18  ;;  %v3587_v7 = vunpack.i.h.bf16 %v3585_v18  ;;  %v2274_v18 = vld [vmem:[%s3970_s28 + $0x30] sm:$0xff] }
 0x4ac   : > { %3670 = vrcp.f32 %v1701_v45  ;;  %3450 = vmatmul.msk.f32.gmra.mxu2 %vm1464_vm9, %v1712_v43  ;;  %2304 = vmatpush.msra.mxu3 %v2274_v18 }
 0x4b2   : > { %v3671_v54 = vpop.eup %3670 }
 0x4b3   : > { %v1704_v13 = vpop.xlane.xlu0 %1703  ;;  %v1713_v55 = vmul.f32 %v3671_v54, %v4446_v29  ;;  %v3590_v29 = vpop.permute.xlu1 %3589 }
 0x4b4   : > { %3672 = vrcp.f32 %v1704_v13  ;;  %v3591_v8 = vunpack.i.l.bf16 %v3590_v29  ;;  %v3592_v46 = vunpack.i.h.bf16 %v3590_v29  ;;  %v2270_v29 = vld [vmem:[%s3970_s28 + $0x10] sm:$0xff] }
 0x4b5   : > { %3451 = vmatmul.msk.f32.gmra.mxu2 %vm1464_vm9, %v1713_v55 }
 0x4ba   : > { %v3673_v36 = vpop.eup %3672  ;;  %v1560_v26 = vpop.f32.mrf.mxu0 }
 0x4bb   : > { %1573 = vst.msk [vmem:[#allocation3 + $0x8] sm:$0xff] %vm1391_vm7, %v1560_v26  ;;  %v1714_v35 = vmul.f32 %v3673_v36, %v4453_v38  ;;  %v2150_v57 = vpop.xlane.xlu2 %2149 }
 0x4bc   : > { %3674 = vrcp.f32 %v2150_v57  ;;  %v2273_v57 = vld [vmem:[%s3970_s28 + $0x28] sm:$0xff] }
 0x4bd   : > { %3452 = vmatmul.msk.f32.gmra.mxu2 %vm1464_vm9, %v1714_v35  ;;  %3676 = vrcp.f32 %v1923_v33  ;;  %2305 = vmatpush.msra.mxu3 %v2273_v57 }
 0x4c2   : > { %v3675_v63 = vpop.eup %3674 }
 0x4c3   : > { %v1955_v59 = vpop.permute.xlu2 %1954  ;;  %v3677_v31 = vpop.eup %3676  ;;  %v2168_v38 = vmul.f32 %v3675_v63, %v4459_v52  ;;  %v2268_v63 = vld [vmem:[%s3970_s28] sm:$0xff] }
 0x4c4   : > { %3463 = vmatpush.msk.msra.mxu0 %vm1536_vm8, %v1955_v59  ;;  %v1941_v12 = vmul.f32 %v3677_v31, %v4423_v11  ;;  %v2272_v59 = vld [vmem:[%s3970_s28 + $0x20] sm:$0xff] }
 0x4c5   : > { %2306 = vmatpush.msra.mxu3 %v2272_v59 }
 0x4c6   : > { %v3580_v2 = vpop.permute.xlu0 %3579  ;;  %1989 = vmatpush.msra.mxu0 %v3586_v60  ;;  %v2271_v60 = vld [vmem:[%s3970_s28 + $0x18] sm:$0xff] }
 0x4c7   : > { %v3581_v1 = vunpack.i.l.bf16 %v3580_v2  ;;  %v3582_v37 = vunpack.i.h.bf16 %v3580_v2  ;;  %2307 = vmatpush.msra.mxu3 %v2271_v60  ;;  %v2269_v2 = vld [vmem:[%s3970_s28 + $0x8] sm:$0xff] }
 0x4c8   : > { %1990 = vmatpush.msra.mxu0 %v3587_v7 }
 0x4c9   : > { %2218 = vmatpush.msra.mxu2 %v3581_v1  ;;  %2308 = vmatpush.msra.mxu3 %v2270_v29 }
 0x4ca   : > { %v1563_v19 = vpop.f32.mrf.mxu0  ;;  %1991 = vmatpush.msra.mxu0 %v3591_v8 }
 0x4cb   : > { %2219 = vmatpush.msra.mxu2 %v3582_v37  ;;  %1574 = vst.msk [vmem:[#allocation3 + $0x10] sm:$0xff] %vm1391_vm7, %v1563_v19  ;;  %2309 = vmatpush.msra.mxu3 %v2269_v2 }
 0x4cc   : > { %3480 = vmatmul.msk.f32.vlgmr.msra.gmra.mxu2 %vm1464_vm9, %v2168_v38  ;;  %1992 = vmatpush.msra.mxu0 %v3592_v46 }
 0x4cd   : > { %3464 = vmatmul.msk.f32.vlgmr.msra.gmra.mxu0 %vm1464_vm9, %v1941_v12  ;;  %2310 = vmatpush.msra.mxu3 %v2268_v63 }
 0x4d2   : > { %v1566_v49 = vpop.f32.mrf.mxu0 }
 0x4d3   : > { %1575 = vst.msk [vmem:[#allocation3 + $0x18] sm:$0xff] %vm1391_vm7, %v1566_v49 }
 0x4da   : > { %v1569_v14 = vpop.f32.mrf.mxu0 }
 0x4db   : > { %1577 = vst.msk [vmem:[#allocation3 + $0x20] sm:$0x3] %vm1576_vm11, %v1569_v14  ;;  %v2156_v3 = vpop.xlane.xlu1 %2155 }
 0x4e3   : > { %v2162_v22 = vpop.xlane.xlu1 %2161 }
 0x4f1   : > { %v2153_v52 = vpop.xlane.xlu0 %2152 }
 0x4f2   : > { %3678 = vrcp.f32 %v2153_v52 }
 0x4f3   : > { %3680 = vrcp.f32 %v2156_v3 }
 0x4f8   : > { %v3679_v30 = vpop.eup %3678 }
 0x4f9   : > { %v1929_v11 = vpop.xlane.xlu0 %1928  ;;  %v2169_v56 = vmul.f32 %v3679_v30, %v4489_v17  ;;  %v3681_v24 = vpop.eup %3680 }
 0x4fa   : > { %v2170_v20 = vmul.f32 %v3681_v24, %v4475_v9  ;;  %v3724_v24 = vld [vmem:[#allocation2] sm:$0xff] }
 0x4fb   : > { %3481 = vmatmul.msk.f32.gmra.mxu2 %vm1464_vm9, %v2169_v56  ;;  %v3598_v56 = vld [vmem:[%s5210_s8] ss:$0 sm:$0xff] }
 0x4fc   : > { %v1926_v0 = vpop.xlane.xlu2 %1925 }
 0x4fd   : > { %v1767_v15 = vpop.f32.mrf.mxu2  ;;  %3682 = vrcp.f32 %v1926_v0 }
 0x4fe   : > { %1787 = vrot.lane.b32.xlu2 %v1767_v15, %s3778_s2 }
 0x501   : > { %v2159_v42 = vpop.xlane.xlu0 %2158 }
 0x502   : > { %3684 = vrcp.f32 %v2159_v42 }
 0x503   : > { %3482 = vmatmul.msk.f32.gmra.mxu2 %vm1464_vm9, %v2170_v20  ;;  %v3683_v21 = vpop.eup %3682  ;;  %3686 = vrcp.f32 %v1929_v11 }
 0x504   : > { %v1942_v17 = vmul.f32 %v3683_v21, %v4503_v61  ;;  %3688 = vrcp.f32 %v2162_v22  ;;  %v1932_v39 = vpop.xlane.xlu2 %1931 }
 0x505   : > { %3690 = vrcp.f32 %v1932_v39 }
 0x506   : > { %3465 = vmatmul.msk.f32.gmra.mxu0 %vm1464_vm9, %v1942_v17  ;;  %v3725_v17 = vld [vmem:[#allocation2 + $0x8] sm:$0xff] }
 0x508   : > { %v3685_v51 = vpop.eup %3684 }
 0x509   : > { %v2171_v41 = vmul.f32 %v3685_v51, %v4507_v48  ;;  %v3687_v16 = vpop.eup %3686  ;;  %v1935_v25 = vpop.xlane.xlu0 %1934 }
 0x50a   : > { %v1943_v9 = vmul.f32 %v3687_v16, %v4497_v10  ;;  %v3689_v23 = vpop.eup %3688  ;;  %3692 = vrcp.f32 %v1935_v25 }
 0x50b   : > { %3483 = vmatmul.msk.f32.gmra.mxu2 %vm1464_vm9, %v2171_v41  ;;  %v2172_v6 = vmul.f32 %v3689_v23, %v4480_v53  ;;  %v3691_v61 = vpop.eup %3690 }
 0x50c   : > { %v1944_v50 = vmul.f32 %v3691_v61, %v4511_v62 }
 0x50e   : > { %3466 = vmatmul.msk.f32.gmra.mxu0 %vm1464_vm9, %v1943_v9  ;;  %v3726_v9 = vld [vmem:[#allocation2 + $0x10] sm:$0xff] }
 0x510   : > { %v3693_v48 = vpop.eup %3692 }
 0x511   : > { %v1945_v27 = vmul.f32 %v3693_v48, %v4515_v28 }
 0x513   : > { %3484 = vmatmul.msk.f32.gmra.mxu2 %vm1464_vm9, %v2172_v6 }
 0x516   : > { %3467 = vmatmul.msk.f32.gmra.mxu0 %vm1464_vm9, %v1944_v50  ;;  %v3727_v50 = vld [vmem:[#allocation2 + $0x18] sm:$0xff] }
 0x51e   : > { %3468 = vmatmul.msk.f32.gmra.mxu0 %vm1464_vm9, %v1945_v27 }
 0x527   : > { %v1770_v10 = vpop.f32.mrf.mxu2 }
 0x528   : > { %1789 = vrot.lane.b32.xlu2 %v1770_v10, %s3778_s2 }
 0x52f   : > { %v1773_v33 = vpop.f32.mrf.mxu2 }
 0x530   : > { %1791 = vrot.lane.b32.xlu2 %v1773_v33, %s3778_s2 }
 0x538   : > { %v1776_v53 = vpop.f32.mrf.mxu2 }
 0x539   : > { %1793 = vrot.lane.b32.xlu2 %v1776_v53, %s3778_s2  ;;  %v3728_v53 = vld [vmem:[#allocation2 + $0x20] sm:$0x3] }
 0x540   : > { %v1779_v47 = vpop.f32.mrf.mxu2 }
 0x541   : > { %1795 = vrot.lane.b32.xlu2 %v1779_v47, %s3778_s2  ;;  %s5220_s2 = sld [smem:[#allocation23_spill]] (!%p3510_p5) }
 0x54a   : > { %v1994_v62 = vpop.f32.mrf.mxu0 }
 0x54b   : > { %2014 = vrot.lane.b32.xlu1 %v1994_v62, %s3779_s30 }
 0x54f   : > { %v2221_v28 = vpop.f32.mrf.mxu2 }
 0x550   : > { %2241 = vrot.lane.b32.xlu0 %v2221_v28, %s3780_s6 }
 0x558   : > { %v1788_v4 = vpop.permute.xlu2 %1787 }
 0x559   : > { %1803 = vst.msk [vmem:[#allocation3] sm:$0xff] %vm1802_vm12, %v1788_v4 }
 0x57e   : > { %v2224_v5 = vpop.f32.mrf.mxu2 }
 0x57f   : > { %2243 = vrot.lane.b32.xlu1 %v2224_v5, %s3780_s6 }
 0x582   : > { %v1790_v34 = vpop.permute.xlu2 %1789 }
 0x583   : > { %1804 = vst.msk [vmem:[#allocation3 + $0x8] sm:$0xff] %vm1802_vm12, %v1790_v34  ;;  %v1997_v40 = vpop.f32.mrf.mxu0 }
 0x584   : > { %2016 = vrot.lane.b32.xlu0 %v1997_v40, %s3779_s30 }
 0x586   : > { %v2227_v32 = vpop.f32.mrf.mxu2 }
 0x587   : > { %2245 = vrot.lane.b32.xlu1 %v2227_v32, %s3780_s6 }
 0x58a   : > { %v1792_v43 = vpop.permute.xlu2 %1791 }
 0x58b   : > { %1805 = vst.msk [vmem:[#allocation3 + $0x10] sm:$0xff] %vm1802_vm12, %v1792_v43  ;;  %v2000_v45 = vpop.f32.mrf.mxu0 }
 0x58c   : > { %2018 = vrot.lane.b32.xlu0 %v2000_v45, %s3779_s30 }
 0x58e   : > { %v2230_v54 = vpop.f32.mrf.mxu2 }
 0x58f   : > { %2247 = vrot.lane.b32.xlu1 %v2230_v54, %s3780_s6 }
 0x593   : > { %v1794_v13 = vpop.permute.xlu2 %1793  ;;  %v2003_v55 = vpop.f32.mrf.mxu0 }
 0x594   : > { %1806 = vst.msk [vmem:[#allocation3 + $0x18] sm:$0xff] %vm1802_vm12, %v1794_v13  ;;  %2020 = vrot.lane.b32.xlu0 %v2003_v55, %s3779_s30 }
 0x596   : > { %v2233_v36 = vpop.f32.mrf.mxu2 }
 0x597   : > { %2249 = vrot.lane.b32.xlu1 %v2233_v36, %s3780_s6 }
 0x59b   : > { %v1796_v26 = vpop.permute.xlu2 %1795  ;;  %v2006_v35 = vpop.f32.mrf.mxu0 }
 0x59c   : > { %1808 = vst.msk [vmem:[#allocation3 + $0x20] sm:$0x3] %vm1807_vm13, %v1796_v26  ;;  %2022 = vrot.lane.b32.xlu0 %v2006_v35, %s3779_s30  ;;  %s5221_s30 = sld [smem:[#allocation21_spill]] (!%p3510_p5) }
 0x5bd   : > { %v2015_v7 = vpop.permute.xlu1 %2014 }
 0x5be   : > { %2030 = vst.msk [vmem:[#allocation3] sm:$0xff] %vm2029_vm14, %v2015_v7 }
 0x5c2   : > { %v2242_v1 = vpop.permute.xlu0 %2241 }
 0x5c3   : > { %2257 = vst.msk [vmem:[#allocation3] sm:$0xff] %vm2256_vm15, %v2242_v1 }
 0x5ca   : > { %v2263_v31 = vld [vmem:[#allocation3] sm:$0xff] }
 0x5cb   : > { %3485 = vmatmul.msk.f32.vlgmr.msra.gmra.mxu3 %vm1104_vm3, %v2263_v31 }
 0x5f1   : > { %v2244_v8 = vpop.permute.xlu1 %2243 }
 0x5f6   : > { %v2017_v37 = vpop.permute.xlu0 %2016 }
 0x5f7   : > { %2031 = vst.msk [vmem:[#allocation3 + $0x8] sm:$0xff] %vm2029_vm14, %v2017_v37  ;;  %v2475_v37 = vld [vmem:[%s3988_s27 + $0x78] sm:$0xff] }
 0x5f8   : > { %2258 = vst.msk [vmem:[#allocation3 + $0x8] sm:$0xff] %vm2256_vm15, %v2244_v8  ;;  %v2474_v8 = vld [vmem:[%s3988_s27 + $0x70] sm:$0xff]  ;;  %2537 = vmatpush.msrb.mxu1 %v2475_v37 }
 0x5f9   : > { %v2246_v38 = vpop.permute.xlu1 %2245  ;;  %2505 = vmatpush.msrb.mxu0 %v2474_v8 }
 0x5fe   : > { %v2019_v46 = vpop.permute.xlu0 %2018 }
 0x5ff   : > { %2032 = vst.msk [vmem:[#allocation3 + $0x10] sm:$0xff] %vm2029_vm14, %v2019_v46  ;;  %v2264_v19 = vld [vmem:[#allocation3 + $0x8] sm:$0xff]  ;;  %v2473_v46 = vld [vmem:[%s3988_s27 + $0x68] sm:$0xff] }
 0x600   : > { %2259 = vst.msk [vmem:[#allocation3 + $0x10] sm:$0xff] %vm2256_vm15, %v2246_v38  ;;  %3486 = vmatmul.msk.f32.gmra.mxu3 %vm1104_vm3, %v2264_v19  ;;  %v2472_v38 = vld [vmem:[%s3988_s27 + $0x60] sm:$0xff]  ;;  %2538 = vmatpush.msrb.mxu1 %v2473_v46  ;;  %v2470_v19 = vld [vmem:[%s3988_s27 + $0x50] sm:$0xff] }
 0x601   : > { %v2248_v12 = vpop.permute.xlu1 %2247  ;;  %2506 = vmatpush.msrb.mxu0 %v2472_v38 }
 0x603   : > { %2507 = vmatpush.msrb.mxu0 %v2470_v19 }
 0x606   : > { %v2021_v49 = vpop.permute.xlu0 %2020 }
 0x607   : > { %2033 = vst.msk [vmem:[#allocation3 + $0x18] sm:$0xff] %vm2029_vm14, %v2021_v49  ;;  %v2265_v14 = vld [vmem:[#allocation3 + $0x10] sm:$0xff]  ;;  %v2468_v49 = vld [vmem:[%s3988_s27 + $0x40] sm:$0xff] }
 0x608   : > { %2260 = vst.msk [vmem:[#allocation3 + $0x18] sm:$0xff] %vm2256_vm15, %v2248_v12  ;;  %3487 = vmatmul.msk.f32.gmra.mxu3 %vm1104_vm3, %v2265_v14  ;;  %v2471_v12 = vld [vmem:[%s3988_s27 + $0x58] sm:$0xff]  ;;  %v2469_v14 = vld [vmem:[%s3988_s27 + $0x48] sm:$0xff]  ;;  %2508 = vmatpush.msrb.mxu0 %v2468_v49 }
 0x609   : > { %v2250_v3 = vpop.permute.xlu1 %2249  ;;  %2539 = vmatpush.msrb.mxu1 %v2471_v12 }
 0x60b   : > { %2540 = vmatpush.msrb.mxu1 %v2469_v14 }
 0x60e   : > { %v2023_v52 = vpop.permute.xlu0 %2022 }
 0x60f   : > { %2035 = vst.msk [vmem:[#allocation3 + $0x20] sm:$0x3] %vm2034_vm0, %v2023_v52  ;;  %v2266_v30 = vld [vmem:[#allocation3 + $0x18] sm:$0xff]  ;;  %v2466_v52 = vld [vmem:[%s3988_s27 + $0x30] sm:$0xff] }
 0x610   : > { %2262 = vst.msk [vmem:[#allocation3 + $0x20] sm:$0x3] %vm2261_vm1, %v2250_v3  ;;  %3488 = vmatmul.msk.f32.gmra.mxu3 %vm1104_vm3, %v2266_v30  ;;  %v2467_v3 = vld [vmem:[%s3988_s27 + $0x38] sm:$0xff]  ;;  %2509 = vmatpush.msrb.mxu0 %v2466_v52  ;;  %v2464_v30 = vld [vmem:[%s3988_s27 + $0x20] sm:$0xff] }
 0x611   : > { %2541 = vmatpush.msrb.mxu1 %v2467_v3 }
 0x612   : > { %2510 = vmatpush.msrb.mxu0 %v2464_v30 }
 0x617   : > { %v2267_v11 = vld [vmem:[#allocation3 + $0x20] sm:$0x3] }
 0x618   : > { %3489 = vmatmul.msk.f32.gmra.mxu3 %vm1104_vm3, %v2267_v11  ;;  %v2465_v11 = vld [vmem:[%s3988_s27 + $0x28] sm:$0xff] }
 0x619   : > { %2542 = vmatpush.msrb.mxu1 %v2465_v11 }
 0x64e   : > { %v2312_v0 = vpop.f32.mrf.mxu3 }
 0x64f   : > { %v2313_v15 = vadd.f32 %v3598_v56, %v2312_v0  ;;  %v2463_v0 = vld [vmem:[%s3988_s27 + $0x18] sm:$0xff] }
 0x650   : > { %2543 = vmatpush.msrb.mxu1 %v2463_v0 }
 0x651   : > { %v4593_v42 = vadd.f32 %v3724_v24, %v2313_v15  ;;  %v2460_v15 = vld [vmem:[%s3988_s27] sm:$0xff]  ;;  %v2461_v24 = vld [vmem:[%s3988_s27 + $0x8] sm:$0xff] }
 0x652   : > { %2544 = vmatpush.msrb.mxu1 %v2461_v24 }
 0x653   : > { %v2334_v20 = vsel %vm1104_vm3, %v4593_v42, 0.0 }
 0x654   : > { %2335 = vadd.xlane.f32.xlu2 %v2334_v20 }
 0x683   : > { %v2315_v21 = vpop.f32.mrf.mxu3 }
 0x684   : > { %v2316_v22 = vadd.f32 %v3598_v56, %v2315_v21 }
 0x686   : > { %v4597_v51 = vadd.f32 %v3725_v17, %v2316_v22 }
 0x688   : > { %v2337_v39 = vsel %vm1104_vm3, %v4597_v51, 0.0 }
 0x689   : > { %2338 = vadd.xlane.f32.xlu0 %v2337_v39 }
 0x68b   : > { %v2318_v41 = vpop.f32.mrf.mxu3 }
 0x68c   : > { %v2319_v16 = vadd.f32 %v3598_v56, %v2318_v41 }
 0x68e   : > { %v4601_v23 = vadd.f32 %v3726_v9, %v2319_v16 }
 0x690   : > { %v2340_v25 = vsel %vm1104_vm3, %v4601_v23, 0.0 }
 0x691   : > { %2341 = vadd.xlane.f32.xlu1 %v2340_v25 }
 0x693   : > { %v2321_v6 = vpop.f32.mrf.mxu3 }
 0x694   : > { %v2322_v61 = vadd.f32 %v3598_v56, %v2321_v6  ;;  %v4670_v6 = vld [vmem:[%s5211_s25] ss:$0 sm:$0xff] }
 0x696   : > { %v4605_v48 = vadd.f32 %v3727_v50, %v2322_v61 }
 0x698   : > { %v2343_v27 = vsel %vm1104_vm3, %v4605_v48, 0.0 }
 0x699   : > { %2344 = vadd.xlane.f32.xlu2 %v2343_v27  ;;  %v4678_v27 = vld [vmem:[%s5212_s10] ss:$0 sm:$0xff] }
 0x69b   : > { %v2324_v10 = vpop.f32.mrf.mxu3 }
 0x69c   : > { %v2325_v33 = vadd.f32 %v3598_v56, %v2324_v10  ;;  %v2462_v56 = vld [vmem:[%s3988_s27 + $0x10] sm:$0xff] }
 0x69d   : > { %2511 = vmatpush.msrb.mxu0 %v2462_v56 }
 0x69e   : > { %v4609_v47 = vadd.f32 %v3728_v53, %v2325_v33 }
 0x69f   : > { %2512 = vmatpush.msrb.mxu0 %v2460_v15 }
 0x6a0   : > { %v2346_v62 = vsel %vm1117_vm4, %v4609_v47, 0.0 }
 0x6a1   : > { %2347 = vadd.xlane.f32.xlu0 %v2346_v62 }
 0x6c7   : > { %v2336_v28 = vpop.xlane.xlu2 %2335 }
 0x6c8   : > { %v2349_v4 = vmul.f32 %v2336_v28, %v4060_v44 }
 0x6ca   : > { %v4615_v58 = vsub.f32 %v4593_v42, %v2349_v4 }
 0x6cc   : > { %v2359_v5 = vmul.f32 %v4615_v58, %v4615_v58 }
 0x6ce   : > { %v2364_v34 = vsel %vm1104_vm3, %v2359_v5, 0.0 }
 0x6cf   : > { %2365 = vadd.xlane.f32.xlu2 %v2364_v34 }
 0x6fc   : > { %v2339_v40 = vpop.xlane.xlu0 %2338 }
 0x6fd   : > { %v2350_v32 = vmul.f32 %v2339_v40, %v4060_v44 }
 0x6ff   : > { %v4622_v43 = vsub.f32 %v4597_v51, %v2350_v32 }
 0x701   : > { %v2360_v45 = vmul.f32 %v4622_v43, %v4622_v43 }
 0x703   : > { %v2367_v54 = vsel %vm1104_vm3, %v2360_v45, 0.0 }
 0x704   : > { %2368 = vadd.xlane.f32.xlu1 %v2367_v54  ;;  %v2342_v13 = vpop.xlane.xlu1 %2341 }
 0x705   : > { %v2351_v55 = vmul.f32 %v2342_v13, %v4060_v44 }
 0x707   : > { %v4629_v36 = vsub.f32 %v4601_v23, %v2351_v55 }
 0x709   : > { %v2361_v26 = vmul.f32 %v4629_v36, %v4629_v36 }
 0x70b   : > { %v2370_v35 = vsel %vm1104_vm3, %v2361_v26, 0.0 }
 0x70c   : > { %v2345_v18 = vpop.xlane.xlu2 %2344  ;;  %2371 = vadd.xlane.f32.xlu0 %v2370_v35 }
 0x70d   : > { %v2352_v57 = vmul.f32 %v2345_v18, %v4060_v44 }
 0x70f   : > { %v4636_v59 = vsub.f32 %v4605_v48, %v2352_v57 }
 0x711   : > { %v2362_v60 = vmul.f32 %v4636_v59, %v4636_v59 }
 0x713   : > { %v2373_v29 = vsel %vm1104_vm3, %v2362_v60, 0.0 }
 0x714   : > { %2374 = vadd.xlane.f32.xlu2 %v2373_v29  ;;  %v2348_v2 = vpop.xlane.xlu0 %2347 }
 0x715   : > { %v2353_v63 = vmul.f32 %v2348_v2, %v4060_v44 }
 0x717   : > { %v4643_v7 = vsub.f32 %v4609_v47, %v2353_v63 }
 0x719   : > { %v2363_v1 = vmul.f32 %v4643_v7, %v4643_v7 }
 0x71b   : > { %v2376_v31 = vsel %vm1117_vm4, %v2363_v1, 0.0 }
 0x71c   : > { %2377 = vadd.xlane.f32.xlu1 %v2376_v31 }
 0x742   : > { %v2366_v20 = vpop.xlane.xlu2 %2365 }
 0x743   : > { %v2379_v21 = vmul.f32 %v2366_v20, %v4060_v44 }
 0x745   : > { %v2384_v22 = vadd.f32 1e-06, %v2379_v21 }
 0x747   : > { %3694 = vrsqrt.f32 %v2384_v22  ;;  %vm2395_vm5 = vweird.f32 %v2384_v22 }
 0x74d   : > { %v3695_v17 = vpop.eup %3694 }
 0x74e   : > { %v2390_v39 = vmul.f32 %v3695_v17, %v2384_v22  ;;  %vm2396_vm2 = vweird.f32 %v3695_v17 }
 0x74f   : > { %vm2397_vm6 = vmor %vm2395_vm5, %vm2396_vm2 }
 0x750   : > { %v2391_v41 = vmul.f32 %v3695_v17, %v2390_v39 }
 0x752   : > { %v2392_v16 = vmul.f32 0.5, %v2391_v41 }
 0x754   : > { %v2393_v9 = vsub.f32 1.5, %v2392_v16 }
 0x756   : > { %v2394_v25 = vmul.f32 %v3695_v17, %v2393_v9 }
 0x758   : > { %v2398_v61 = vsel %vm2397_vm6, %v3695_v17, %v2394_v25 }
 0x759   : > { %v2439_v50 = vmul.f32 %v2398_v61, %v4615_v58 }
 0x75b   : > { %v2447_v10 = vmul.f32 %v4670_v6, %v2439_v50  ;;  %v3016_v50 = vld [vmem:[%s4000_s0 + $0x78] sm:$0xff] }
 0x75c   : > { %3037 = vmatpush.msrb.mxu2 %v3016_v50  ;;  %v3019_v50 = vld [vmem:[%s4000_s0 + $0x90] sm:$0xff] }
 0x75d   : > { %v2455_v33 = vadd.f32 %v4678_v27, %v2447_v10  ;;  %v3032_v10 = vld [vmem:[%s4000_s0 + $0xf8] sm:$0xff] }
 0x75e   : > { %3069 = vmatpush.msrb.mxu3 %v3032_v10 }
 0x75f   : > { %3490 = vmatmul.msk.f32.vlgmr.msrb.gmra.mxu0 %vm1104_vm3, %v2455_v33  ;;  %3495 = vmatmul.msk.f32.vlgmr.msrb.gmra.mxu1 %vm1104_vm3, %v2455_v33  ;;  %v2476_v33 = vld [vmem:[%s3994_s22] sm:$0x3] }
 0x777   : > { %v2369_v53 = vpop.xlane.xlu1 %2368 }
 0x778   : > { %v2380_v62 = vmul.f32 %v2369_v53, %v4060_v44  ;;  %v3015_v53 = vld [vmem:[%s4000_s0 + $0x70] sm:$0xff] }
 0x779   : > { %3038 = vmatpush.msrb.mxu2 %v3015_v53 }
 0x77a   : > { %v2385_v28 = vadd.f32 1e-06, %v2380_v62  ;;  %v3031_v62 = vld [vmem:[%s4000_s0 + $0xf0] sm:$0xff] }
 0x77b   : > { %3070 = vmatpush.msrb.mxu3 %v3031_v62  ;;  %v3002_v62 = vld [vmem:[%s4000_s0 + $0x8] sm:$0xff] }
 0x77c   : > { %3696 = vrsqrt.f32 %v2385_v28  ;;  %vm2405_vm8 = vweird.f32 %v2385_v28 }
 0x77f   : > { %v2372_v4 = vpop.xlane.xlu0 %2371 }
 0x780   : > { %v2381_v58 = vmul.f32 %v2372_v4, %v4060_v44  ;;  %v3013_v4 = vld [vmem:[%s4000_s0 + $0x60] sm:$0xff] }
 0x782   : > { %v3697_v5 = vpop.eup %3696  ;;  %v2386_v34 = vadd.f32 1e-06, %v2381_v58  ;;  %v3029_v58 = vld [vmem:[%s4000_s0 + $0xe0] sm:$0xff] }
 0x783   : > { %v2400_v40 = vmul.f32 %v3697_v5, %v2385_v28  ;;  %vm2406_vm7 = vweird.f32 %v3697_v5  ;;  %v4717_v28 = vperm.slane %v2476_v33, 1 }
 0x784   : > { %3698 = vrsqrt.f32 %v2386_v34  ;;  %vm2407_vm9 = vmor %vm2405_vm8, %vm2406_vm7  ;;  %vm2415_vm12 = vweird.f32 %v2386_v34 }
 0x785   : > { %v2401_v32 = vmul.f32 %v3697_v5, %v2400_v40  ;;  %v3012_v40 = vld [vmem:[%s4000_s0 + $0x58] sm:$0xff] }
 0x787   : > { %v2402_v45 = vmul.f32 0.5, %v2401_v32  ;;  %v2375_v54 = vpop.xlane.xlu2 %2374  ;;  %v3028_v32 = vld [vmem:[%s4000_s0 + $0xd8] sm:$0xff] }
 0x788   : > { %v2382_v13 = vmul.f32 %v2375_v54, %v4060_v44 }
 0x789   : > { %v2403_v55 = vsub.f32 1.5, %v2402_v45 }
 0x78a   : > { %v3699_v26 = vpop.eup %3698  ;;  %v2387_v35 = vadd.f32 1e-06, %v2382_v13  ;;  %v3011_v13 = vld [vmem:[%s4000_s0 + $0x50] sm:$0xff] }
 0x78b   : > { %v2404_v18 = vmul.f32 %v3697_v5, %v2403_v55  ;;  %v2410_v57 = vmul.f32 %v3699_v26, %v2386_v34  ;;  %vm2416_vm10 = vweird.f32 %v3699_v26  ;;  %v3027_v55 = vld [vmem:[%s4000_s0 + $0xd0] sm:$0xff] }
 0x78c   : > { %3700 = vrsqrt.f32 %v2387_v35  ;;  %vm2417_vm13 = vmor %vm2415_vm12, %vm2416_vm10  ;;  %vm2425_vm15 = vweird.f32 %v2387_v35 }
 0x78d   : > { %v2408_v60 = vsel %vm2407_vm9, %v3697_v5, %v2404_v18  ;;  %v2411_v29 = vmul.f32 %v3699_v26, %v2410_v57  ;;  %v3010_v18 = vld [vmem:[%s4000_s0 + $0x48] sm:$0xff] }
 0x78e   : > { %v2440_v2 = vmul.f32 %v2408_v60, %v4622_v43  ;;  %v3026_v57 = vld [vmem:[%s4000_s0 + $0xc8] sm:$0xff] }
 0x78f   : > { %v2412_v63 = vmul.f32 0.5, %v2411_v29  ;;  %v2378_v1 = vpop.xlane.xlu1 %2377 }
 0x790   : > { %v2383_v31 = vmul.f32 %v2378_v1, %v4060_v44  ;;  %v2448_v8 = vmul.f32 %v4670_v6, %v2440_v2  ;;  %v3009_v2 = vld [vmem:[%s4000_s0 + $0x40] sm:$0xff] }
 0x791   : > { %v2413_v37 = vsub.f32 1.5, %v2412_v63  ;;  %v3025_v63 = vld [vmem:[%s4000_s0 + $0xc0] sm:$0xff] }
 0x792   : > { %v3701_v38 = vpop.eup %3700  ;;  %v2388_v46 = vadd.f32 1e-06, %v2383_v31  ;;  %v2456_v19 = vadd.f32 %v4678_v27, %v2448_v8  ;;  %v3008_v8 = vld [vmem:[%s4000_s0 + $0x38] sm:$0xff] }
 0x793   : > { %v2414_v12 = vmul.f32 %v3699_v26, %v2413_v37  ;;  %v2420_v49 = vmul.f32 %v3701_v38, %v2387_v35  ;;  %vm2426_vm14 = vweird.f32 %v3701_v38  ;;  %v3024_v37 = vld [vmem:[%s4000_s0 + $0xb8] sm:$0xff] }
 0x794   : > { %3702 = vrsqrt.f32 %v2388_v46  ;;  %3491 = vmatmul.msk.f32.gmra.mxu0 %vm1104_vm3, %v2456_v19  ;;  %3496 = vmatmul.msk.f32.gmra.mxu1 %vm1104_vm3, %v2456_v19  ;;  %vm2427_vm0 = vmor %vm2425_vm15, %vm2426_vm14  ;;  %vm2435_vm2 = vweird.f32 %v2388_v46 }
 0x795   : > { %v2418_v43 = vsel %vm2417_vm13, %v3699_v26, %v2414_v12  ;;  %v2421_v14 = vmul.f32 %v3701_v38, %v2420_v49  ;;  %v3007_v49 = vld [vmem:[%s4000_s0 + $0x30] sm:$0xff] }
 0x796   : > { %v2441_v52 = vmul.f32 %v2418_v43, %v4629_v36  ;;  %v3023_v43 = vld [vmem:[%s4000_s0 + $0xb0] sm:$0xff] }
 0x797   : > { %v2422_v3 = vmul.f32 0.5, %v2421_v14 }
 0x798   : > { %v2449_v30 = vmul.f32 %v4670_v6, %v2441_v52 }
 0x799   : > { %v2423_v11 = vsub.f32 1.5, %v2422_v3 }
 0x79a   : > { %v3703_v56 = vpop.eup %3702  ;;  %v2457_v0 = vadd.f32 %v4678_v27, %v2449_v30 }
 0x79b   : > { %v2424_v15 = vmul.f32 %v3701_v38, %v2423_v11  ;;  %v2430_v24 = vmul.f32 %v3703_v56, %v2388_v46  ;;  %vm2436_vm1 = vweird.f32 %v3703_v56  ;;  %v3006_v11 = vld [vmem:[%s4000_s0 + $0x28] sm:$0xff] }
 0x79c   : > { %3492 = vmatmul.msk.f32.gmra.mxu0 %vm1104_vm3, %v2457_v0  ;;  %3497 = vmatmul.msk.f32.gmra.mxu1 %vm1104_vm3, %v2457_v0  ;;  %vm2437_vm5 = vmor %vm2435_vm2, %vm2436_vm1 }
 0x79d   : > { %v2428_v20 = vsel %vm2427_vm0, %v3701_v38, %v2424_v15  ;;  %v2431_v21 = vmul.f32 %v3703_v56, %v2430_v24 }
 0x79e   : > { %v2442_v36 = vmul.f32 %v2428_v20, %v4636_v59 }
 0x79f   : > { %v2432_v22 = vmul.f32 0.5, %v2431_v21  ;;  %v3005_v21 = vld [vmem:[%s4000_s0 + $0x20] sm:$0xff] }
 0x7a0   : > { %v2450_v17 = vmul.f32 %v4670_v6, %v2442_v36  ;;  %v3021_v36 = vld [vmem:[%s4000_s0 + $0xa0] sm:$0xff] }
 0x7a1   : > { %v2433_v39 = vsub.f32 1.5, %v2432_v22 }
 0x7a2   : > { %v2458_v41 = vadd.f32 %v4678_v27, %v2450_v17 }
 0x7a3   : > { %v2434_v16 = vmul.f32 %v3703_v56, %v2433_v39 }
 0x7a4   : > { %3493 = vmatmul.msk.f32.gmra.mxu0 %vm1104_vm3, %v2458_v41  ;;  %3498 = vmatmul.msk.f32.gmra.mxu1 %vm1104_vm3, %v2458_v41  ;;  %v3004_v41 = vld [vmem:[%s4000_s0 + $0x18] sm:$0xff] }
 0x7a5   : > { %v2438_v59 = vsel %vm2437_vm5, %v3703_v56, %v2434_v16  ;;  %v3022_v56 = vld [vmem:[%s4000_s0 + $0xa8] sm:$0xff]  ;;  %v3020_v16 = vld [vmem:[%s4000_s0 + $0x98] sm:$0xff] }
 0x7a6   : > { %v2443_v9 = vmul.f32 %v2438_v59, %v4643_v7  ;;  %v3014_v7 = vld [vmem:[%s4000_s0 + $0x68] sm:$0xff] }
 0x7a7   : > { %3039 = vmatpush.msrb.mxu2 %v3014_v7  ;;  %v3018_v7 = vld [vmem:[%s4000_s0 + $0x88] sm:$0xff] }
 0x7a8   : > { %v2451_v25 = vmul.f32 %v4670_v6, %v2443_v9  ;;  %v3030_v6 = vld [vmem:[%s4000_s0 + $0xe8] sm:$0xff] }
 0x7a9   : > { %3071 = vmatpush.msrb.mxu3 %v3030_v6  ;;  %3040 = vmatpush.msrb.mxu2 %v3013_v4 }
 0x7aa   : > { %v2459_v61 = vadd.f32 %v4678_v27, %v2451_v25  ;;  %v4715_v27 = vperm.slane %v2476_v33, 0 }
 0x7ab   : > { %3072 = vmatpush.msrb.mxu3 %v3029_v58  ;;  %3041 = vmatpush.msrb.mxu2 %v3012_v40 }
 0x7ac   : > { %3494 = vmatmul.msk.f32.gmra.mxu0 %vm1104_vm3, %v2459_v61  ;;  %3499 = vmatmul.msk.f32.gmra.mxu1 %vm1104_vm3, %v2459_v61  ;;  %v3003_v61 = vld [vmem:[%s4000_s0 + $0x10] sm:$0xff] }
 0x7ad   : > { %3073 = vmatpush.msrb.mxu3 %v3028_v32  ;;  %3042 = vmatpush.msrb.mxu2 %v3011_v13 }
 0x7af   : > { %3074 = vmatpush.msrb.mxu3 %v3027_v55  ;;  %3043 = vmatpush.msrb.mxu2 %v3010_v18 }
 0x7b1   : > { %3075 = vmatpush.msrb.mxu3 %v3026_v57  ;;  %3044 = vmatpush.msrb.mxu2 %v3009_v2 }
 0x7b3   : > { %3076 = vmatpush.msrb.mxu3 %v3025_v63  ;;  %3045 = vmatpush.msrb.mxu2 %v3008_v8 }
 0x7b5   : > { %3077 = vmatpush.msrb.mxu3 %v3024_v37  ;;  %3046 = vmatpush.msrb.mxu2 %v3007_v49 }
 0x7b7   : > { %3078 = vmatpush.msrb.mxu3 %v3023_v43  ;;  %3047 = vmatpush.msrb.mxu2 %v3006_v11 }
 0x7b9   : > { %3079 = vmatpush.msrb.mxu3 %v3022_v56  ;;  %3048 = vmatpush.msrb.mxu2 %v3005_v21 }
 0x7bb   : > { %3080 = vmatpush.msrb.mxu3 %v3021_v36  ;;  %3049 = vmatpush.msrb.mxu2 %v3004_v41 }
 0x7bd   : > { %3081 = vmatpush.msrb.mxu3 %v3020_v16  ;;  %3050 = vmatpush.msrb.mxu2 %v3003_v61 }
 0x7bf   : > { %3082 = vmatpush.msrb.mxu3 %v3019_v50  ;;  %3051 = vmatpush.msrb.mxu2 %v3002_v62 }
 0x7c1   : > { %3083 = vmatpush.msrb.mxu3 %v3018_v7 }
 0x7dc   : > { %v2514_v5 = vpop.f32.mrf.mxu0  ;;  %v2546_v34 = vpop.f32.mrf.mxu1 }
 0x7dd   : > { %v4724_v45 = vadd.f32 %v2514_v5, %v4715_v27  ;;  %v4727_v54 = vadd.f32 %v2546_v34, %v4717_v28  ;;  %v3001_v5 = vld [vmem:[%s4000_s0] sm:$0xff] }
 0x7de   : > { %v3017_v34 = vld [vmem:[%s4000_s0 + $0x80] sm:$0xff]  ;;  %3052 = vmatpush.msrb.mxu2 %v3001_v5 }
 0x7df   : > { %v4732_v26 = vmul.f32 0.70710677, %v4724_v45  ;;  %v4735_v35 = vmul.f32 0.70710677, %v4727_v54  ;;  %3084 = vmatpush.msrb.mxu3 %v3017_v34 }
 0x7e1   : > { %v2581_v60 = vmul.f32 %v4732_v26, %v4732_v26  ;;  %v2621_v29 = vmul.f32 %v4735_v35, %v4735_v35 }
 0x7e3   : > { %v4745_v1 = vmin.f32 %v2581_v60, 16.0  ;;  %v4747_v31 = vmin.f32 %v2621_v29, 16.0 }
 0x7e5   : > { %v2583_v38 = vmul.f32 2.1237322e-06, %v4745_v1  ;;  %v2594_v46 = vmul.f32 3.8918573e-05, %v4745_v1  ;;  %v2623_v19 = vmul.f32 2.1237322e-06, %v4747_v31 }
 0x7e6   : > { %v2634_v12 = vmul.f32 3.8918573e-05, %v4747_v31 }
 0x7e7   : > { %v2584_v14 = vadd.f32 0.00028619796, %v2583_v38  ;;  %v2595_v52 = vadd.f32 0.001143296, %v2594_v46  ;;  %v2624_v3 = vadd.f32 0.00028619796, %v2623_v19 }
 0x7e8   : > { %v2635_v30 = vadd.f32 0.001143296, %v2634_v12 }
 0x7e9   : > { %v2585_v0 = vmul.f32 %v2584_v14, %v4745_v1  ;;  %v2596_v15 = vmul.f32 %v2595_v52, %v4745_v1  ;;  %v2625_v24 = vmul.f32 %v2624_v3, %v4747_v31 }
 0x7ea   : > { %v2636_v20 = vmul.f32 %v2635_v30, %v4747_v31 }
 0x7eb   : > { %v2586_v22 = vadd.f32 0.0036580483, %v2585_v0  ;;  %v2597_v17 = vadd.f32 0.014752088, %v2596_v15  ;;  %v2626_v9 = vadd.f32 0.0036580483, %v2625_v24 }
 0x7ec   : > { %v2637_v39 = vadd.f32 0.014752088, %v2636_v20 }
 0x7ed   : > { %v2598_v59 = vmul.f32 %v2597_v17, %v4745_v1  ;;  %v2587_v10 = vmul.f32 %v2586_v22, %v4745_v1  ;;  %v2627_v4 = vmul.f32 %v2626_v9, %v4747_v31 }
 0x7ee   : > { %v2638_v25 = vmul.f32 %v2637_v39, %v4747_v31 }
 0x7ef   : > { %v2599_v33 = vadd.f32 0.112945676, %v2598_v59  ;;  %v2588_v40 = vadd.f32 0.05243302, %v2587_v10  ;;  %v2628_v18 = vadd.f32 0.05243302, %v2627_v4 }
 0x7f0   : > { %v2639_v53 = vadd.f32 0.112945676, %v2638_v25  ;;  %v2561_v10 = vmul.f32 0.5, %v4724_v45 }
 0x7f1   : > { %v2600_v6 = vmul.f32 %v2599_v33, %v4745_v1  ;;  %v2589_v60 = vmul.f32 %v2588_v40, %v4745_v1  ;;  %v2629_v63 = vmul.f32 %v2628_v18, %v4747_v31 }
 0x7f2   : > { %v2640_v58 = vmul.f32 %v2639_v53, %v4747_v31  ;;  %v2562_v53 = vmul.f32 0.5, %v4727_v54 }
 0x7f3   : > { %v2601_v32 = vadd.f32 0.4994258, %v2600_v6  ;;  %v2590_v8 = vadd.f32 0.18741608, %v2589_v60  ;;  %v2630_v37 = vadd.f32 0.18741608, %v2629_v63 }
 0x7f4   : > { %v2641_v13 = vadd.f32 0.4994258, %v2640_v58 }
 0x7f5   : > { %v2602_v55 = vmul.f32 %v2601_v32, %v4745_v1  ;;  %v2591_v46 = vmul.f32 %v2590_v8, %v4745_v1  ;;  %v2631_v49 = vmul.f32 %v2630_v37, %v4747_v31 }
 0x7f6   : > { %v2642_v57 = vmul.f32 %v2641_v13, %v4747_v31 }
 0x7f7   : > { %v2603_v29 = vadd.f32 1.0, %v2602_v55  ;;  %v2592_v52 = vadd.f32 1.1283791, %v2591_v46  ;;  %v2632_v15 = vadd.f32 1.1283791, %v2631_v49 }
 0x7f8   : > { %v2643_v2 = vadd.f32 1.0, %v2642_v57 }
 0x7f9   : > { %3704 = vrcp.f32 %v2603_v29  ;;  %v2615_v3 = vand.u32 2147483648, %v2603_v29  ;;  %v2613_v56 = vand.u32 2147483647, %v2603_v29  ;;  %vm2609_vm8 = vweird.f32 %v2603_v29 }
 0x7fa   : > { %3706 = vrcp.f32 %v2643_v2  ;;  %v2655_v0 = vand.u32 2147483648, %v2643_v2  ;;  %v2653_v20 = vand.u32 2147483647, %v2643_v2  ;;  %vm2649_vm10 = vweird.f32 %v2643_v2 }
 0x7fb   : > { %v2616_v1 = vor.u32 1.1754944e-38, %v2615_v3  ;;  %v2593_v31 = vmul.f32 %v2592_v52, %v4732_v26  ;;  %vm2614_vm12 = vcmp.eq.f32.partialorder %v2613_v56, 8.507059e+37  ;;  %v2633_v41 = vmul.f32 %v2632_v15, %v4735_v35 }
 0x7fc   : > { %v2656_v17 = vor.u32 1.1754944e-38, %v2655_v0  ;;  %vm2654_vm14 = vcmp.eq.f32.partialorder %v2653_v20, 8.507059e+37 }
 0x7ff   : > { %v3705_v38 = vpop.eup %3704 }
 0x800   : > { %v3707_v19 = vpop.eup %3706  ;;  %v2605_v12 = vmul.f32 %v3705_v38, %v2603_v29  ;;  %vm2610_vm6 = vweird.f32 %v3705_v38 }
 0x801   : > { %v2645_v43 = vmul.f32 %v3707_v19, %v2643_v2  ;;  %vm2650_vm7 = vweird.f32 %v3707_v19  ;;  %vm2611_vm9 = vmor %vm2609_vm8, %vm2610_vm6 }
 0x802   : > { %v2606_v14 = vsub.f32 1.0, %v2605_v12  ;;  %vm2651_vm13 = vmor %vm2649_vm10, %vm2650_vm7 }
 0x803   : > { %v2646_v30 = vsub.f32 1.0, %v2645_v43 }
 0x804   : > { %v2607_v11 = vmul.f32 %v3705_v38, %v2606_v14 }
 0x805   : > { %v2647_v24 = vmul.f32 %v3707_v19, %v2646_v30 }
 0x806   : > { %v2608_v21 = vadd.f32 %v3705_v38, %v2607_v11 }
 0x807   : > { %v2648_v36 = vadd.f32 %v3707_v19, %v2647_v24 }
 0x808   : > { %v2612_v22 = vsel %vm2611_vm9, %v3705_v38, %v2608_v21 }
 0x809   : > { %v2617_v39 = vsel %vm2614_vm12, %v2616_v1, %v2612_v22  ;;  %v2652_v16 = vsel %vm2651_vm13, %v3707_v19, %v2648_v36 }
 0x80a   : > { %v2618_v59 = vmul.f32 %v2617_v39, %v2593_v31  ;;  %v2657_v9 = vsel %vm2654_vm14, %v2656_v17, %v2652_v16 }
 0x80b   : > { %v2658_v25 = vmul.f32 %v2657_v9, %v2633_v41 }
 0x80c   : > { %v3500_v61 = vclamps-f32 %v2618_v59, 1.0 }
 0x80d   : > { %v3501_v50 = vclamps-f32 %v2658_v25, 1.0 }
 0x80e   : > { %v2981_v33 = vadd.f32 1.0, %v3500_v61 }
 0x80f   : > { %v2982_v26 = vadd.f32 1.0, %v3501_v50 }
 0x810   : > { %v2991_v62 = vmul.f32 %v2981_v33, %v2561_v10 }
 0x811   : > { %v2992_v7 = vmul.f32 %v2982_v26, %v2562_v53  ;;  %v2517_v6 = vpop.f32.mrf.mxu0  ;;  %v2549_v4 = vpop.f32.mrf.mxu1 }
 0x812   : > { %3053 = vmatmul.f32.vlgmr.msrb.gmra.mxu2 %v2991_v62  ;;  %v4790_v35 = vadd.f32 %v2517_v6, %v4715_v27  ;;  %v4793_v58 = vadd.f32 %v2549_v4, %v4717_v28 }
 0x813   : > { %3085 = vmatmul.f32.vlgmr.msrb.gmra.mxu3 %v2992_v7 }
 0x814   : > { %v4796_v5 = vmul.f32 0.70710677, %v4790_v35  ;;  %v4799_v45 = vmul.f32 0.70710677, %v4793_v58 }
 0x816   : > { %v2661_v54 = vmul.f32 %v4796_v5, %v4796_v5  ;;  %v2701_v34 = vmul.f32 %v4799_v45, %v4799_v45 }
 0x818   : > { %v4805_v40 = vmin.f32 %v2661_v54, 16.0  ;;  %v4807_v32 = vmin.f32 %v2701_v34, 16.0 }
 0x819   : > { %v2520_v13 = vpop.f32.mrf.mxu0  ;;  %v2552_v55 = vpop.f32.mrf.mxu1 }
 0x81a   : > { %v2663_v18 = vmul.f32 2.1237322e-06, %v4805_v40  ;;  %v2703_v57 = vmul.f32 2.1237322e-06, %v4807_v32  ;;  %v4812_v60 = vadd.f32 %v2520_v13, %v4715_v27  ;;  %v4815_v29 = vadd.f32 %v2552_v55, %v4717_v28 }
 0x81b   : > { %v2674_v2 = vmul.f32 3.8918573e-05, %v4805_v40  ;;  %v2714_v63 = vmul.f32 3.8918573e-05, %v4807_v32 }
 0x81c   : > { %v2664_v8 = vadd.f32 0.00028619796, %v2663_v18  ;;  %v2704_v37 = vadd.f32 0.00028619796, %v2703_v57  ;;  %v4820_v38 = vmul.f32 0.70710677, %v4812_v60 }
 0x81d   : > { %v4823_v46 = vmul.f32 0.70710677, %v4815_v29  ;;  %v2675_v19 = vadd.f32 0.001143296, %v2674_v2  ;;  %v2715_v43 = vadd.f32 0.001143296, %v2714_v63 }
 0x81e   : > { %v2665_v12 = vmul.f32 %v2664_v8, %v4805_v40  ;;  %v2705_v49 = vmul.f32 %v2704_v37, %v4807_v32  ;;  %v2741_v14 = vmul.f32 %v4820_v38, %v4820_v38 }
 0x81f   : > { %v2781_v52 = vmul.f32 %v4823_v46, %v4823_v46  ;;  %v2676_v3 = vmul.f32 %v2675_v19, %v4805_v40  ;;  %v2716_v11 = vmul.f32 %v2715_v43, %v4807_v32 }
 0x820   : > { %v2666_v30 = vadd.f32 0.0036580483, %v2665_v12  ;;  %v2706_v56 = vadd.f32 0.0036580483, %v2705_v49  ;;  %v4833_v0 = vmin.f32 %v2741_v14, 16.0 }
 0x821   : > { %v4835_v15 = vmin.f32 %v2781_v52, 16.0  ;;  %v2523_v24 = vpop.f32.mrf.mxu0  ;;  %v2555_v20 = vpop.f32.mrf.mxu1  ;;  %v2677_v21 = vadd.f32 0.014752088, %v2676_v3  ;;  %v2717_v17 = vadd.f32 0.014752088, %v2716_v11 }
 0x822   : > { %v4838_v1 = vadd.f32 %v2523_v24, %v4715_v27  ;;  %v4841_v36 = vadd.f32 %v2555_v20, %v4717_v28  ;;  %v2743_v31 = vmul.f32 2.1237322e-06, %v4833_v0  ;;  %v2667_v39 = vmul.f32 %v2666_v30, %v4805_v40 }
 0x823   : > { %v2783_v22 = vmul.f32 2.1237322e-06, %v4835_v15  ;;  %v2678_v41 = vmul.f32 %v2677_v21, %v4805_v40  ;;  %v2707_v16 = vmul.f32 %v2706_v56, %v4807_v32  ;;  %v2718_v50 = vmul.f32 %v2717_v17, %v4807_v32 }
 0x824   : > { %v2744_v59 = vadd.f32 0.00028619796, %v2743_v31  ;;  %v4849_v25 = vmul.f32 0.70710677, %v4838_v1  ;;  %v4852_v61 = vmul.f32 0.70710677, %v4841_v36 }
 0x825   : > { %v2784_v9 = vadd.f32 0.00028619796, %v2783_v22  ;;  %v2668_v26 = vadd.f32 0.05243302, %v2667_v39  ;;  %v2679_v7 = vadd.f32 0.112945676, %v2678_v41 }
 0x826   : > { %v2745_v10 = vmul.f32 %v2744_v59, %v4833_v0  ;;  %v2821_v53 = vmul.f32 %v4849_v25, %v4849_v25  ;;  %v2861_v62 = vmul.f32 %v4852_v61, %v4852_v61  ;;  %v2708_v6 = vadd.f32 0.05243302, %v2707_v16 }
 0x827   : > { %v2785_v33 = vmul.f32 %v2784_v9, %v4835_v15  ;;  %v2719_v18 = vadd.f32 0.112945676, %v2718_v50  ;;  %v2669_v8 = vmul.f32 %v2668_v26, %v4805_v40  ;;  %v2680_v12 = vmul.f32 %v2679_v7, %v4805_v40 }
 0x828   : > { %v2746_v4 = vadd.f32 0.0036580483, %v2745_v10  ;;  %v4861_v54 = vmin.f32 %v2821_v53, 16.0  ;;  %v4863_v55 = vmin.f32 %v2861_v62, 16.0  ;;  %v2709_v49 = vmul.f32 %v2708_v6, %v4807_v32 }
 0x829   : > { %v2526_v34 = vpop.f32.mrf.mxu0  ;;  %v2558_v13 = vpop.f32.mrf.mxu1  ;;  %v2786_v57 = vadd.f32 0.0036580483, %v2785_v33  ;;  %v2720_v3 = vmul.f32 %v2719_v18, %v4807_v32  ;;  %v2670_v56 = vadd.f32 0.18741608, %v2669_v8  ;;  %v2681_v20 = vadd.f32 0.4994258, %v2680_v12 }
 0x82a   : > { %v2823_v2 = vmul.f32 2.1237322e-06, %v4861_v54  ;;  %v4867_v63 = vadd.f32 %v2526_v34, %v4715_v27  ;;  %v2863_v37 = vmul.f32 2.1237322e-06, %v4863_v55  ;;  %v4872_v19 = vadd.f32 %v2558_v13, %v4717_v28 }
 0x82b   : > { %v2747_v43 = vmul.f32 %v2746_v4, %v4833_v0  ;;  %v2787_v27 = vmul.f32 %v2786_v57, %v4835_v15  ;;  %v2710_v21 = vadd.f32 0.18741608, %v2709_v49  ;;  %v2682_v41 = vmul.f32 %v2681_v20, %v4805_v40 }
 0x82c   : > { %v2824_v14 = vadd.f32 0.00028619796, %v2823_v2  ;;  %v2864_v52 = vadd.f32 0.00028619796, %v2863_v37  ;;  %v4881_v11 = vmul.f32 0.70710677, %v4867_v63  ;;  %v2671_v33 = vmul.f32 %v2670_v56, %v4805_v40 }
 0x82d   : > { %v4885_v24 = vmul.f32 0.70710677, %v4872_v19  ;;  %v2748_v31 = vadd.f32 0.05243302, %v2747_v43  ;;  %v2721_v16 = vadd.f32 0.4994258, %v2720_v3  ;;  %v2711_v53 = vmul.f32 %v2710_v21, %v4807_v32 }
 0x82e   : > { %v2825_v30 = vmul.f32 %v2824_v14, %v4861_v54  ;;  %v2865_v28 = vmul.f32 %v2864_v52, %v4863_v55  ;;  %v2901_v17 = vmul.f32 %v4881_v11, %v4881_v11  ;;  %v2788_v59 = vadd.f32 0.05243302, %v2787_v27 }
 0x82f   : > { %v2941_v39 = vmul.f32 %v4885_v24, %v4885_v24  ;;  %v2683_v10 = vadd.f32 1.0, %v2682_v41  ;;  %v2722_v26 = vmul.f32 %v2721_v16, %v4807_v32  ;;  %v2749_v62 = vmul.f32 %v2748_v31, %v4833_v0 }
 0x830   : > { %v2826_v22 = vadd.f32 0.0036580483, %v2825_v30  ;;  %v2866_v50 = vadd.f32 0.0036580483, %v2865_v28  ;;  %v4897_v7 = vmin.f32 %v2901_v17, 16.0  ;;  %v2789_v4 = vmul.f32 %v2788_v59, %v4835_v15 }
 0x831   : > { %v4899_v6 = vmin.f32 %v2941_v39, 16.0  ;;  %3708 = vrcp.f32 %v2683_v10  ;;  %v2672_v18 = vadd.f32 1.1283791, %v2671_v33  ;;  %v2712_v57 = vadd.f32 1.1283791, %v2711_v53 }
 0x832   : > { %v2827_v9 = vmul.f32 %v2826_v22, %v4861_v54  ;;  %v2867_v13 = vmul.f32 %v2866_v50, %v4863_v55  ;;  %v4903_v2 = vadd.f32 1.0, %v2722_v26  ;;  %v2750_v40 = vadd.f32 0.18741608, %v2749_v62 }
 0x833   : > { %v2903_v8 = vmul.f32 2.1237322e-06, %v4897_v7  ;;  %v2943_v32 = vmul.f32 2.1237322e-06, %v4899_v6  ;;  %v2790_v37 = vadd.f32 0.18741608, %v2789_v4  ;;  %v2673_v3 = vmul.f32 %v2672_v18, %v4796_v5 }
 0x834   : > { %v2828_v34 = vadd.f32 0.05243302, %v2827_v9  ;;  %3710 = vrcp.f32 %v4903_v2  ;;  %v2754_v12 = vmul.f32 3.8918573e-05, %v4833_v0  ;;  %v4910_v43 = vmul.f32 0.5, %v4790_v35 }
 0x835   : > { %v2868_v52 = vadd.f32 0.05243302, %v2867_v13  ;;  %v4915_v27 = vmul.f32 0.5, %v4793_v58  ;;  %v2713_v30 = vmul.f32 %v2712_v57, %v4799_v45  ;;  %v4919_v28 = vmul.f32 %v2750_v40, %v4833_v0 }
 0x836   : > { %v2829_v14 = vmul.f32 %v2828_v34, %v4861_v54  ;;  %v2904_v20 = vadd.f32 0.00028619796, %v2903_v8  ;;  %v2944_v21 = vadd.f32 0.00028619796, %v2943_v32  ;;  %v2693_v31 = vand.u32 2147483647, %v2683_v10 }
 0x837   : > { %v3709_v49 = vpop.eup %3708  ;;  %v4922_v35 = vmul.f32 %v2790_v37, %v4835_v15  ;;  %vm2689_vm15 = vweird.f32 %v2683_v10  ;;  %v2755_v17 = vadd.f32 0.001143296, %v2754_v12  ;;  %v4927_v58 = vmul.f32 %v2868_v52, %v4863_v55 }
 0x838   : > { %v2685_v56 = vmul.f32 %v3709_v49, %v2683_v10  ;;  %v4924_v39 = vadd.f32 0.18741608, %v2829_v14  ;;  %v2695_v5 = vand.u32 2147483648, %v2683_v10  ;;  %v2794_v45 = vmul.f32 3.8918573e-05, %v4835_v15 }
 0x839   : > { %vm2690_vm0 = vweird.f32 %v3709_v49  ;;  %v2756_v59 = vmul.f32 %v2755_v17, %v4833_v0  ;;  %v2834_v9 = vmul.f32 3.8918573e-05, %v4861_v54  ;;  %v2905_v50 = vmul.f32 %v2904_v20, %v4897_v7 }
 0x83a   : > { %v2686_v22 = vsub.f32 1.0, %v2685_v56  ;;  %v3711_v41 = vpop.eup %3710  ;;  %v4934_v33 = vmul.f32 %v2944_v21, %v4899_v6  ;;  %vm2694_vm1 = vcmp.eq.f32.partialorder %v2693_v31, 8.507059e+37  ;;  %v2795_v4 = vadd.f32 0.001143296, %v2794_v45  ;;  %vm2691_vm2 = vmor %vm2689_vm15, %vm2690_vm0 }
 0x83b   : > { %v2725_v53 = vmul.f32 %v3711_v41, %v4903_v2  ;;  %v2757_v62 = vadd.f32 0.014752088, %v2756_v59  ;;  %v2835_v34 = vadd.f32 0.001143296, %v2834_v9  ;;  %v2696_v13 = vor.u32 1.1754944e-38, %v2695_v5 }
 0x83c   : > { %v2687_v16 = vmul.f32 %v3709_v49, %v2686_v22  ;;  %v2735_v57 = vand.u32 2147483648, %v4903_v2  ;;  %v2874_v40 = vmul.f32 3.8918573e-05, %v4863_v55  ;;  %v2796_v37 = vmul.f32 %v2795_v4, %v4835_v15 }
 0x83d   : > { %v2726_v18 = vsub.f32 1.0, %v2725_v53  ;;  %v2758_v32 = vmul.f32 %v2757_v62, %v4833_v0  ;;  %v2836_v12 = vmul.f32 %v2835_v34, %v4861_v54  ;;  %vm2730_vm5 = vweird.f32 %v3711_v41 }
 0x83e   : > { %v2688_v26 = vadd.f32 %v3709_v49, %v2687_v16  ;;  %v2733_v56 = vand.u32 2147483647, %v4903_v2  ;;  %v2797_v21 = vadd.f32 0.014752088, %v2796_v37  ;;  %vm2729_vm6 = vweird.f32 %v4903_v2 }
 0x83f   : > { %v2727_v52 = vmul.f32 %v3711_v41, %v2726_v18  ;;  %v2759_v20 = vadd.f32 0.112945676, %v2758_v32  ;;  %v2837_v31 = vadd.f32 0.014752088, %v2836_v12  ;;  %v2736_v17 = vor.u32 1.1754944e-38, %v2735_v57  ;;  %vm2731_vm7 = vmor %vm2729_vm6, %vm2730_vm5 }
 0x840   : > { %v2692_v8 = vsel %vm2691_vm2, %v3709_v49, %v2688_v26  ;;  %v2875_v49 = vadd.f32 0.001143296, %v2874_v40  ;;  %v2798_v16 = vmul.f32 %v2797_v21, %v4835_v15  ;;  %v2906_v9 = vadd.f32 0.0036580483, %v2905_v50 }
 0x841   : > { %v2697_v14 = vsel %vm2694_vm1, %v2696_v13, %v2692_v8  ;;  %v2728_v22 = vadd.f32 %v3711_v41, %v2727_v52  ;;  %v2760_v45 = vmul.f32 %v2759_v20, %v4833_v0  ;;  %v2838_v59 = vmul.f32 %v2837_v31, %v4861_v54 }
 0x842   : > { %v2698_v10 = vmul.f32 %v2697_v14, %v2673_v3  ;;  %vm2734_vm8 = vcmp.eq.f32.partialorder %v2733_v56, 8.507059e+37  ;;  %v2876_v3 = vmul.f32 %v2875_v49, %v4863_v55  ;;  %v2799_v34 = vadd.f32 0.112945676, %v2798_v16 }
 0x843   : > { %v2732_v53 = vsel %vm2731_vm7, %v3711_v41, %v2728_v22  ;;  %v2761_v4 = vadd.f32 0.4994258, %v2760_v45  ;;  %v2839_v13 = vadd.f32 0.112945676, %v2838_v59  ;;  %v2914_v57 = vmul.f32 3.8918573e-05, %v4897_v7 }
 0x844   : > { %v3502_v5 = vclamps-f32 %v2698_v10, 1.0  ;;  %v2737_v62 = vsel %vm2734_vm8, %v2736_v17, %v2732_v53  ;;  %v2877_v18 = vadd.f32 0.014752088, %v2876_v3  ;;  %v2800_v32 = vmul.f32 %v2799_v34, %v4835_v15 }
 0x845   : > { %v2738_v2 = vmul.f32 %v2737_v62, %v2713_v30  ;;  %v2762_v8 = vmul.f32 %v2761_v4, %v4833_v0  ;;  %v2954_v41 = vmul.f32 3.8918573e-05, %v4899_v6  ;;  %v2840_v37 = vmul.f32 %v2839_v13, %v4861_v54 }
 0x846   : > { %v2983_v26 = vadd.f32 1.0, %v3502_v5  ;;  %v2878_v12 = vmul.f32 %v2877_v18, %v4863_v55  ;;  %v2915_v14 = vadd.f32 0.001143296, %v2914_v57  ;;  %v2907_v30 = vmul.f32 %v2906_v9, %v4897_v7 }
 0x847   : > { %v3503_v50 = vclamps-f32 %v2738_v2, 1.0  ;;  %v4957_v52 = vadd.f32 1.0, %v2762_v8  ;;  %v2801_v56 = vadd.f32 0.4994258, %v2800_v32  ;;  %v2955_v10 = vadd.f32 0.001143296, %v2954_v41 }
 0x848   : > { %v2993_v40 = vmul.f32 %v2983_v26, %v4910_v43  ;;  %v2841_v20 = vadd.f32 0.4994258, %v2840_v37  ;;  %v2879_v0 = vadd.f32 0.112945676, %v2878_v12  ;;  %v2916_v21 = vmul.f32 %v2915_v14, %v4897_v7 }
 0x849   : > { %v2984_v43 = vadd.f32 1.0, %v3503_v50  ;;  %v2831_v31 = vmul.f32 %v4924_v39, %v4861_v54  ;;  %v2870_v22 = vadd.f32 0.18741608, %v4927_v58  ;;  %v2946_v17 = vadd.f32 0.0036580483, %v4934_v33 }
 0x84a   : > { %3056 = vmatmul.f32.gmra.mxu2 %v2993_v40  ;;  %3712 = vrcp.f32 %v4957_v52  ;;  %v2802_v5 = vmul.f32 %v2801_v56, %v4835_v15  ;;  %v2842_v45 = vmul.f32 %v2841_v20, %v4861_v54  ;;  %v2880_v16 = vmul.f32 %v2879_v0, %v4863_v55 }
 0x84b   : > { %v2994_v49 = vmul.f32 %v2984_v43, %v4915_v27  ;;  %v2908_v59 = vadd.f32 0.05243302, %v2907_v30  ;;  %v2917_v9 = vadd.f32 0.014752088, %v2916_v21  ;;  %v2956_v53 = vmul.f32 %v2955_v10, %v4899_v6 }
 0x84c   : > { %v2752_v39 = vadd.f32 1.1283791, %v4919_v28  ;;  %v2792_v58 = vadd.f32 1.1283791, %v4922_v35  ;;  %v4972_v33 = vadd.f32 1.0, %v2802_v5  ;;  %v4974_v3 = vadd.f32 1.0, %v2842_v45 }
 0x84d   : > { %3088 = vmatmul.f32.gmra.mxu3 %v2994_v49  ;;  %v2871_v27 = vmul.f32 %v2870_v22, %v4863_v55  ;;  %v2881_v15 = vadd.f32 0.4994258, %v2880_v16  ;;  %v2918_v54 = vmul.f32 %v2917_v9, %v4897_v7  ;;  %v2832_v26 = vadd.f32 1.1283791, %v2831_v31 }
 0x84e   : > { %v2947_v62 = vmul.f32 %v2946_v17, %v4899_v6  ;;  %3714 = vrcp.f32 %v4972_v33  ;;  %v2957_v4 = vadd.f32 0.014752088, %v2956_v53  ;;  %v4981_v28 = vmul.f32 0.5, %v4812_v60 }
 0x84f   : > { %v2909_v35 = vmul.f32 %v2908_v59, %v4897_v7  ;;  %3716 = vrcp.f32 %v4974_v3  ;;  %v2753_v2 = vmul.f32 %v2752_v39, %v4820_v38  ;;  %v4987_v13 = vmul.f32 %v2792_v58, %v4823_v46 }
 0x850   : > { %v3713_v34 = vpop.eup %3712  ;;  %v2773_v57 = vand.u32 2147483647, %v4957_v52  ;;  %v4991_v40 = vadd.f32 1.1283791, %v2871_v27  ;;  %v2775_v8 = vand.u32 2147483648, %v4957_v52  ;;  %v2882_v60 = vmul.f32 %v2881_v15, %v4863_v55 }
 0x851   : > { %v2765_v18 = vmul.f32 %v3713_v34, %v4957_v52  ;;  %v2919_v32 = vadd.f32 0.112945676, %v2918_v54  ;;  %v4996_v41 = vmul.f32 %v2832_v26, %v4849_v25  ;;  %v4998_v50 = vadd.f32 0.05243302, %v2947_v62 }
 0x852   : > { %v2958_v46 = vmul.f32 %v2957_v4, %v4899_v6  ;;  %v5001_v37 = vadd.f32 0.18741608, %v2909_v35  ;;  %vm2769_vm9 = vweird.f32 %v4957_v52  ;;  %v5004_v12 = vadd.f32 1.0, %v2882_v60 }
 0x853   : > { %v2766_v38 = vsub.f32 1.0, %v2765_v18  ;;  %v2920_v14 = vmul.f32 %v2919_v32, %v4897_v7  ;;  %vm2770_vm10 = vweird.f32 %v3713_v34  ;;  %vm5007_vm12 = vcmp.eq.f32.partialorder %v2773_v57, 8.507059e+37 }
 0x854   : > { %v3715_v30 = vpop.eup %3714  ;;  %v2959_v25 = vadd.f32 0.112945676, %v2958_v46  ;;  %v2776_v43 = vor.u32 1.1754944e-38, %v2775_v8  ;;  %vm2809_vm13 = vweird.f32 %v4972_v33  ;;  %3718 = vrcp.f32 %v5004_v12  ;;  %vm2771_vm14 = vmor %vm2769_vm9, %vm2770_vm10 }
 0x855   : > { %v2767_v56 = vmul.f32 %v3713_v34, %v2766_v38  ;;  %v3717_v10 = vpop.eup %3716  ;;  %v2805_v20 = vmul.f32 %v3715_v30, %v4972_v33  ;;  %v2813_v21 = vand.u32 2147483647, %v4972_v33  ;;  %v2815_v31 = vand.u32 2147483648, %v4972_v33 }
 0x856   : > { %v2845_v22 = vmul.f32 %v3717_v10, %v4974_v3  ;;  %vm2849_vm15 = vweird.f32 %v4974_v3  ;;  %v2853_v49 = vand.u32 2147483647, %v4974_v3  ;;  %v2921_v5 = vadd.f32 0.4994258, %v2920_v14 }
 0x857   : > { %v2768_v0 = vadd.f32 %v3713_v34, %v2767_v56  ;;  %v2806_v17 = vsub.f32 1.0, %v2805_v20  ;;  %v2855_v59 = vand.u32 2147483648, %v4974_v3  ;;  %v2960_v9 = vmul.f32 %v2959_v25, %v4899_v6 }
 0x858   : > { %v2846_v16 = vsub.f32 1.0, %v2845_v22  ;;  %vm2810_vm0 = vweird.f32 %v3715_v30  ;;  %v2922_v52 = vmul.f32 %v2921_v5, %v4897_v7  ;;  %vm5026_vm1 = vcmp.eq.f32.partialorder %v2813_v21, 8.507059e+37 }
 0x859   : > { %v2772_v45 = vsel %vm2771_vm14, %v3713_v34, %v2768_v0  ;;  %v2807_v39 = vmul.f32 %v3715_v30, %v2806_v17  ;;  %vm2850_vm2 = vweird.f32 %v3717_v10  ;;  %v2816_v62 = vor.u32 1.1754944e-38, %v2815_v31  ;;  %vm2811_vm6 = vmor %vm2809_vm13, %vm2810_vm0 }
 0x85a   : > { %v2777_v53 = vsel %vm5007_vm12, %v2776_v43, %v2772_v45  ;;  %v2847_v15 = vmul.f32 %v3717_v10, %v2846_v16  ;;  %v3719_v54 = vpop.eup %3718  ;;  %vm5030_vm5 = vcmp.eq.f32.partialorder %v2853_v49, 8.507059e+37  ;;  %v5034_v34 = vadd.f32 1.0, %v2922_v52  ;;  %vm2851_vm7 = vmor %vm2849_vm15, %vm2850_vm2 }
 0x85b   : > { %v2778_v58 = vmul.f32 %v2777_v53, %v2753_v2  ;;  %v2808_v26 = vadd.f32 %v3715_v30, %v2807_v39  ;;  %v2885_v18 = vmul.f32 %v3719_v54, %v5004_v12  ;;  %v2961_v57 = vadd.f32 0.4994258, %v2960_v9 }
 0x85c   : > { %v2848_v2 = vadd.f32 %v3717_v10, %v2847_v15  ;;  %v2856_v60 = vor.u32 1.1754944e-38, %v2855_v59  ;;  %v2893_v32 = vand.u32 2147483647, %v5004_v12  ;;  %3720 = vrcp.f32 %v5034_v34 }
 0x85d   : > { %v3504_v35 = vclamps-f32 %v2778_v58, 1.0  ;;  %v2812_v8 = vsel %vm2811_vm6, %v3715_v30, %v2808_v26  ;;  %v2886_v33 = vsub.f32 1.0, %v2885_v18  ;;  %vm2890_vm8 = vweird.f32 %v3719_v54 }
 0x85e   : > { %v2817_v46 = vsel %vm5026_vm1, %v2816_v62, %v2812_v8  ;;  %v2852_v14 = vsel %vm2851_vm7, %v3717_v10, %v2848_v2  ;;  %v2895_v3 = vand.u32 2147483648, %v5004_v12  ;;  %v2962_v20 = vmul.f32 %v2961_v57, %v4899_v6 }
 0x85f   : > { %v2985_v38 = vadd.f32 1.0, %v3504_v35  ;;  %v2818_v56 = vmul.f32 %v2817_v46, %v4987_v13  ;;  %v2857_v55 = vsel %vm5030_vm5, %v2856_v60, %v2852_v14  ;;  %v2887_v43 = vmul.f32 %v3719_v54, %v2886_v33 }
 0x860   : > { %v2858_v25 = vmul.f32 %v2857_v55, %v4996_v41  ;;  %v2566_v0 = vmul.f32 0.5, %v4815_v29  ;;  %v2567_v10 = vmul.f32 0.5, %v4838_v1  ;;  %v2873_v13 = vmul.f32 %v4991_v40, %v4852_v61 }
 0x861   : > { %v2995_v30 = vmul.f32 %v2985_v38, %v4981_v28  ;;  %v3505_v21 = vclamps-f32 %v2818_v56, 1.0  ;;  %v2888_v22 = vadd.f32 %v3719_v54, %v2887_v43  ;;  %vm2889_vm9 = vweird.f32 %v5004_v12 }
 0x862   : > { %v3506_v31 = vclamps-f32 %v2858_v25, 1.0  ;;  %v2963_v17 = vadd.f32 1.0, %v2962_v20  ;;  %v3721_v28 = vpop.eup %3720  ;;  %v2911_v41 = vmul.f32 %v5001_v37, %v4897_v7  ;;  %v2949_v49 = vmul.f32 %v4998_v50, %v4899_v6  ;;  %vm2891_vm10 = vmor %vm2889_vm9, %vm2890_vm8 }
 0x863   : > { %3059 = vmatmul.f32.gmra.mxu2 %v2995_v30  ;;  %v2986_v29 = vadd.f32 1.0, %v3505_v21  ;;  %v2896_v1 = vor.u32 1.1754944e-38, %v2895_v3  ;;  %v2892_v61 = vsel %vm2891_vm10, %v3719_v54, %v2888_v22  ;;  %vm2894_vm12 = vcmp.eq.f32.partialorder %v2893_v32, 8.507059e+37 }
 0x864   : > { %v2987_v5 = vadd.f32 1.0, %v3506_v31  ;;  %v2925_v40 = vmul.f32 %v3721_v28, %v5034_v34  ;;  %3722 = vrcp.f32 %v2963_v17  ;;  %v2912_v53 = vadd.f32 1.1283791, %v2911_v41 }
 0x865   : > { %v2996_v45 = vmul.f32 %v2986_v29, %v2566_v0  ;;  %v2897_v16 = vsel %vm2894_vm12, %v2896_v1, %v2892_v61  ;;  %v2950_v7 = vadd.f32 0.18741608, %v2949_v49  ;;  %v2935_v50 = vand.u32 2147483648, %v5034_v34 }
 0x866   : > { %v2997_v12 = vmul.f32 %v2987_v5, %v2567_v10  ;;  %v2898_v59 = vmul.f32 %v2897_v16, %v2873_v13  ;;  %v2926_v9 = vsub.f32 1.0, %v2925_v40  ;;  %vm2930_vm13 = vweird.f32 %v3721_v28 }
 0x867   : > { %3091 = vmatmul.f32.gmra.mxu3 %v2996_v45  ;;  %v2933_v52 = vand.u32 2147483647, %v5034_v34  ;;  %v2568_v58 = vmul.f32 0.5, %v4841_v36  ;;  %vm2929_vm14 = vweird.f32 %v5034_v34  ;;  %v2913_v26 = vmul.f32 %v2912_v53, %v4881_v11 }
 0x868   : > { %v3507_v37 = vclamps-f32 %v2898_v59, 1.0  ;;  %v2927_v39 = vmul.f32 %v3721_v28, %v2926_v9  ;;  %v2951_v62 = vmul.f32 %v2950_v7, %v4899_v6  ;;  %vm2931_vm15 = vmor %vm2929_vm14, %vm2930_vm13  ;;  %v2936_v4 = vor.u32 1.1754944e-38, %v2935_v50 }
 0x869   : > { %vm2934_vm0 = vcmp.eq.f32.partialorder %v2933_v52, 8.507059e+37  ;;  %v2975_v32 = vand.u32 2147483648, %v2963_v17  ;;  %v2973_v34 = vand.u32 2147483647, %v2963_v17  ;;  %v2569_v11 = vmul.f32 0.5, %v4867_v63 }
 0x86a   : > { %v2988_v27 = vadd.f32 1.0, %v3507_v37  ;;  %v2928_v15 = vadd.f32 %v3721_v28, %v2927_v39  ;;  %v3723_v54 = vpop.eup %3722  ;;  %v2952_v36 = vadd.f32 1.1283791, %v2951_v62  ;;  %vm2969_vm2 = vweird.f32 %v2963_v17  ;;  %v3601_v63 = vld [vmem:[%s5219_s23] ss:$0 sm:$0xff] }
 0x86b   : > { %3062 = vmatmul.f32.gmra.mxu2 %v2997_v12  ;;  %v2965_v18 = vmul.f32 %v3723_v54, %v2963_v17  ;;  %vm2970_vm1 = vweird.f32 %v3723_v54  ;;  %v2976_v33 = vor.u32 1.1754944e-38, %v2975_v32  ;;  %vm2974_vm6 = vcmp.eq.f32.partialorder %v2973_v34, 8.507059e+37 }
 0x86c   : > { %v2998_v35 = vmul.f32 %v2988_v27, %v2568_v58  ;;  %v2932_v2 = vsel %vm2931_vm15, %v3721_v28, %v2928_v15  ;;  %vm2971_vm5 = vmor %vm2969_vm2, %vm2970_vm1  ;;  %v2953_v56 = vmul.f32 %v2952_v36, %v4885_v24  ;;  %v2570_v20 = vmul.f32 0.5, %v4872_v19 }
 0x86d   : > { %v2937_v57 = vsel %vm2934_vm0, %v2936_v4, %v2932_v2  ;;  %v2966_v60 = vsub.f32 1.0, %v2965_v18 }
 0x86e   : > { %v2938_v8 = vmul.f32 %v2937_v57, %v2913_v26 }
 0x86f   : > { %3094 = vmatmul.f32.gmra.mxu3 %v2998_v35  ;;  %v2967_v46 = vmul.f32 %v3723_v54, %v2966_v60 }
 0x870   : > { %v3508_v38 = vclamps-f32 %v2938_v8, 1.0 }
 0x871   : > { %v2968_v6 = vadd.f32 %v3723_v54, %v2967_v46 }
 0x872   : > { %v2989_v14 = vadd.f32 1.0, %v3508_v38 }
 0x873   : > { %v2972_v3 = vsel %vm2971_vm5, %v3723_v54, %v2968_v6 }
 0x874   : > { %v2999_v55 = vmul.f32 %v2989_v14, %v2569_v11  ;;  %v2977_v30 = vsel %vm2974_vm6, %v2976_v33, %v2972_v3 }
 0x875   : > { %v2978_v25 = vmul.f32 %v2977_v30, %v2953_v56 }
 0x876   : > { %3065 = vmatmul.f32.gmra.mxu2 %v2999_v55 }
 0x877   : > { %v3509_v43 = vclamps-f32 %v2978_v25, 1.0 }
 0x879   : > { %v2990_v0 = vadd.f32 1.0, %v3509_v43 }
 0x87b   : > { %v3000_v10 = vmul.f32 %v2990_v0, %v2570_v20 }
 0x87d   : > { %3097 = vmatmul.f32.gmra.mxu3 %v3000_v10 }
 0x895   : > { %v3054_v13 = vpop.f32.mrf.mxu2 }
 0x896   : > { %v3055_v21 = vadd.f32 %v3601_v63, %v3054_v13  ;;  %v3086_v24 = vpop.f32.mrf.mxu3 }
 0x898   : > { %v3087_v31 = vadd.f32 %v3086_v24, %v3055_v21 }
 0x89a   : > { %v3101_v22 = vadd.f32 %v3087_v31, %v4593_v42 }
 0x89c   : > { %3106 = vst.msk [vmem:[#allocation2] sm:$0xff] %vm1104_vm3, %v3101_v22 }
 0x8cd   : > { %v3057_v17 = vpop.f32.mrf.mxu2 }
 0x8ce   : > { %v3058_v28 = vadd.f32 %v3601_v63, %v3057_v17 }
 0x8d0   : > { %v3089_v41 = vpop.f32.mrf.mxu3 }
 0x8d1   : > { %v3090_v19 = vadd.f32 %v3089_v41, %v3058_v28 }
 0x8d3   : > { %v3102_v49 = vadd.f32 %v3090_v19, %v4597_v51 }
 0x8d5   : > { %3107 = vst.msk [vmem:[#allocation2 + $0x8] sm:$0xff] %vm1104_vm3, %v3102_v49 }
 0x8e6   : > { %v3060_v29 = vpop.f32.mrf.mxu2 }
 0x8e7   : > { %v3061_v1 = vadd.f32 %v3601_v63, %v3060_v29 }
 0x8ea   : > { %v3092_v5 = vpop.f32.mrf.mxu3 }
 0x8eb   : > { %v3093_v61 = vadd.f32 %v3092_v5, %v3061_v1 }
 0x8ed   : > { %v3103_v40 = vadd.f32 %v3093_v61, %v4601_v23 }
 0x8ee   : > { %v3063_v45 = vpop.f32.mrf.mxu2 }
 0x8ef   : > { %3108 = vst.msk [vmem:[#allocation2 + $0x10] sm:$0xff] %vm1104_vm3, %v3103_v40  ;;  %v3064_v42 = vadd.f32 %v3601_v63, %v3063_v45 }
 0x8f2   : > { %v3095_v16 = vpop.f32.mrf.mxu3 }
 0x8f3   : > { %v3096_v12 = vadd.f32 %v3095_v16, %v3064_v42 }
 0x8f5   : > { %v3104_v59 = vadd.f32 %v3096_v12, %v4605_v48 }
 0x8f7   : > { %3109 = vst.msk [vmem:[#allocation2 + $0x18] sm:$0xff] %vm1104_vm3, %v3104_v59 }
 0x8f9   : > { %v3066_v9 = vpop.f32.mrf.mxu2 }
 0x8fa   : > { %v3067_v51 = vadd.f32 %v3601_v63, %v3066_v9 }
 0x900   : > { %v3098_v53 = vpop.f32.mrf.mxu3 }
 0x901   : > { %v3099_v7 = vadd.f32 %v3098_v53, %v3067_v51  ;;  %3114 = sbr.rel (%p3510_p5) target bundleno = 2707 (0xa93), region = 132 }
 0x903   : > { %v3105_v50 = vadd.f32 %v3099_v7, %v4609_v47 }
 0x905   : > { %3110 = vst.msk [vmem:[#allocation2 + $0x20] sm:$0x3] %vm1117_vm4, %v3105_v50 }
 0x906   : > { %v3117_v23 = vsel %vm1117_vm4, %v3105_v50, 0.0  ;;  %v3154_v47 = vld [vmem:[%s5220_s2 + $0x38] sm:$0xff]  ;;  %v3153_v27 = vld [vmem:[%s5220_s2 + $0x30] sm:$0xff]  ;;  %v3152_v15 = vld [vmem:[%s5220_s2 + $0x28] sm:$0xff] }
 0x907   : > { %3118 = vadd.xlane.f32.xlu0 %v3117_v23  ;;  %3170 = vmatpush.msra.mxu0 %v3154_v47  ;;  %v3151_v54 = vld [vmem:[%s5220_s2 + $0x20] sm:$0xff]  ;;  %v3150_v26 = vld [vmem:[%s5220_s2 + $0x18] sm:$0xff]  ;;  %v3149_v62 = vld [vmem:[%s5220_s2 + $0x10] sm:$0xff] }
 0x908   : > { %v3148_v4 = vld [vmem:[%s5220_s2 + $0x8] sm:$0xff]  ;;  %v3147_v35 = vld [vmem:[%s5220_s2] sm:$0xff] }
 0x909   : > { %3171 = vmatpush.msra.mxu0 %v3153_v27  ;;  %v3729_v34 = vld [vmem:[%s5221_s30] ss:$0 sm:$0xff] }
 0x90a   : > { %v3731_v56 = vld [vmem:[%s5223_s12] ss:$0 sm:$0xff] }
 0x90b   : > { %3172 = vmatpush.msra.mxu0 %v3152_v15 }
 0x90d   : > { %3173 = vmatpush.msra.mxu0 %v3151_v54 }
 0x90f   : > { %3174 = vmatpush.msra.mxu0 %v3150_v26 }
 0x911   : > { %3175 = vmatpush.msra.mxu0 %v3149_v62 }
 0x913   : > { %3176 = vmatpush.msra.mxu0 %v3148_v4 }
 0x915   : > { %3177 = vmatpush.msra.mxu0 %v3147_v35 }
 0x97a   : > { %v3119_v37 = vpop.xlane.xlu0 %3118 }
 0x97b   : > { %v3120_v39 = vmul.f32 %v3119_v37, %v4060_v44 }
 0x97d   : > { %v3121_v48 = vsub.f32 %v3105_v50, %v3120_v39 }
 0x97f   : > { %v3122_v52 = vmul.f32 %v3121_v48, %v3121_v48 }
 0x981   : > { %v3123_v58 = vsel %vm1117_vm4, %v3122_v52, 0.0 }
 0x982   : > { %3124 = vadd.xlane.f32.xlu0 %v3123_v58 }
 0x9f5   : > { %v3125_v2 = vpop.xlane.xlu0 %3124 }
 0x9f6   : > { %v3126_v18 = vmul.f32 %v3125_v2, %v4060_v44  ;;  %v3730_v44 = vld [vmem:[%s5222_s26] ss:$0 sm:$0xff] }
 0x9f8   : > { %v3127_v57 = vadd.f32 1e-06, %v3126_v18 }
 0x9fa   : > { %3732 = vrsqrt.f32 %v3127_v57  ;;  %vm3134_vm7 = vweird.f32 %v3127_v57 }
 0xa00   : > { %v3733_v8 = vpop.eup %3732 }
 0xa01   : > { %v3129_v60 = vmul.f32 %v3733_v8, %v3127_v57  ;;  %vm3135_vm4 = vweird.f32 %v3733_v8 }
 0xa02   : > { %vm3136_vm8 = vmor %vm3134_vm7, %vm3135_vm4 }
 0xa03   : > { %v3130_v36 = vmul.f32 %v3733_v8, %v3129_v60 }
 0xa05   : > { %v3131_v32 = vmul.f32 0.5, %v3130_v36 }
 0xa07   : > { %v3132_v38 = vsub.f32 1.5, %v3131_v32 }
 0xa09   : > { %v3133_v46 = vmul.f32 %v3733_v8, %v3132_v38 }
 0xa0b   : > { %v3137_v11 = vsel %vm3136_vm8, %v3733_v8, %v3133_v46 }
 0xa0c   : > { %v3138_v14 = vmul.f32 %v3137_v11, %v3121_v48 }
 0xa0e   : > { %v3142_v6 = vmul.f32 %v3729_v34, %v3138_v14 }
 0xa10   : > { %v3146_v33 = vadd.f32 %v3730_v44, %v3142_v6 }
 0xa12   : > { %3511 = vmatmul.msk.f32.vlgmr.msra.gmra.mxu0 %vm1104_vm3, %v3146_v33 }
 0xa8f   : > { %v3179_v55 = vpop.f32.mrf.mxu0 }
 0xa90   : > { %v3180_v3 = vadd.f32 %v3731_v56, %v3179_v55 }
 0xa92   : > { %3182 = vst.msk [vmem:[#allocation4] sm:$0x3] %vm1576_vm11, %v3180_v3 }
 0xa93 PF: > { %p3544_p6 = scmp.eq.s32.totalorder %s3923_s3, 1  ;;  %s3781_s25 = smov [#allocation4]  }
 0xa94   : > { %s3189_s4 = sshll.u32 %s3781_s25, 4  ;;  %s5224_s22 = sld [smem:[#allocation25_spill]]  ;;  %s3190_s4 = int_to_ptr.vmem [resolvable:$true] %s3189_s4 }
 0xa9a   : > { %s3191_s0 = sshll.u32 %s5224_s22, 4  ;;  %s3192_s0 = int_to_ptr.hbm [resolvable:$true] %s3191_s0 }
 0xa9b   : > { %3541 = dma.vmem_to_hbm [thread:$0]  (%p3544_p6), %s3190_s4, 32, %s3192_s0, [#allocation5]  }
 0xa9c   : > { %3767 = dma.done.wait (%p3544_p6), [#allocation5], 32  }
 0xa9d   : > { %3769 = vsyncadd (%p3544_p6), [#allocation5], 4294967264 }
 0xa9e PF: > { %s5225_s23 = sld [smem:[#allocation7_spill]] }
 0xaa4   : > { %s37_s27 = sadd.s32 1, %s5225_s23  }
 0xaa5   : > { %p34_p7 = scmp.ge.s32.totalorder %s37_s27, 4  }
 0xaa7   :  { %36 = sbr.rel (!%p34_p7) target bundleno = 20 (0x14), region = 204 }
 0xaac   :  { %3205 = vsyncpa [#allocation5], 1 }
 0xaad   :  { %3207 = vsyncpa [#allocation5 + $0x1], 1 }

</bundles_post_ra>
